<compile_context>
chip_gen: v5e
topology: v5e:2x2
jax: 0.10.0
libtpu: 0.0.40
codegen_flags: <defaults>
</compile_context>

<pallas_src>
import jax
import jax.numpy as jnp
from jax.experimental import pallas as pl
from jax.experimental.pallas import tpu as pltpu


# ---------------------------------------------------------------------------
# Generation-aware compiler params
# ---------------------------------------------------------------------------
def _vmem_limit_bytes():
    cap = None
    try:
        info = pltpu.get_tpu_info()
        cap = getattr(info, "vmem_capacity_bytes", None)
    except Exception:
        cap = None
    if not cap:
        cap = 128 * 1024 * 1024
    # v5e/v6e (128 MiB) -> 64 MiB scoped; v7x (64 MiB per TC) -> 32 MiB scoped.
    return int(min(cap // 2, 64 * 1024 * 1024))


_VMEM_LIMIT = _vmem_limit_bytes()


def _compiler_params(semantics):
    return pltpu.CompilerParams(dimension_semantics=semantics,
                                vmem_limit_bytes=_VMEM_LIMIT)


# ---------------------------------------------------------------------------
# Fused conv_block_nested kernel
#   conv1(3x3)+bias -> identity; BN1+ReLU; conv2(3x3, BN2 folded); +identity; ReLU
#   * multiple input sources (the torch.cat constituents) enter as separate refs
#   * nb images are folded into one block when HW % 8 == 0 (MXU M-fill)
#   * dx taps are NOT masked on the input; the correction is applied on the
#     (M, Cout) output with two column masks.
# ---------------------------------------------------------------------------
def _conv_block_kernel(H, W, nb, cins, cmid, cout):
    HW = H * W
    M = nb * HW
    has_dx = W > 1
    has_dy = H > 1
    dxs = (0, 1, 2) if has_dx else (1,)
    dys = (0, 1, 2) if has_dy else (1,)
    n_src = len(cins)
    offs, o = [], 0
    for c in cins:
        offs.append(o)
        o += c

    def make_slabs(v, C):
        """v: (nb, HW, C) f32 -> {(dy,dx): shifted slab}.  Row (dy) boundaries are
        handled by per-image zero padding; column (dx) boundaries are fixed later
        on the conv output."""
        slabs = {(1, 1): v}
        if not (has_dx or has_dy):
            return slabs

        def z(rows):
            return jnp.zeros((nb, rows, C), v.dtype)

        if has_dy:
            for dx in dxs:
                top = W + 1 - dx            # asymmetric pad -> dy slices are
                bot = W - 1 + dx            # aligned offsets (multiples of W)
                parts = ([z(top)] if top else []) + [v] + ([z(bot)] if bot else [])
                vp = jnp.concatenate(parts, axis=1)
                for dy in dys:
                    if (dy, dx) == (1, 1):
                        continue
                    slabs[(dy, dx)] = vp[:, dy * W: dy * W + HW, :]
        else:  # H == 1, W > 1: only +/-1 column shifts are needed.
            zz = z(1)
            slabs[(1, 0)] = jnp.concatenate([zz, v[:, :HW - 1, :]], axis=1)
            slabs[(1, 2)] = jnp.concatenate([v[:, 1:, :], zz], axis=1)
        return slabs

    def conv3x3(srcs, w_ref, n_out):
        """srcs: list of (v (nb,HW,C) f32, C, w-row-offset).  Returns per-dx f32
        accumulators of shape (M, n_out)."""
        accs = {dx: jnp.zeros((M, n_out), jnp.float32) for dx in dxs}
        for v, C, off in srcs:
            slabs = make_slabs(v, C)
            for (dy, dx), slab in slabs.items():
                w_tile = w_ref[dy * 3 + dx, off:off + C, :]          # (C, n_out) bf16
                a = slab.reshape(M, C).astype(jnp.bfloat16)
                accs[dx] = accs[dx] + jnp.dot(a, w_tile,
                                              preferred_element_type=jnp.float32)
        return accs

    def combine(accs, ml, mr):
        out = accs[1]
        if has_dx:   # zero contributions that crossed the left / right image edge
            out = out + ml * accs[0] + mr * accs[2]
        return out

    def kernel(*refs):
        x_refs = refs[:n_src]
        idx = n_src
        if has_dx:
            m = refs[idx][...]                    # (M, 2) f32 in {0,1}
            ml, mr = m[:, 0:1], m[:, 1:2]
            idx += 1
        else:
            ml = mr = None
        w1_ref, b1_ref, s1_ref, t1_ref, w2_ref, b2_ref = refs[idx:idx + 6]
        o_ref = refs[-1]

        srcs = [(x_refs[i][...].astype(jnp.float32), cins[i], offs[i])
                for i in range(n_src)]

        pre = combine(conv3x3(srcs, w1_ref, cmid), ml, mr) + b1_ref[...]   # identity
        h1 = jnp.maximum(pre * s1_ref[...] + t1_ref[...], 0.0)            # BN1+ReLU
        y2 = combine(conv3x3([(h1.reshape(nb, HW, cmid), cmid, 0)],
                             w2_ref, cout), ml, mr) + b2_ref[...]          # conv2 (+BN2)
        out = jnp.maximum(y2 + pre, 0.0)
        o_ref[...] = out.reshape(nb, HW, cout).astype(o_ref.dtype)

    return kernel


def _batch_fold(n, hw):
    """Fold several images per grid step when the flattened spatial size is
    tile-aligned (keeps all in-kernel reshapes free) to fill the MXU M dim."""
    if hw >= 256 or hw % 8 != 0:
        return 1
    nb = min(n, max(1, 256 // hw))
    while nb > 1 and n % nb != 0:
        nb -= 1
    return nb


def conv_block_nested_fwd(params, inputs, out_dtype=jnp.bfloat16):
    """conv_block_nested on the channel-concat of `inputs` (list of NHWC arrays,
    any float dtype).  The concat never hits HBM: each source is a separate
    kernel input and w1 is sliced per source inside the kernel."""
    if not isinstance(inputs, (list, tuple)):
        inputs = [inputs]
    n, h, w = inputs[0].shape[:3]
    cins = tuple(int(t.shape[-1]) for t in inputs)
    hw = h * w
    cmid = params["w1"].shape[2]
    cout = params["w2"].shape[2]
    cin_total = sum(cins)
    assert cin_total == params["w1"].shape[1]
    nb = _batch_fold(n, hw)
    m = nb * hw

    args = [t.reshape(n, hw, c) for t, c in zip(inputs, cins)]
    in_specs = [pl.BlockSpec((nb, hw, c), lambda i: (i, 0, 0)) for c in cins]

    if w > 1:
        col = jnp.arange(hw, dtype=jnp.int32) % w
        mhw = jnp.stack([(col >= 1), (col <= w - 2)], axis=1).astype(jnp.float32)
        args.append(jnp.tile(mhw, (nb, 1)))                       # (m, 2)
        in_specs.append(pl.BlockSpec((m, 2), lambda i: (0, 0)))

    args += [params["w1"], params["b1"], params["s1"], params["t1"],
             params["w2"], params["b2"]]
    in_specs += [
        pl.BlockSpec((9, cin_total, cmid), lambda i: (0, 0, 0)),  # w1 (bf16)
        pl.BlockSpec((1, cmid), lambda i: (0, 0)),                # b1
        pl.BlockSpec((1, cmid), lambda i: (0, 0)),                # BN1 scale
        pl.BlockSpec((1, cmid), lambda i: (0, 0)),                # BN1 shift
        pl.BlockSpec((9, cmid, cout), lambda i: (0, 0, 0)),       # w2*s2 (bf16)
        pl.BlockSpec((1, cout), lambda i: (0, 0)),                # b2*s2+t2
    ]

    out = pl.pallas_call(
        _conv_block_kernel(h, w, nb, cins, cmid, cout),
        out_shape=jax.ShapeDtypeStruct((n, hw, cout), out_dtype),
        grid=(n // nb,),
        in_specs=in_specs,
        out_specs=pl.BlockSpec((nb, hw, cout), lambda i: (i, 0, 0)),
        compiler_params=_compiler_params(("parallel",)),
    )(*args)
    return out.reshape(n, h, w, cout)


# ---------------------------------------------------------------------------
# Pairwise L2 distance over the 5 (resized, bf16) feature levels,
# tiled over pixels; the 992-channel concat never hits HBM.
# ---------------------------------------------------------------------------
def _distance_kernel(*refs):
    o_ref = refs[-1]
    total = None
    for f in refs[:-1]:
        d = f[0].astype(jnp.float32) - f[1].astype(jnp.float32) + 1e-6  # F.pairwise_distance eps
        s = jnp.sum(d * d, axis=1, keepdims=True)
        total = s if total is None else total + s
    o_ref[...] = jnp.sqrt(total)


def _pixel_tile(m):
    for cand in (2048, 1024, 512, 256, 128, 64, 32, 16, 8):
        if m % cand == 0:
            return cand
    return m


def get_distance(feats, out_h, out_w):
    b = feats[0].shape[0] // 2
    m = b * out_h * out_w
    tm = _pixel_tile(m)
    resized = []
    for f in feats:
        if f.shape[1] == out_h and f.shape[2] == out_w:
            r = f
        else:
            r = bilinear_resize(f.astype(jnp.float32), out_h, out_w,
                                align_corners=False).astype(jnp.bfloat16)
        resized.append(r.reshape(2, m, r.shape[-1]))   # (2 halves, pixels, C_l)

    out = pl.pallas_call(
        _distance_kernel,
        out_shape=jax.ShapeDtypeStruct((m, 1), jnp.float32),
        grid=(m // tm,),
        in_specs=[pl.BlockSpec((2, tm, r.shape[-1]), lambda i: (0, i, 0))
                  for r in resized],
        out_specs=pl.BlockSpec((tm, 1), lambda i: (i, 0)),
        compiler_params=_compiler_params(("parallel",)),
    )(*resized)
    return out.reshape(b, out_h, out_w, 1)


# ---------------------------------------------------------------------------
# JAX glue: pooling and PyTorch-exact bilinear resizing
# ---------------------------------------------------------------------------
def maxpool2(x):  # MaxPool2d(kernel_size=2, stride=2), NHWC
    n, h, w, c = x.shape
    return x.reshape(n, h // 2, 2, w // 2, 2, c).max(axis=(2, 4))


def _src_index(out_size, in_size, align_corners):
    i = jnp.arange(out_size, dtype=jnp.float32)
    if align_corners:
        scale = (in_size - 1) / (out_size - 1) if out_size > 1 else 0.0
        src = i * scale
    else:
        scale = in_size / out_size
        src = jnp.maximum(scale * (i + 0.5) - 0.5, 0.0)
    i0 = jnp.clip(jnp.floor(src).astype(jnp.int32), 0, in_size - 1)
    i1 = jnp.minimum(i0 + 1, in_size - 1)
    frac = jnp.clip(src - i0.astype(jnp.float32), 0.0, 1.0)
    return i0, i1, frac


def bilinear_resize(x, out_h, out_w, align_corners):
    """PyTorch-semantics bilinear resize, NHWC (JAX glue)."""
    n, h, w, c = x.shape
    y0, y1, fy = _src_index(out_h, h, align_corners)
    x0, x1, fx = _src_index(out_w, w, align_corners)
    fy = fy[None, :, None, None]
    fx = fx[None, None, :, None]
    r0 = x[:, y0, :, :]
    r1 = x[:, y1, :, :]
    top = r0[:, :, x0, :] * (1.0 - fx) + r0[:, :, x1, :] * fx
    bot = r1[:, :, x0, :] * (1.0 - fx) + r1[:, :, x1, :] * fx
    return top * (1.0 - fy) + bot * fy


def _up2x(x):  # up(..., bilinear=True): Upsample(scale=2, align_corners=True)
    return bilinear_resize(x.astype(jnp.float32), x.shape[1] * 2, x.shape[2] * 2,
                           align_corners=True).astype(x.dtype)


# ---------------------------------------------------------------------------
# Parameters (deterministic, matching module __init__ shapes / init scheme)
# ---------------------------------------------------------------------------
def _init_conv_block(key, cin, cout):
    cmid = cout
    k1, k2, k3, k4 = jax.random.split(key, 4)

    def conv_w(k, ci, co):  # kaiming_normal_, mode='fan_out', nonlinearity='relu'
        std = (2.0 / (co * 9)) ** 0.5
        return jax.random.normal(k, (3, 3, ci, co), jnp.float32) * std

    def conv_b(k, ci, co):  # PyTorch Conv2d default bias init
        bound = 1.0 / (ci * 9) ** 0.5
        return jax.random.uniform(k, (1, co), jnp.float32, -bound, bound)

    eps = 1e-5  # BatchNorm2d eval: gamma=1, beta=0, running mean/var = 0/1
    bn_scale = 1.0 / (1.0 + eps) ** 0.5

    w1 = conv_w(k1, cin, cmid).reshape(9, cin, cmid)   # tap = dy*3+dx
    b1 = conv_b(k2, cin, cmid)
    w2 = conv_w(k3, cmid, cout).reshape(9, cmid, cout)
    b2 = conv_b(k4, cmid, cout)

    return dict(
        w1=w1.astype(jnp.bfloat16),
        b1=b1,
        s1=jnp.full((1, cmid), bn_scale, jnp.float32),
        t1=jnp.zeros((1, cmid), jnp.float32),
        # BN2 (eval mode) folded into conv2 weights / bias.
        w2=(w2 * bn_scale).astype(jnp.bfloat16),
        b2=b2 * bn_scale,  # + beta2 (= 0)
    )


def init_params(key, in_ch=3, n1=32):
    f = [n1, n1 * 2, n1 * 4, n1 * 8, n1 * 16]
    specs = {
        "conv0_0": (in_ch, f[0]),
        "conv1_0": (f[0], f[1]),
        "conv2_0": (f[1], f[2]),
        "conv3_0": (f[2], f[3]),
        "conv4_0": (f[3], f[4]),
        "conv0_1": (f[0] * 2 + f[1], f[0]),
        "conv1_1": (f[1] * 2 + f[2], f[1]),
        "conv2_1": (f[2] * 2 + f[3], f[2]),
        "conv3_1": (f[3] * 2 + f[4], f[3]),
        "conv0_2": (f[0] * 3 + f[1], f[0]),
        "conv1_2": (f[1] * 3 + f[2], f[1]),
        "conv2_2": (f[2] * 3 + f[3], f[2]),
        "conv0_3": (f[0] * 4 + f[1], f[0]),
        "conv1_3": (f[1] * 4 + f[2], f[1]),
        "conv0_4": (f[0] * 5 + f[1], f[0]),
    }
    names = sorted(specs)
    keys = jax.random.split(key, len(names))
    return {name: _init_conv_block(k, *specs[name]) for name, k in zip(names, keys)}


# ---------------------------------------------------------------------------
# Forward pass (SiameseCGNet.forward, diffFPN=False)
# ---------------------------------------------------------------------------
def siamese_cgnet_forward(params, x):
    b = x.shape[0] // 2
    h, w = x.shape[1:3]
    f32 = jnp.float32

    def blk(name, ts, out_dtype=jnp.bfloat16):
        return conv_block_nested_fwd(params[name], ts, out_dtype=out_dtype)

    x0_0 = blk("conv0_0", [x])
    x1_0 = blk("conv1_0", [maxpool2(x0_0)])
    x2_0 = blk("conv2_0", [maxpool2(x1_0)])
    x3_0 = blk("conv3_0", [maxpool2(x2_0)])
    x4_0 = blk("conv4_0", [maxpool2(x3_0)])

    x0_0A, x0_0B = x0_0[:b], x0_0[b:]
    x1_0A, x1_0B = x1_0[:b], x1_0[b:]
    x2_0A, x2_0B = x2_0[:b], x2_0[b:]
    x3_0A, x3_0B = x3_0[:b], x3_0[b:]
    x4_0B = x4_0[b:]

    distance = get_distance((x0_0, x1_0, x2_0, x3_0, x4_0), h, w)

    x0_1 = blk("conv0_1", [x0_0A, x0_0B, _up2x(x1_0B)], out_dtype=f32)
    x1_1 = blk("conv1_1", [x1_0A, x1_0B, _up2x(x2_0B)])
    x0_2 = blk("conv0_2", [x0_0A, x0_0B, x0_1, _up2x(x1_1)], out_dtype=f32)
    x2_1 = blk("conv2_1", [x2_0A, x2_0B, _up2x(x3_0B)])
    x1_2 = blk("conv1_2", [x1_0A, x1_0B, x1_1, _up2x(x2_1)])
    x0_3 = blk("conv0_3", [x0_0A, x0_0B, x0_1, x0_2, _up2x(x1_2)], out_dtype=f32)
    x3_1 = blk("conv3_1", [x3_0A, x3_0B, _up2x(x4_0B)])
    x2_2 = blk("conv2_2", [x2_0A, x2_0B, x2_1, _up2x(x3_1)])
    x1_3 = blk("conv1_3", [x1_0A, x1_0B, x1_1, x1_2, _up2x(x2_2)])
    x0_4 = blk("conv0_4", [x0_0A, x0_0B, x0_1, x0_2, x0_3, _up2x(x1_3)], out_dtype=f32)

    return (x0_1, x0_2, x0_3, x0_4), distance


# ---------------------------------------------------------------------------
# Pure-JAX reference of one conv_block_nested (checks the Pallas lowering)
# ---------------------------------------------------------------------------
def _reference_block(params, x):
    def conv(inp, w9, bias):
        w = w9.astype(jnp.float32).reshape(3, 3, w9.shape[1], w9.shape[2])
        y = jax.lax.conv_general_dilated(
            inp, w, window_strides=(1, 1), padding="SAME",
            dimension_numbers=("NHWC", "HWIO", "NHWC"),
            precision=jax.lax.Precision.HIGHEST)
        return y + bias.reshape(1, 1, 1, -1)

    xb = x.astype(jnp.bfloat16).astype(jnp.float32)
    pre = conv(xb, params["w1"], params["b1"])
    h1 = jnp.maximum(pre * params["s1"].reshape(1, 1, 1, -1)
                     + params["t1"].reshape(1, 1, 1, -1), 0.0)
    h1 = h1.astype(jnp.bfloat16).astype(jnp.float32)
    y2 = conv(h1, params["w2"], params["b2"])
    return jnp.maximum(y2 + pre, 0.0)


if __name__ == "__main__":
    key = jax.random.PRNGKey(0)
    pkey, xkey = jax.random.split(key)
    params = init_params(pkey, in_ch=3, n1=32)

    B = 1           # number of siamese pairs; batch dim of x is 2*B
    H = W = 16
    x = jax.random.normal(xkey, (2 * B, H, W, 3), jnp.float32)  # NHWC

    # Numerics / lowering self-check of the fused conv block kernel (conv0_0).
    got = conv_block_nested_fwd(params["conv0_0"], [x], out_dtype=jnp.float32)
    want = _reference_block(params["conv0_0"], x)
    assert bool(jnp.allclose(got, want, atol=5e-2, rtol=5e-2)), "conv block mismatch"

    fwd = jax.jit(siamese_cgnet_forward)
    (x0_1, x0_2, x0_3, x0_4), distance = fwd(params, x)
    jax.block_until_ready((x0_1, x0_2, x0_3, x0_4, distance))

    assert x0_1.shape == (B, H, W, 32)
    assert x0_2.shape == (B, H, W, 32)
    assert x0_3.shape == (B, H, W, 32)
    assert x0_4.shape == (B, H, W, 32)
    assert distance.shape == (B, H, W, 1)
    assert all(bool(jnp.isfinite(t.astype(jnp.float32)).all())
               for t in (x0_1, x0_2, x0_3, x0_4, distance))
    print("KERNEL_OK")
</pallas_src>

<mosaic_0001>
module attributes {stable_mosaic.version = 11 : i64} {
  func.func @kernel(%arg0: i32, %arg1: memref<1x256x3xf32, #tpu.memory_space<vmem>>, %arg2: memref<256x2xf32, #tpu.memory_space<vmem>>, %arg3: memref<9x3x32xbf16, #tpu.memory_space<vmem>>, %arg4: memref<1x32xf32, #tpu.memory_space<vmem>>, %arg5: memref<1x32xf32, #tpu.memory_space<vmem>>, %arg6: memref<1x32xf32, #tpu.memory_space<vmem>>, %arg7: memref<9x32x32xbf16, #tpu.memory_space<vmem>>, %arg8: memref<1x32xf32, #tpu.memory_space<vmem>>, %arg9: memref<1x256x32xf32, #tpu.memory_space<vmem>>) attributes {dimension_semantics = [#tpu.dimension_semantics<parallel>], iteration_bounds = array<i64: 2>, scalar_prefetch = 0 : i64, scratch_operands = 0 : i64, tpu.core_type = #tpu.core_type<tc>, window_params = [{transform_indices = @transform_0, window_bounds = array<i64: 1, 256, 3>}, {pipeline_mode = #tpu.pipeline_mode<synchronous>, transform_indices = @transform_1, window_bounds = array<i64: 256, 2>}, {pipeline_mode = #tpu.pipeline_mode<synchronous>, transform_indices = @transform_2, window_bounds = array<i64: 9, 3, 32>}, {pipeline_mode = #tpu.pipeline_mode<synchronous>, transform_indices = @transform_3, window_bounds = array<i64: 1, 32>}, {pipeline_mode = #tpu.pipeline_mode<synchronous>, transform_indices = @transform_4, window_bounds = array<i64: 1, 32>}, {pipeline_mode = #tpu.pipeline_mode<synchronous>, transform_indices = @transform_5, window_bounds = array<i64: 1, 32>}, {pipeline_mode = #tpu.pipeline_mode<synchronous>, transform_indices = @transform_6, window_bounds = array<i64: 9, 32, 32>}, {pipeline_mode = #tpu.pipeline_mode<synchronous>, transform_indices = @transform_7, window_bounds = array<i64: 1, 32>}, {transform_indices = @transform_8, window_bounds = array<i64: 1, 256, 32>}]} {
    %c0 = arith.constant 0 : index
    %c0_0 = arith.constant 0 : index
    %0 = vector.load %arg2[%c0, %c0_0] : memref<256x2xf32, #tpu.memory_space<vmem>>, vector<256x2xf32>
    %1 = vector.extract_strided_slice %0 {offsets = [0, 0], sizes = [256, 1], strides = [1, 1]} : vector<256x2xf32> to vector<256x1xf32>
    %2 = vector.extract_strided_slice %0 {offsets = [0, 1], sizes = [256, 1], strides = [1, 1]} : vector<256x2xf32> to vector<256x1xf32>
    %c0_1 = arith.constant 0 : index
    %c0_2 = arith.constant 0 : index
    %c0_3 = arith.constant 0 : index
    %3 = vector.load %arg1[%c0_1, %c0_2, %c0_3] : memref<1x256x3xf32, #tpu.memory_space<vmem>>, vector<1x256x3xf32>
    %cst = arith.constant 0.000000e+00 : f32
    %4 = vector.broadcast %cst : f32 to vector<256x32xf32>
    %cst_4 = arith.constant 0.000000e+00 : f32
    %5 = vector.broadcast %cst_4 : f32 to vector<256x32xf32>
    %cst_5 = arith.constant 0.000000e+00 : f32
    %6 = vector.broadcast %cst_5 : f32 to vector<256x32xf32>
    %cst_6 = arith.constant 0.000000e+00 : f32
    %7 = vector.broadcast %cst_6 : f32 to vector<1x17x3xf32>
    %cst_7 = arith.constant 0.000000e+00 : f32
    %8 = vector.broadcast %cst_7 : f32 to vector<1x15x3xf32>
    %9 = tpu.concatenate %7, %3, %8 in 1 : vector<1x17x3xf32>, vector<1x256x3xf32>, vector<1x15x3xf32> -> vector<1x288x3xf32>
    %10 = vector.extract_strided_slice %9 {offsets = [0, 0, 0], sizes = [1, 256, 3], strides = [1, 1, 1]} : vector<1x288x3xf32> to vector<1x256x3xf32>
    %11 = vector.extract_strided_slice %9 {offsets = [0, 16, 0], sizes = [1, 256, 3], strides = [1, 1, 1]} : vector<1x288x3xf32> to vector<1x256x3xf32>
    %12 = vector.extract_strided_slice %9 {offsets = [0, 32, 0], sizes = [1, 256, 3], strides = [1, 1, 1]} : vector<1x288x3xf32> to vector<1x256x3xf32>
    %cst_8 = arith.constant 0.000000e+00 : f32
    %13 = vector.broadcast %cst_8 : f32 to vector<1x16x3xf32>
    %cst_9 = arith.constant 0.000000e+00 : f32
    %14 = vector.broadcast %cst_9 : f32 to vector<1x16x3xf32>
    %15 = tpu.concatenate %13, %3, %14 in 1 : vector<1x16x3xf32>, vector<1x256x3xf32>, vector<1x16x3xf32> -> vector<1x288x3xf32>
    %16 = vector.extract_strided_slice %15 {offsets = [0, 0, 0], sizes = [1, 256, 3], strides = [1, 1, 1]} : vector<1x288x3xf32> to vector<1x256x3xf32>
    %17 = vector.extract_strided_slice %15 {offsets = [0, 32, 0], sizes = [1, 256, 3], strides = [1, 1, 1]} : vector<1x288x3xf32> to vector<1x256x3xf32>
    %cst_10 = arith.constant 0.000000e+00 : f32
    %18 = vector.broadcast %cst_10 : f32 to vector<1x15x3xf32>
    %cst_11 = arith.constant 0.000000e+00 : f32
    %19 = vector.broadcast %cst_11 : f32 to vector<1x17x3xf32>
    %20 = tpu.concatenate %18, %3, %19 in 1 : vector<1x15x3xf32>, vector<1x256x3xf32>, vector<1x17x3xf32> -> vector<1x288x3xf32>
    %21 = vector.extract_strided_slice %20 {offsets = [0, 0, 0], sizes = [1, 256, 3], strides = [1, 1, 1]} : vector<1x288x3xf32> to vector<1x256x3xf32>
    %22 = vector.extract_strided_slice %20 {offsets = [0, 16, 0], sizes = [1, 256, 3], strides = [1, 1, 1]} : vector<1x288x3xf32> to vector<1x256x3xf32>
    %23 = vector.extract_strided_slice %20 {offsets = [0, 32, 0], sizes = [1, 256, 3], strides = [1, 1, 1]} : vector<1x288x3xf32> to vector<1x256x3xf32>
    %c4 = arith.constant 4 : index
    %c0_12 = arith.constant 0 : index
    %c0_13 = arith.constant 0 : index
    %24 = vector.load %arg3[%c4, %c0_12, %c0_13] : memref<9x3x32xbf16, #tpu.memory_space<vmem>>, vector<1x3x32xbf16>
    %25 = vector.shape_cast %24 : vector<1x3x32xbf16> to vector<3x32xbf16>
    %26 = vector.shape_cast %3 : vector<1x256x3xf32> to vector<256x3xf32>
    %27 = arith.truncf %26 : vector<256x3xf32> to vector<256x3xbf16>
    %cst_14 = arith.constant dense<0.000000e+00> : vector<256x32xf32>
    %28 = tpu.matmul %27, %25, %cst_14 {dimension_numbers = #tpu.dot_dimension_numbers<[1], [0], [0], [1], [0, 0, 1, 1], [], []>} : vector<256x3xbf16>, vector<3x32xbf16>, vector<256x32xf32> -> vector<256x32xf32>
    %29 = arith.addf %5, %28 : vector<256x32xf32>
    %c0_15 = arith.constant 0 : index
    %c0_16 = arith.constant 0 : index
    %c0_17 = arith.constant 0 : index
    %30 = vector.load %arg3[%c0_15, %c0_16, %c0_17] : memref<9x3x32xbf16, #tpu.memory_space<vmem>>, vector<1x3x32xbf16>
    %31 = vector.shape_cast %30 : vector<1x3x32xbf16> to vector<3x32xbf16>
    %32 = vector.shape_cast %10 : vector<1x256x3xf32> to vector<256x3xf32>
    %33 = arith.truncf %32 : vector<256x3xf32> to vector<256x3xbf16>
    %cst_18 = arith.constant dense<0.000000e+00> : vector<256x32xf32>
    %34 = tpu.matmul %33, %31, %cst_18 {dimension_numbers = #tpu.dot_dimension_numbers<[1], [0], [0], [1], [0, 0, 1, 1], [], []>} : vector<256x3xbf16>, vector<3x32xbf16>, vector<256x32xf32> -> vector<256x32xf32>
    %35 = arith.addf %4, %34 : vector<256x32xf32>
    %c3 = arith.constant 3 : index
    %c0_19 = arith.constant 0 : index
    %c0_20 = arith.constant 0 : index
    %36 = vector.load %arg3[%c3, %c0_19, %c0_20] : memref<9x3x32xbf16, #tpu.memory_space<vmem>>, vector<1x3x32xbf16>
    %37 = vector.shape_cast %36 : vector<1x3x32xbf16> to vector<3x32xbf16>
    %38 = vector.shape_cast %11 : vector<1x256x3xf32> to vector<256x3xf32>
    %39 = arith.truncf %38 : vector<256x3xf32> to vector<256x3xbf16>
    %cst_21 = arith.constant dense<0.000000e+00> : vector<256x32xf32>
    %40 = tpu.matmul %39, %37, %cst_21 {dimension_numbers = #tpu.dot_dimension_numbers<[1], [0], [0], [1], [0, 0, 1, 1], [], []>} : vector<256x3xbf16>, vector<3x32xbf16>, vector<256x32xf32> -> vector<256x32xf32>
    %41 = arith.addf %35, %40 : vector<256x32xf32>
    %c6 = arith.constant 6 : index
    %c0_22 = arith.constant 0 : index
    %c0_23 = arith.constant 0 : index
    %42 = vector.load %arg3[%c6, %c0_22, %c0_23] : memref<9x3x32xbf16, #tpu.memory_space<vmem>>, vector<1x3x32xbf16>
    %43 = vector.shape_cast %42 : vector<1x3x32xbf16> to vector<3x32xbf16>
    %44 = vector.shape_cast %12 : vector<1x256x3xf32> to vector<256x3xf32>
    %45 = arith.truncf %44 : vector<256x3xf32> to vector<256x3xbf16>
    %cst_24 = arith.constant dense<0.000000e+00> : vector<256x32xf32>
    %46 = tpu.matmul %45, %43, %cst_24 {dimension_numbers = #tpu.dot_dimension_numbers<[1], [0], [0], [1], [0, 0, 1, 1], [], []>} : vector<256x3xbf16>, vector<3x32xbf16>, vector<256x32xf32> -> vector<256x32xf32>
    %47 = arith.addf %41, %46 : vector<256x32xf32>
    %c1 = arith.constant 1 : index
    %c0_25 = arith.constant 0 : index
    %c0_26 = arith.constant 0 : index
    %48 = vector.load %arg3[%c1, %c0_25, %c0_26] : memref<9x3x32xbf16, #tpu.memory_space<vmem>>, vector<1x3x32xbf16>
    %49 = vector.shape_cast %48 : vector<1x3x32xbf16> to vector<3x32xbf16>
    %50 = vector.shape_cast %16 : vector<1x256x3xf32> to vector<256x3xf32>
    %51 = arith.truncf %50 : vector<256x3xf32> to vector<256x3xbf16>
    %cst_27 = arith.constant dense<0.000000e+00> : vector<256x32xf32>
    %52 = tpu.matmul %51, %49, %cst_27 {dimension_numbers = #tpu.dot_dimension_numbers<[1], [0], [0], [1], [0, 0, 1, 1], [], []>} : vector<256x3xbf16>, vector<3x32xbf16>, vector<256x32xf32> -> vector<256x32xf32>
    %53 = arith.addf %29, %52 : vector<256x32xf32>
    %c7 = arith.constant 7 : index
    %c0_28 = arith.constant 0 : index
    %c0_29 = arith.constant 0 : index
    %54 = vector.load %arg3[%c7, %c0_28, %c0_29] : memref<9x3x32xbf16, #tpu.memory_space<vmem>>, vector<1x3x32xbf16>
    %55 = vector.shape_cast %54 : vector<1x3x32xbf16> to vector<3x32xbf16>
    %56 = vector.shape_cast %17 : vector<1x256x3xf32> to vector<256x3xf32>
    %57 = arith.truncf %56 : vector<256x3xf32> to vector<256x3xbf16>
    %cst_30 = arith.constant dense<0.000000e+00> : vector<256x32xf32>
    %58 = tpu.matmul %57, %55, %cst_30 {dimension_numbers = #tpu.dot_dimension_numbers<[1], [0], [0], [1], [0, 0, 1, 1], [], []>} : vector<256x3xbf16>, vector<3x32xbf16>, vector<256x32xf32> -> vector<256x32xf32>
    %59 = arith.addf %53, %58 : vector<256x32xf32>
    %c2 = arith.constant 2 : index
    %c0_31 = arith.constant 0 : index
    %c0_32 = arith.constant 0 : index
    %60 = vector.load %arg3[%c2, %c0_31, %c0_32] : memref<9x3x32xbf16, #tpu.memory_space<vmem>>, vector<1x3x32xbf16>
    %61 = vector.shape_cast %60 : vector<1x3x32xbf16> to vector<3x32xbf16>
    %62 = vector.shape_cast %21 : vector<1x256x3xf32> to vector<256x3xf32>
    %63 = arith.truncf %62 : vector<256x3xf32> to vector<256x3xbf16>
    %cst_33 = arith.constant dense<0.000000e+00> : vector<256x32xf32>
    %64 = tpu.matmul %63, %61, %cst_33 {dimension_numbers = #tpu.dot_dimension_numbers<[1], [0], [0], [1], [0, 0, 1, 1], [], []>} : vector<256x3xbf16>, vector<3x32xbf16>, vector<256x32xf32> -> vector<256x32xf32>
    %65 = arith.addf %6, %64 : vector<256x32xf32>
    %c5 = arith.constant 5 : index
    %c0_34 = arith.constant 0 : index
    %c0_35 = arith.constant 0 : index
    %66 = vector.load %arg3[%c5, %c0_34, %c0_35] : memref<9x3x32xbf16, #tpu.memory_space<vmem>>, vector<1x3x32xbf16>
    %67 = vector.shape_cast %66 : vector<1x3x32xbf16> to vector<3x32xbf16>
    %68 = vector.shape_cast %22 : vector<1x256x3xf32> to vector<256x3xf32>
    %69 = arith.truncf %68 : vector<256x3xf32> to vector<256x3xbf16>
    %cst_36 = arith.constant dense<0.000000e+00> : vector<256x32xf32>
    %70 = tpu.matmul %69, %67, %cst_36 {dimension_numbers = #tpu.dot_dimension_numbers<[1], [0], [0], [1], [0, 0, 1, 1], [], []>} : vector<256x3xbf16>, vector<3x32xbf16>, vector<256x32xf32> -> vector<256x32xf32>
    %71 = arith.addf %65, %70 : vector<256x32xf32>
    %c8 = arith.constant 8 : index
    %c0_37 = arith.constant 0 : index
    %c0_38 = arith.constant 0 : index
    %72 = vector.load %arg3[%c8, %c0_37, %c0_38] : memref<9x3x32xbf16, #tpu.memory_space<vmem>>, vector<1x3x32xbf16>
    %73 = vector.shape_cast %72 : vector<1x3x32xbf16> to vector<3x32xbf16>
    %74 = vector.shape_cast %23 : vector<1x256x3xf32> to vector<256x3xf32>
    %75 = arith.truncf %74 : vector<256x3xf32> to vector<256x3xbf16>
    %cst_39 = arith.constant dense<0.000000e+00> : vector<256x32xf32>
    %76 = tpu.matmul %75, %73, %cst_39 {dimension_numbers = #tpu.dot_dimension_numbers<[1], [0], [0], [1], [0, 0, 1, 1], [], []>} : vector<256x3xbf16>, vector<3x32xbf16>, vector<256x32xf32> -> vector<256x32xf32>
    %77 = arith.addf %71, %76 : vector<256x32xf32>
    %78 = vector.broadcast %1 : vector<256x1xf32> to vector<256x32xf32>
    %79 = arith.mulf %78, %47 : vector<256x32xf32>
    %80 = arith.addf %59, %79 : vector<256x32xf32>
    %81 = vector.broadcast %2 : vector<256x1xf32> to vector<256x32xf32>
    %82 = arith.mulf %81, %77 : vector<256x32xf32>
    %83 = arith.addf %80, %82 : vector<256x32xf32>
    %c0_40 = arith.constant 0 : index
    %c0_41 = arith.constant 0 : index
    %84 = vector.load %arg4[%c0_40, %c0_41] : memref<1x32xf32, #tpu.memory_space<vmem>>, vector<1x32xf32>
    %85 = vector.broadcast %84 : vector<1x32xf32> to vector<256x32xf32>
    %86 = arith.addf %83, %85 : vector<256x32xf32>
    %c0_42 = arith.constant 0 : index
    %c0_43 = arith.constant 0 : index
    %87 = vector.load %arg5[%c0_42, %c0_43] : memref<1x32xf32, #tpu.memory_space<vmem>>, vector<1x32xf32>
    %88 = vector.broadcast %87 : vector<1x32xf32> to vector<256x32xf32>
    %89 = arith.mulf %86, %88 : vector<256x32xf32>
    %c0_44 = arith.constant 0 : index
    %c0_45 = arith.constant 0 : index
    %90 = vector.load %arg6[%c0_44, %c0_45] : memref<1x32xf32, #tpu.memory_space<vmem>>, vector<1x32xf32>
    %91 = vector.broadcast %90 : vector<1x32xf32> to vector<256x32xf32>
    %92 = arith.addf %89, %91 : vector<256x32xf32>
    %cst_46 = arith.constant 0.000000e+00 : f32
    %93 = vector.broadcast %cst_46 : f32 to vector<256x32xf32>
    %94 = arith.maximumf %92, %93 : vector<256x32xf32>
    %95 = vector.shape_cast %94 : vector<256x32xf32> to vector<1x256x32xf32>
    %cst_47 = arith.constant 0.000000e+00 : f32
    %96 = vector.broadcast %cst_47 : f32 to vector<256x32xf32>
    %cst_48 = arith.constant 0.000000e+00 : f32
    %97 = vector.broadcast %cst_48 : f32 to vector<256x32xf32>
    %cst_49 = arith.constant 0.000000e+00 : f32
    %98 = vector.broadcast %cst_49 : f32 to vector<256x32xf32>
    %cst_50 = arith.constant 0.000000e+00 : f32
    %99 = vector.broadcast %cst_50 : f32 to vector<1x17x32xf32>
    %cst_51 = arith.constant 0.000000e+00 : f32
    %100 = vector.broadcast %cst_51 : f32 to vector<1x15x32xf32>
    %101 = tpu.concatenate %99, %95, %100 in 1 : vector<1x17x32xf32>, vector<1x256x32xf32>, vector<1x15x32xf32> -> vector<1x288x32xf32>
    %102 = vector.extract_strided_slice %101 {offsets = [0, 0, 0], sizes = [1, 256, 32], strides = [1, 1, 1]} : vector<1x288x32xf32> to vector<1x256x32xf32>
    %103 = vector.extract_strided_slice %101 {offsets = [0, 16, 0], sizes = [1, 256, 32], strides = [1, 1, 1]} : vector<1x288x32xf32> to vector<1x256x32xf32>
    %104 = vector.extract_strided_slice %101 {offsets = [0, 32, 0], sizes = [1, 256, 32], strides = [1, 1, 1]} : vector<1x288x32xf32> to vector<1x256x32xf32>
    %cst_52 = arith.constant 0.000000e+00 : f32
    %105 = vector.broadcast %cst_52 : f32 to vector<1x16x32xf32>
    %cst_53 = arith.constant 0.000000e+00 : f32
    %106 = vector.broadcast %cst_53 : f32 to vector<1x16x32xf32>
    %107 = tpu.concatenate %105, %95, %106 in 1 : vector<1x16x32xf32>, vector<1x256x32xf32>, vector<1x16x32xf32> -> vector<1x288x32xf32>
    %108 = vector.extract_strided_slice %107 {offsets = [0, 0, 0], sizes = [1, 256, 32], strides = [1, 1, 1]} : vector<1x288x32xf32> to vector<1x256x32xf32>
    %109 = vector.extract_strided_slice %107 {offsets = [0, 32, 0], sizes = [1, 256, 32], strides = [1, 1, 1]} : vector<1x288x32xf32> to vector<1x256x32xf32>
    %cst_54 = arith.constant 0.000000e+00 : f32
    %110 = vector.broadcast %cst_54 : f32 to vector<1x15x32xf32>
    %cst_55 = arith.constant 0.000000e+00 : f32
    %111 = vector.broadcast %cst_55 : f32 to vector<1x17x32xf32>
    %112 = tpu.concatenate %110, %95, %111 in 1 : vector<1x15x32xf32>, vector<1x256x32xf32>, vector<1x17x32xf32> -> vector<1x288x32xf32>
    %113 = vector.extract_strided_slice %112 {offsets = [0, 0, 0], sizes = [1, 256, 32], strides = [1, 1, 1]} : vector<1x288x32xf32> to vector<1x256x32xf32>
    %114 = vector.extract_strided_slice %112 {offsets = [0, 16, 0], sizes = [1, 256, 32], strides = [1, 1, 1]} : vector<1x288x32xf32> to vector<1x256x32xf32>
    %115 = vector.extract_strided_slice %112 {offsets = [0, 32, 0], sizes = [1, 256, 32], strides = [1, 1, 1]} : vector<1x288x32xf32> to vector<1x256x32xf32>
    %c4_56 = arith.constant 4 : index
    %c0_57 = arith.constant 0 : index
    %c0_58 = arith.constant 0 : index
    %116 = vector.load %arg7[%c4_56, %c0_57, %c0_58] : memref<9x32x32xbf16, #tpu.memory_space<vmem>>, vector<1x32x32xbf16>
    %117 = vector.shape_cast %116 : vector<1x32x32xbf16> to vector<32x32xbf16>
    %118 = vector.shape_cast %95 : vector<1x256x32xf32> to vector<256x32xf32>
    %119 = arith.truncf %118 : vector<256x32xf32> to vector<256x32xbf16>
    %cst_59 = arith.constant dense<0.000000e+00> : vector<256x32xf32>
    %120 = tpu.matmul %119, %117, %cst_59 {dimension_numbers = #tpu.dot_dimension_numbers<[1], [0], [0], [1], [0, 0, 1, 1], [], []>} : vector<256x32xbf16>, vector<32x32xbf16>, vector<256x32xf32> -> vector<256x32xf32>
    %121 = arith.addf %97, %120 : vector<256x32xf32>
    %c0_60 = arith.constant 0 : index
    %c0_61 = arith.constant 0 : index
    %c0_62 = arith.constant 0 : index
    %122 = vector.load %arg7[%c0_60, %c0_61, %c0_62] : memref<9x32x32xbf16, #tpu.memory_space<vmem>>, vector<1x32x32xbf16>
    %123 = vector.shape_cast %122 : vector<1x32x32xbf16> to vector<32x32xbf16>
    %124 = vector.shape_cast %102 : vector<1x256x32xf32> to vector<256x32xf32>
    %125 = arith.truncf %124 : vector<256x32xf32> to vector<256x32xbf16>
    %cst_63 = arith.constant dense<0.000000e+00> : vector<256x32xf32>
    %126 = tpu.matmul %125, %123, %cst_63 {dimension_numbers = #tpu.dot_dimension_numbers<[1], [0], [0], [1], [0, 0, 1, 1], [], []>} : vector<256x32xbf16>, vector<32x32xbf16>, vector<256x32xf32> -> vector<256x32xf32>
    %127 = arith.addf %96, %126 : vector<256x32xf32>
    %c3_64 = arith.constant 3 : index
    %c0_65 = arith.constant 0 : index
    %c0_66 = arith.constant 0 : index
    %128 = vector.load %arg7[%c3_64, %c0_65, %c0_66] : memref<9x32x32xbf16, #tpu.memory_space<vmem>>, vector<1x32x32xbf16>
    %129 = vector.shape_cast %128 : vector<1x32x32xbf16> to vector<32x32xbf16>
    %130 = vector.shape_cast %103 : vector<1x256x32xf32> to vector<256x32xf32>
    %131 = arith.truncf %130 : vector<256x32xf32> to vector<256x32xbf16>
    %cst_67 = arith.constant dense<0.000000e+00> : vector<256x32xf32>
    %132 = tpu.matmul %131, %129, %cst_67 {dimension_numbers = #tpu.dot_dimension_numbers<[1], [0], [0], [1], [0, 0, 1, 1], [], []>} : vector<256x32xbf16>, vector<32x32xbf16>, vector<256x32xf32> -> vector<256x32xf32>
    %133 = arith.addf %127, %132 : vector<256x32xf32>
    %c6_68 = arith.constant 6 : index
    %c0_69 = arith.constant 0 : index
    %c0_70 = arith.constant 0 : index
    %134 = vector.load %arg7[%c6_68, %c0_69, %c0_70] : memref<9x32x32xbf16, #tpu.memory_space<vmem>>, vector<1x32x32xbf16>
    %135 = vector.shape_cast %134 : vector<1x32x32xbf16> to vector<32x32xbf16>
    %136 = vector.shape_cast %104 : vector<1x256x32xf32> to vector<256x32xf32>
    %137 = arith.truncf %136 : vector<256x32xf32> to vector<256x32xbf16>
    %cst_71 = arith.constant dense<0.000000e+00> : vector<256x32xf32>
    %138 = tpu.matmul %137, %135, %cst_71 {dimension_numbers = #tpu.dot_dimension_numbers<[1], [0], [0], [1], [0, 0, 1, 1], [], []>} : vector<256x32xbf16>, vector<32x32xbf16>, vector<256x32xf32> -> vector<256x32xf32>
    %139 = arith.addf %133, %138 : vector<256x32xf32>
    %c1_72 = arith.constant 1 : index
    %c0_73 = arith.constant 0 : index
    %c0_74 = arith.constant 0 : index
    %140 = vector.load %arg7[%c1_72, %c0_73, %c0_74] : memref<9x32x32xbf16, #tpu.memory_space<vmem>>, vector<1x32x32xbf16>
    %141 = vector.shape_cast %140 : vector<1x32x32xbf16> to vector<32x32xbf16>
    %142 = vector.shape_cast %108 : vector<1x256x32xf32> to vector<256x32xf32>
    %143 = arith.truncf %142 : vector<256x32xf32> to vector<256x32xbf16>
    %cst_75 = arith.constant dense<0.000000e+00> : vector<256x32xf32>
    %144 = tpu.matmul %143, %141, %cst_75 {dimension_numbers = #tpu.dot_dimension_numbers<[1], [0], [0], [1], [0, 0, 1, 1], [], []>} : vector<256x32xbf16>, vector<32x32xbf16>, vector<256x32xf32> -> vector<256x32xf32>
    %145 = arith.addf %121, %144 : vector<256x32xf32>
    %c7_76 = arith.constant 7 : index
    %c0_77 = arith.constant 0 : index
    %c0_78 = arith.constant 0 : index
    %146 = vector.load %arg7[%c7_76, %c0_77, %c0_78] : memref<9x32x32xbf16, #tpu.memory_space<vmem>>, vector<1x32x32xbf16>
    %147 = vector.shape_cast %146 : vector<1x32x32xbf16> to vector<32x32xbf16>
    %148 = vector.shape_cast %109 : vector<1x256x32xf32> to vector<256x32xf32>
    %149 = arith.truncf %148 : vector<256x32xf32> to vector<256x32xbf16>
    %cst_79 = arith.constant dense<0.000000e+00> : vector<256x32xf32>
    %150 = tpu.matmul %149, %147, %cst_79 {dimension_numbers = #tpu.dot_dimension_numbers<[1], [0], [0], [1], [0, 0, 1, 1], [], []>} : vector<256x32xbf16>, vector<32x32xbf16>, vector<256x32xf32> -> vector<256x32xf32>
    %151 = arith.addf %145, %150 : vector<256x32xf32>
    %c2_80 = arith.constant 2 : index
    %c0_81 = arith.constant 0 : index
    %c0_82 = arith.constant 0 : index
    %152 = vector.load %arg7[%c2_80, %c0_81, %c0_82] : memref<9x32x32xbf16, #tpu.memory_space<vmem>>, vector<1x32x32xbf16>
    %153 = vector.shape_cast %152 : vector<1x32x32xbf16> to vector<32x32xbf16>
    %154 = vector.shape_cast %113 : vector<1x256x32xf32> to vector<256x32xf32>
    %155 = arith.truncf %154 : vector<256x32xf32> to vector<256x32xbf16>
    %cst_83 = arith.constant dense<0.000000e+00> : vector<256x32xf32>
    %156 = tpu.matmul %155, %153, %cst_83 {dimension_numbers = #tpu.dot_dimension_numbers<[1], [0], [0], [1], [0, 0, 1, 1], [], []>} : vector<256x32xbf16>, vector<32x32xbf16>, vector<256x32xf32> -> vector<256x32xf32>
    %157 = arith.addf %98, %156 : vector<256x32xf32>
    %c5_84 = arith.constant 5 : index
    %c0_85 = arith.constant 0 : index
    %c0_86 = arith.constant 0 : index
    %158 = vector.load %arg7[%c5_84, %c0_85, %c0_86] : memref<9x32x32xbf16, #tpu.memory_space<vmem>>, vector<1x32x32xbf16>
    %159 = vector.shape_cast %158 : vector<1x32x32xbf16> to vector<32x32xbf16>
    %160 = vector.shape_cast %114 : vector<1x256x32xf32> to vector<256x32xf32>
    %161 = arith.truncf %160 : vector<256x32xf32> to vector<256x32xbf16>
    %cst_87 = arith.constant dense<0.000000e+00> : vector<256x32xf32>
    %162 = tpu.matmul %161, %159, %cst_87 {dimension_numbers = #tpu.dot_dimension_numbers<[1], [0], [0], [1], [0, 0, 1, 1], [], []>} : vector<256x32xbf16>, vector<32x32xbf16>, vector<256x32xf32> -> vector<256x32xf32>
    %163 = arith.addf %157, %162 : vector<256x32xf32>
    %c8_88 = arith.constant 8 : index
    %c0_89 = arith.constant 0 : index
    %c0_90 = arith.constant 0 : index
    %164 = vector.load %arg7[%c8_88, %c0_89, %c0_90] : memref<9x32x32xbf16, #tpu.memory_space<vmem>>, vector<1x32x32xbf16>
    %165 = vector.shape_cast %164 : vector<1x32x32xbf16> to vector<32x32xbf16>
    %166 = vector.shape_cast %115 : vector<1x256x32xf32> to vector<256x32xf32>
    %167 = arith.truncf %166 : vector<256x32xf32> to vector<256x32xbf16>
    %cst_91 = arith.constant dense<0.000000e+00> : vector<256x32xf32>
    %168 = tpu.matmul %167, %165, %cst_91 {dimension_numbers = #tpu.dot_dimension_numbers<[1], [0], [0], [1], [0, 0, 1, 1], [], []>} : vector<256x32xbf16>, vector<32x32xbf16>, vector<256x32xf32> -> vector<256x32xf32>
    %169 = arith.addf %163, %168 : vector<256x32xf32>
    %170 = vector.broadcast %1 : vector<256x1xf32> to vector<256x32xf32>
    %171 = arith.mulf %170, %139 : vector<256x32xf32>
    %172 = arith.addf %151, %171 : vector<256x32xf32>
    %173 = vector.broadcast %2 : vector<256x1xf32> to vector<256x32xf32>
    %174 = arith.mulf %173, %169 : vector<256x32xf32>
    %175 = arith.addf %172, %174 : vector<256x32xf32>
    %c0_92 = arith.constant 0 : index
    %c0_93 = arith.constant 0 : index
    %176 = vector.load %arg8[%c0_92, %c0_93] : memref<1x32xf32, #tpu.memory_space<vmem>>, vector<1x32xf32>
    %177 = vector.broadcast %176 : vector<1x32xf32> to vector<256x32xf32>
    %178 = arith.addf %175, %177 : vector<256x32xf32>
    %179 = arith.addf %178, %86 : vector<256x32xf32>
    %cst_94 = arith.constant 0.000000e+00 : f32
    %180 = vector.broadcast %cst_94 : f32 to vector<256x32xf32>
    %181 = arith.maximumf %179, %180 : vector<256x32xf32>
    %182 = vector.shape_cast %181 : vector<256x32xf32> to vector<1x256x32xf32>
    %c0_95 = arith.constant 0 : index
    %c0_96 = arith.constant 0 : index
    %c0_97 = arith.constant 0 : index
    %183 = vector.load %arg9[%c0_95, %c0_96, %c0_97] : memref<1x256x32xf32, #tpu.memory_space<vmem>>, vector<1x256x32xf32>
    tpu.vector_store %arg9[%c0_95, %c0_96, %c0_97], %182 {strides = array<i32>} : memref<1x256x32xf32, #tpu.memory_space<vmem>>, vector<1x256x32xf32>,
    return
  }
  func.func @transform_0(%arg0: i32) -> (i32, i32, i32) {
    %c0_i32 = arith.constant 0 : i32
    %c0_i32_0 = arith.constant 0 : i32
    %c0_i32_1 = arith.constant 0 : i32
    return %arg0, %c0_i32, %c0_i32_0 : i32, i32, i32
  }
  func.func @transform_1(%arg0: i32) -> (i32, i32) {
    %c0_i32 = arith.constant 0 : i32
    %c0_i32_0 = arith.constant 0 : i32
    %c0_i32_1 = arith.constant 0 : i32
    return %c0_i32, %c0_i32_0 : i32, i32
  }
  func.func @transform_2(%arg0: i32) -> (i32, i32, i32) {
    %c0_i32 = arith.constant 0 : i32
    %c0_i32_0 = arith.constant 0 : i32
    %c0_i32_1 = arith.constant 0 : i32
    %c0_i32_2 = arith.constant 0 : i32
    return %c0_i32, %c0_i32_0, %c0_i32_1 : i32, i32, i32
  }
  func.func @transform_3(%arg0: i32) -> (i32, i32) {
    %c0_i32 = arith.constant 0 : i32
    %c0_i32_0 = arith.constant 0 : i32
    %c0_i32_1 = arith.constant 0 : i32
    return %c0_i32, %c0_i32_0 : i32, i32
  }
  func.func @transform_4(%arg0: i32) -> (i32, i32) {
    %c0_i32 = arith.constant 0 : i32
    %c0_i32_0 = arith.constant 0 : i32
    %c0_i32_1 = arith.constant 0 : i32
    return %c0_i32, %c0_i32_0 : i32, i32
  }
  func.func @transform_5(%arg0: i32) -> (i32, i32) {
    %c0_i32 = arith.constant 0 : i32
    %c0_i32_0 = arith.constant 0 : i32
    %c0_i32_1 = arith.constant 0 : i32
    return %c0_i32, %c0_i32_0 : i32, i32
  }
  func.func @transform_6(%arg0: i32) -> (i32, i32, i32) {
    %c0_i32 = arith.constant 0 : i32
    %c0_i32_0 = arith.constant 0 : i32
    %c0_i32_1 = arith.constant 0 : i32
    %c0_i32_2 = arith.constant 0 : i32
    return %c0_i32, %c0_i32_0, %c0_i32_1 : i32, i32, i32
  }
  func.func @transform_7(%arg0: i32) -> (i32, i32) {
    %c0_i32 = arith.constant 0 : i32
    %c0_i32_0 = arith.constant 0 : i32
    %c0_i32_1 = arith.constant 0 : i32
    return %c0_i32, %c0_i32_0 : i32, i32
  }
  func.func @transform_8(%arg0: i32) -> (i32, i32, i32) {
    %c0_i32 = arith.constant 0 : i32
    %c0_i32_0 = arith.constant 0 : i32
    %c0_i32_1 = arith.constant 0 : i32
    return %arg0, %c0_i32, %c0_i32_0 : i32, i32, i32
  }
}

</mosaic_0001>

<bundles_post_ra>
// kernel: tpu_custom_call.1
= control target key start
LH: loop header
LB: loop body
LE: loop exit
PB: predicated region body
PF: predicated region fallthrough
CT: control target
= control target key end

     0   :  { %s4674_s27 = smov 0   ;;  %s7358_s0 = inlined_call_operand.vmem [shape: f32[2,256,3], index: 0, kind: input, shape index: {}]   ;;  %s7359_s1 = inlined_call_operand.vmem [shape: f32[256,2], index: 1, kind: input, shape index: {}]   ;;  %s7360_s2 = inlined_call_operand.vmem [shape: bf16[9,3,32], index: 2, kind: input, shape index: {}]   ;;  %s7361_s3 = inlined_call_operand.vmem [shape: f32[1,32], index: 3, kind: input, shape index: {}]   ;;  %s7362_s4 = inlined_call_operand.vmem [shape: f32[1,32], index: 4, kind: input, shape index: {}]   ;;  %s7363_s5 = inlined_call_operand.vmem [shape: f32[1,32], index: 5, kind: input, shape index: {}]   ;;  %s7364_s6 = inlined_call_operand.vmem [shape: bf16[9,32,32], index: 6, kind: input, shape index: {}]   ;;  %s7365_s7 = inlined_call_operand.vmem [shape: f32[1,32], index: 7, kind: input, shape index: {}]   ;;  %s7366_s8 = inlined_call_operand.vmem [shape: f32[2,256,32], index: 8, kind: output, shape index: {}]  }
   0x1 LB: > { %s4101_s28 = sadd.s32 4294967295, %s4622_s27   ;;  %p4105_p0 = scmp.ge.s32.totalorder %s4622_s27, 1  ;;  %s4622_s27 = sphi %s4674_s27, %s18_s27  }
   0x2   : > { %p262_p1 = scmp.lt.s32.totalorder %s4622_s27, 3 }
   0x4   : > { %p263_p2 = pnand %p4105_p0, %p262_p1 }
   0x6   : > { %266 = sbr.rel (%p263_p2) target bundleno = 1468 (0x5bc), region = 52 }
   0xb   : > { %vm403_vm0 = vcmask 1040384   ;;  %v4111_v0 = vld [vmem:[%s7360_s2 + $0x6] sm:$0x3]  ;;  %vm688_vm1 = vcmask 1041408   ;;  %p296_p3 = scmp.lt.s32.totalorder %s4101_s28, 1  ;;  %v4624_v1 = vmov 65535  }
   0xc   : > { %v689_v2 = vsel %vm403_vm0, 4294967295, %v4624_v1  ;;  %v619_v3 = vld [vmem:[%s7360_s2] sm:$0x3]  ;;  %v4143_v5 = vld [vmem:[%s7360_s2 + $0xc] sm:$0x3]  ;;  %vm639_vm2 = vcmask 23552  }
   0xd   : > { %v4689_v4 = vsel %vm688_vm1, %v689_v2, 0  ;;  %s7847_s28 = smov (!%p296_p3, %s4101_s28), 1  ;;  %v4160_v9 = vld [vmem:[%s7360_s2 + $0x2] sm:$0x3]  ;;  %v4110_v10 = vld [vmem:[%s7360_s2 + $0x8] sm:$0x3] }
   0xe   : > { %v692_v6 = vand.u32 %v4111_v0, %v4689_v4  ;;  %v787_v7 = vand.u32 %v4689_v4, %v619_v3  ;;  %v885_v8 = vand.u32 %v4143_v5, %v4689_v4  ;;  %s4504_s17 = sshll.u32 %s7847_s28, 8  ;;  %v1056_v11 = vand.u32 %v4160_v9, %v4689_v4 }
   0xf   : > { %v1151_v12 = vand.u32 %v4110_v10, %v4689_v4  ;;  %s4713_s20 = scalar_lea.vmem %s7358_s0, %s4504_s17  ;;  %v7367_v27 = vmov 0.0|0.0   ;;  %vm502_vm3 = vcmask 1046528   ;;  %vm2592_vm4 = vcmask 261120   ;;  %s7043_s15 = scalar_lea.vmem %s7366_s8, %s4504_s17 }
  0x10   : > { %701 = vmatpush.bf16.msra.mxu0 %v692_v6  ;;  %4524 = vmatpush.bf16.msra.mxu2 %v692_v6  ;;  %v4716_v13 = vld [vmem:[%s4713_s20] sm:$0xff]  ;;  %v4719_v14 = vld [vmem:[%s4713_s20 + $0x8] sm:$0xff]  ;;  %v4722_v15 = vld [vmem:[%s4713_s20 + $0x78] sm:$0xff] }
  0x11   : > { %796 = vmatpush.bf16.msra.mxu1 %v787_v7  ;;  %4525 = vmatpush.bf16.msra.mxu3 %v787_v7  ;;  %v404_v16 = vrot.slane %v4716_v13, 7  ;;  %v405_v17 = vrot.slane %v4719_v14, 7  ;;  %v4727_v18 = vld [vmem:[%s4713_s20 + $0x80] sm:$0xff]  ;;  %v4730_v19 = vld [vmem:[%s4713_s20 + $0x88] sm:$0xff]  ;;  %v433_v20 = vrot.slane %v4722_v15, 7  ;;  %v4739_v24 = vld [vmem:[%s4713_s20 + $0x70] sm:$0xff] }
  0x12   : > { %v435_v21 = vrot.slane %v4727_v18, 7  ;;  %v437_v22 = vrot.slane %v4730_v19, 7  ;;  %v4736_v23 = vld [vmem:[%s4713_s20 + $0x68] sm:$0xff]  ;;  %v431_v33 = vrot.slane %v4739_v24, 7  ;;  %v4760_v37 = vld [vmem:[%s4713_s20 + $0x10] sm:$0xff]  ;;  %v4763_v38 = vld [vmem:[%s4713_s20 + $0x18] sm:$0xff] }
  0x13   : > { %v406_v25 = vsel %vm403_vm0, %v404_v16, %v405_v17  ;;  %v500_v26 = vsel %vm403_vm0, 0.0, %v404_v16  ;;  %v429_v32 = vrot.slane %v4736_v23, 7  ;;  %v4766_v39 = vld [vmem:[%s4713_s20 + $0x90] sm:$0xff]  ;;  %v4769_v40 = vld [vmem:[%s4713_s20 + $0x98] sm:$0xff]  ;;  %v407_v41 = vrot.slane %v4760_v37, 7  ;;  %v4791_v51 = vld [vmem:[%s4713_s20 + $0x20] sm:$0xff] }
  0x14   : > { %894 = vmatpush.bf16.msrb.mxu2 %v885_v8  ;;  %1160 = vmatpush.bf16.msrb.mxu0 %v1151_v12  ;;  %v621_v28 = vpack.c.bf16 %v406_v25, %v500_v26  ;;  %v436_v29 = vsel %vm403_vm0, %v433_v20, %v435_v21  ;;  %v438_v30 = vsel %vm403_vm0, %v435_v21, %v437_v22  ;;  %v409_v42 = vrot.slane %v4763_v38, 7  ;;  %v4794_v52 = vld [vmem:[%s4713_s20 + $0x28] sm:$0xff]  ;;  %v4797_v53 = vld [vmem:[%s4713_s20 + $0xa0] sm:$0xff]  ;;  %v4823_v1 = vld [vmem:[%s4713_s20 + $0x30] sm:$0xff] }
  0x15   : > { %1065 = vmatpush.bf16.msrb.mxu3 %v1056_v11  ;;  %797 = vmatmul.bf16.vlgmr.msra.gmra.mxu1 %v7367_v27  ;;  %v4746_v31 = vpack.c.bf16 %v438_v30, %v436_v29  ;;  %v432_v34 = vsel %vm403_vm0, %v429_v32, %v431_v33  ;;  %v434_v35 = vsel %vm403_vm0, %v431_v33, %v433_v20  ;;  %v439_v43 = vrot.slane %v4766_v39, 7  ;;  %v4800_v54 = vld [vmem:[%s4713_s20 + $0xa8] sm:$0xff]  ;;  %v4826_v2 = vld [vmem:[%s4713_s20 + $0x38] sm:$0xff]  ;;  %v4829_v3 = vld [vmem:[%s4713_s20 + $0xb0] sm:$0xff] }
  0x16   : > { %4112 = vmatmul.msk.bf16.vlgmr.msra.gmra.mxu0 %vm639_vm2, %v621_v28  ;;  %v4757_v36 = vpack.c.bf16 %v434_v35, %v432_v34  ;;  %v441_v44 = vrot.slane %v4769_v40, 7  ;;  %v408_v45 = vsel %vm403_vm0, %v405_v17, %v407_v41  ;;  %v410_v46 = vsel %vm403_vm0, %v407_v41, %v409_v42  ;;  %v4832_v5 = vld [vmem:[%s4713_s20 + $0xb8] sm:$0xff]  ;;  %v4855_v21 = vld [vmem:[%s4713_s20 + $0x40] sm:$0xff]  ;;  %v4864_v26 = vld [vmem:[%s4713_s20 + $0xc8] sm:$0xff] }
  0x17   : > { %4120 = vmatmul.msk.bf16.vlgmr.msra.gmra.mxu2 %vm639_vm2, %v4746_v31  ;;  %v440_v47 = vsel %vm403_vm0, %v437_v22, %v439_v43  ;;  %v4781_v49 = vpack.c.bf16 %v410_v46, %v408_v45  ;;  %v411_v55 = vrot.slane %v4791_v51, 7  ;;  %v413_v56 = vrot.slane %v4794_v52, 7  ;;  %v4858_v22 = vld [vmem:[%s4713_s20 + $0x48] sm:$0xff]  ;;  %v4861_v25 = vld [vmem:[%s4713_s20 + $0xc0] sm:$0xff]  ;;  %v4887_v45 = vld [vmem:[%s4713_s20 + $0x50] sm:$0xff] }
  0x18   : > { %4135 = vmatmul.msk.bf16.vlgmr.msra.gmra.mxu3 %vm639_vm2, %v4757_v36  ;;  %v442_v48 = vsel %vm403_vm0, %v439_v43, %v441_v44  ;;  %v443_v57 = vrot.slane %v4797_v53, 7  ;;  %v445_v58 = vrot.slane %v4800_v54, 7  ;;  %v415_v6 = vrot.slane %v4823_v1, 7  ;;  %v4890_v46 = vld [vmem:[%s4713_s20 + $0x58] sm:$0xff] }
  0x19   : > { %v4783_v50 = vpack.c.bf16 %v442_v48, %v440_v47  ;;  %v412_v59 = vsel %vm403_vm0, %v409_v42, %v411_v55  ;;  %v414_v60 = vsel %vm403_vm0, %v411_v55, %v413_v56  ;;  %v417_v7 = vrot.slane %v4826_v2, 7  ;;  %v4893_v47 = vld [vmem:[%s4713_s20 + $0xd0] sm:$0xff]  ;;  %v4896_v48 = vld [vmem:[%s4713_s20 + $0xd8] sm:$0xff] }
  0x1a   : > { %v444_v61 = vsel %vm403_vm0, %v441_v44, %v443_v57  ;;  %v446_v62 = vsel %vm403_vm0, %v443_v57, %v445_v58  ;;  %v4812_v63 = vpack.c.bf16 %v414_v60, %v412_v59  ;;  %v447_v8 = vrot.slane %v4829_v3, 7 }
  0x1b   : > { %v4814_v0 = vpack.c.bf16 %v446_v62, %v444_v61  ;;  %v449_v9 = vrot.slane %v4832_v5, 7  ;;  %v416_v10 = vsel %vm403_vm0, %v413_v56, %v415_v6  ;;  %v418_v11 = vsel %vm403_vm0, %v415_v6, %v417_v7 }
  0x1c   : > { %v448_v12 = vsel %vm403_vm0, %v445_v58, %v447_v8  ;;  %v4844_v17 = vpack.c.bf16 %v418_v11, %v416_v10  ;;  %v421_v29 = vrot.slane %v4858_v22, 7  ;;  %v451_v30 = vrot.slane %v4861_v25, 7  ;;  %v4925_v10 = vld [vmem:[%s4713_s20 + $0xe8] sm:$0xff] }
  0x1d   : > { %v450_v16 = vsel %vm403_vm0, %v447_v8, %v449_v9  ;;  %v453_v33 = vrot.slane %v4864_v26, 7  ;;  %v423_v55 = vrot.slane %v4887_v45, 7  ;;  %v425_v56 = vrot.slane %v4890_v46, 7  ;;  %v4919_v8 = vld [vmem:[%s4713_s20 + $0x60] sm:$0xff] }
  0x1e   : > { %v4846_v20 = vpack.c.bf16 %v450_v16, %v448_v12  ;;  %v452_v41 = vsel %vm403_vm0, %v449_v9, %v451_v30  ;;  %v455_v57 = vrot.slane %v4893_v47, 7  ;;  %v457_v58 = vrot.slane %v4896_v48, 7  ;;  %v4922_v9 = vld [vmem:[%s4713_s20 + $0xe0] sm:$0xff] }
  0x1f   : > { %v454_v42 = vsel %vm403_vm0, %v451_v30, %v453_v33  ;;  %v424_v59 = vsel %vm403_vm0, %v421_v29, %v423_v55  ;;  %v426_v60 = vsel %vm403_vm0, %v423_v55, %v425_v56  ;;  %v427_v11 = vrot.slane %v4919_v8, 7  ;;  %v4208_v55 = vld [vmem:[%s7360_s2 + $0x4] sm:$0x3] }
  0x20   : > { %v4878_v44 = vpack.c.bf16 %v454_v42, %v452_v41  ;;  %v456_v61 = vsel %vm403_vm0, %v453_v33, %v455_v57  ;;  %v458_v62 = vsel %vm403_vm0, %v455_v57, %v457_v58  ;;  %v4908_v6 = vpack.c.bf16 %v426_v60, %v424_v59  ;;  %v4949_v41 = vld [vmem:[%s4713_s20 + $0xf0] sm:$0xff]  ;;  %v4209_v42 = vld [vmem:[%s7360_s2 + $0xa] sm:$0x3]  ;;  %v4192_v60 = vld [vmem:[%s7360_s2 + $0xe] sm:$0x3] }
  0x21   : > { %v459_v12 = vrot.slane %v4922_v9, 7  ;;  %v461_v16 = vrot.slane %v4925_v10, 7  ;;  %v1533_v57 = vand.u32 %v4208_v55, %v4689_v4  ;;  %v603_v55 = vpack.c.bf16 %v4719_v14, %v4716_v13 }
  0x23   : > { %v460_v30 = vsel %vm403_vm0, %v457_v58, %v459_v12  ;;  %v462_v33 = vsel %vm403_vm0, %v459_v12, %v461_v16  ;;  %v463_v58 = vrot.slane %v4949_v41, 7  ;;  %1542 = vmatpush.bf16.msra.mxu3 %v1533_v57 }
  0x25   : > { %4128 = vmatmul.msk.bf16.gmra.mxu1 %vm639_vm2, %v621_v28  ;;  %v419_v28 = vrot.slane %v4855_v21, 7  ;;  %v464_v12 = vsel %vm403_vm0, %v461_v16, %v463_v58  ;;  %v7370_v16 = vmov 0  }
  0x26   : > { %4113 = vmatmul.msk.bf16.gmra.mxu0 %vm639_vm2, %v4781_v49  ;;  %4539 = vset.pattern.permute.xlu0 %v7370_v16 }
  0x27   : > { %4121 = vmatmul.msk.bf16.gmra.mxu2 %vm639_vm2, %v4783_v50  ;;  %v420_v34 = vsel %vm403_vm0, %v417_v7, %v419_v28  ;;  %v422_v35 = vsel %vm403_vm0, %v419_v28, %v421_v29  ;;  %v4910_v7 = vpack.c.bf16 %v458_v62, %v456_v61  ;;  %v428_v28 = vsel %vm403_vm0, %v425_v56, %v427_v11  ;;  %v4242_v62 = vld [vmem:[%s7360_s2 + $0x10] sm:$0x3] }
  0x28   : > { %4136 = vmatmul.msk.bf16.gmra.mxu3 %vm639_vm2, %v4746_v31  ;;  %v4876_v43 = vpack.c.bf16 %v422_v35, %v420_v34  ;;  %v430_v29 = vsel %vm403_vm0, %v427_v11, %v429_v32  ;;  %v4940_v35 = vpack.c.bf16 %v462_v33, %v460_v30  ;;  %v4952_v32 = vld [vmem:[%s4713_s20 + $0xf8] sm:$0xff]  ;;  %v1438_v56 = vand.u32 %v4209_v42, %v4689_v4  ;;  %v308_v42 = vld [vmem:[%s7359_s1 + $0x8] sm:$0xff] }
  0x29   : > { %v4938_v34 = vpack.c.bf16 %v430_v29, %v428_v28  ;;  %v7369_v59 = vrot.slane %v4952_v32, 7  ;;  %v1245_v61 = vand.u32 %v4192_v60, %v4689_v4  ;;  %v1627_v11 = vand.u32 %v4242_v62, %v4689_v4  ;;  %v307_v4 = vld [vmem:[%s7359_s1] sm:$0xff]  ;;  %4541 = vset.pattern.permute.xlu2 %v7370_v16 }
  0x2a   : > { %1447 = vmatpush.bf16.msra.mxu2 %v1438_v56  ;;  %1752 = vperm.xlu0 %4539, %v307_v4   ;;  %v604_v30 = vpack.c.bf16 %v4763_v38, %v4760_v37  ;;  %v7372_v60 = vmov 1   ;;  %v5015_v62 = vpack.c.bf16 %v4794_v52, %v4791_v51  ;;  %v310_v52 = vld [vmem:[%s7359_s1 + $0x18] sm:$0xff] }
  0x2b   : > { %1254 = vmatpush.bf16.msrb.mxu1 %v1245_v61  ;;  %v466_v28 = vsel %vm403_vm0, %v463_v58, %v7369_v59  ;;  %1636 = vmatpush.bf16.msra.mxu0 %v1627_v11 }
  0x2c   : > { %v4978_v29 = vpack.c.bf16 %v466_v28, %v464_v12  ;;  %4540 = vset.pattern.permute.xlu1 %v7372_v60 }
  0x2d   : > { %1975 = vperm.xlu1 %4540, %v307_v4  }
  0x32   : > { %1757 = vperm.xlu0 %4539, %v308_v42  }
  0x35   : > { %4129 = vmatmul.msk.bf16.gmra.mxu1 %vm639_vm2, %v4781_v49  ;;  %1979 = vperm.xlu1 %4540, %v308_v42  }
  0x36   : > { %4114 = vmatmul.msk.bf16.gmra.mxu0 %vm639_vm2, %v4812_v63 }
  0x37   : > { %4122 = vmatmul.msk.bf16.gmra.mxu2 %vm639_vm2, %v4814_v0 }
  0x38   : > { %4137 = vmatmul.msk.bf16.gmra.mxu3 %vm639_vm2, %v4783_v50 }
  0x3a   : > { %4542 = vset.pattern.permute.xlu0 %v7372_v60 }
  0x3d   : > { %1987 = vperm.xlu1 %4540, %v310_v52  }
  0x45   : > { %4130 = vmatmul.msk.bf16.gmra.mxu1 %vm639_vm2, %v4812_v63  ;;  %4543 = vset.pattern.permute.xlu1 %v7370_v16 }
  0x46   : > { %4115 = vmatmul.msk.bf16.gmra.mxu0 %vm639_vm2, %v4844_v17 }
  0x47   : > { %4123 = vmatmul.msk.bf16.gmra.mxu2 %vm639_vm2, %v4846_v20 }
  0x48   : > { %4138 = vmatmul.msk.bf16.gmra.mxu3 %vm639_vm2, %v4814_v0 }
  0x55   : > { %4131 = vmatmul.msk.bf16.gmra.mxu1 %vm639_vm2, %v4844_v17 }
  0x56   : > { %4116 = vmatmul.msk.bf16.gmra.mxu0 %vm639_vm2, %v4876_v43 }
  0x57   : > { %4124 = vmatmul.msk.bf16.gmra.mxu2 %vm639_vm2, %v4878_v44 }
  0x58   : > { %4139 = vmatmul.msk.bf16.gmra.mxu3 %vm639_vm2, %v4846_v20 }
  0x65   : > { %4132 = vmatmul.msk.bf16.gmra.mxu1 %vm639_vm2, %v4876_v43 }
  0x66   : > { %4117 = vmatmul.msk.bf16.gmra.mxu0 %vm639_vm2, %v4908_v6 }
  0x67   : > { %4125 = vmatmul.msk.bf16.gmra.mxu2 %vm639_vm2, %v4910_v7 }
  0x68   : > { %4140 = vmatmul.msk.bf16.gmra.mxu3 %vm639_vm2, %v4878_v44 }
  0x75   : > { %4133 = vmatmul.msk.bf16.gmra.mxu1 %vm639_vm2, %v4908_v6 }
  0x76   : > { %4118 = vmatmul.msk.bf16.gmra.mxu0 %vm639_vm2, %v4938_v34 }
  0x77   : > { %4126 = vmatmul.msk.bf16.gmra.mxu2 %vm639_vm2, %v4940_v35 }
  0x78   : > { %4141 = vmatmul.msk.bf16.gmra.mxu3 %vm639_vm2, %v4910_v7 }
  0x85   : > { %4134 = vmatmul.msk.bf16.gmra.mxu1 %vm639_vm2, %v4938_v34 }
  0x86   : > { %4119 = vmatmul.msk.bf16.gmra.mxu0 %vm639_vm2, %v4757_v36 }
  0x87   : > { %4127 = vmatmul.msk.bf16.gmra.mxu2 %vm639_vm2, %v4978_v29 }
  0x88   : > { %4142 = vmatmul.msk.bf16.gmra.mxu3 %vm639_vm2, %v4940_v35 }
  0x92   : > { %v798_v33 = vpop.f32.mrf.mxu1 }
  0x93   : > { %v703_v56 = vpop.f32.mrf.mxu0 }
  0x94   : > { %v5001_v57 = vadd.f32 %v798_v33, %v703_v56 }
  0x95   : > { %4193 = vmatmul.msk.bf16.vlgmr.msrb.gmra.mxu1 %vm639_vm2, %v604_v30 }
  0x96   : > { %4176 = vmatmul.msk.bf16.vlgmr.msrb.gmra.mxu0 %vm639_vm2, %v603_v55 }
  0x97   : > { %4144 = vmatmul.msk.bf16.vlgmr.msrb.gmra.mxu2 %vm639_vm2, %v4781_v49 }
  0x98   : > { %1066 = vmatmul.bf16.vlgmr.msrb.gmra.mxu3 %v7367_v27 }
  0x9a   : > { %v800_v37 = vpop.f32.mrf.mxu1  ;;  %v743_v38 = vpop.f32.mrf.mxu2 }
  0x9b   : > { %v705_v58 = vpop.f32.mrf.mxu0  ;;  %v838_v14 = vpop.f32.mrf.mxu3 }
  0x9c   : > { %v5008_v13 = vadd.f32 %v800_v37, %v705_v58  ;;  %v5011_v61 = vadd.f32 %v838_v14, %v743_v38  ;;  %v309_v14 = vld [vmem:[%s7359_s1 + $0x10] sm:$0xff] }
  0x9d   : > { %1762 = vperm.xlu2 %4541, %v309_v14   ;;  %1983 = vperm.xlu0 %4542, %v309_v14  }
  0xa2   : > { %v803_v49 = vpop.f32.mrf.mxu1  ;;  %v745_v11 = vpop.f32.mrf.mxu2 }
  0xa3   : > { %v708_v12 = vpop.f32.mrf.mxu0  ;;  %v840_v33 = vpop.f32.mrf.mxu3 }
  0xa4   : > { %v5019_v28 = vadd.f32 %v803_v49, %v708_v12  ;;  %v5021_v4 = vadd.f32 %v840_v33, %v745_v11  ;;  %v312_v11 = vld [vmem:[%s7359_s1 + $0x28] sm:$0xff] }
  0xa5   : > { %4194 = vmatmul.msk.bf16.gmra.mxu1 %vm639_vm2, %v5015_v62  ;;  %1777 = vperm.xlu1 %4543, %v312_v11  }
  0xa6   : > { %4177 = vmatmul.msk.bf16.gmra.mxu0 %vm639_vm2, %v604_v30  ;;  %1767 = vperm.xlu2 %4541, %v310_v52   ;;  %v5068_v52 = vpack.c.bf16 %v4858_v22, %v4855_v21 }
  0xa7   : > { %4145 = vmatmul.msk.bf16.gmra.mxu2 %vm639_vm2, %v4812_v63  ;;  %v5039_v63 = vpack.c.bf16 %v4826_v2, %v4823_v1  ;;  %1995 = vperm.xlu0 %4542, %v312_v11  }
  0xa8   : > { %4161 = vmatmul.msk.bf16.gmra.mxu3 %vm639_vm2, %v603_v55 }
  0xaa   : > { %v805_v56 = vpop.f32.mrf.mxu1  ;;  %v748_v51 = vpop.f32.mrf.mxu2 }
  0xab   : > { %v710_v37 = vpop.f32.mrf.mxu0  ;;  %v843_v42 = vpop.f32.mrf.mxu3 }
  0xac   : > { %v5030_v38 = vadd.f32 %v805_v56, %v710_v37  ;;  %v5032_v58 = vadd.f32 %v843_v42, %v748_v51  ;;  %v313_v37 = vld [vmem:[%s7359_s1 + $0x30] sm:$0xff] }
  0xad   : > { %1782 = vperm.xlu1 %4543, %v313_v37  }
  0xaf   : > { %1999 = vperm.xlu0 %4542, %v313_v37   ;;  %v314_v37 = vld [vmem:[%s7359_s1 + $0x38] sm:$0xff] }
  0xb2   : > { %v808_v55 = vpop.f32.mrf.mxu1  ;;  %v750_v49 = vpop.f32.mrf.mxu2 }
  0xb3   : > { %v713_v12 = vpop.f32.mrf.mxu0  ;;  %v845_v56 = vpop.f32.mrf.mxu3 }
  0xb4   : > { %v5046_v33 = vadd.f32 %v808_v55, %v713_v12  ;;  %v5049_v1 = vadd.f32 %v845_v56, %v750_v49 }
  0xb5   : > { %4195 = vmatmul.msk.bf16.gmra.mxu1 %vm639_vm2, %v5039_v63  ;;  %4546 = vset.pattern.permute.xlu1 %v7372_v60 }
  0xb6   : > { %4178 = vmatmul.msk.bf16.gmra.mxu0 %vm639_vm2, %v5015_v62  ;;  %2003 = vperm.xlu1 %4546, %v314_v37  }
  0xb7   : > { %4146 = vmatmul.msk.bf16.gmra.mxu2 %vm639_vm2, %v4844_v17  ;;  %v311_v17 = vld [vmem:[%s7359_s1 + $0x20] sm:$0xff]  ;;  %4547 = vset.pattern.permute.xlu0 %v7370_v16 }
  0xb8   : > { %4162 = vmatmul.msk.bf16.gmra.mxu3 %vm639_vm2, %v604_v30  ;;  %1772 = vperm.xlu2 %4541, %v311_v17  }
  0xba   : > { %v810_v2 = vpop.f32.mrf.mxu1  ;;  %v753_v51 = vpop.f32.mrf.mxu2 }
  0xbb   : > { %v715_v42 = vpop.f32.mrf.mxu0  ;;  %v848_v55 = vpop.f32.mrf.mxu3 }
  0xbc   : > { %v5059_v14 = vadd.f32 %v810_v2, %v715_v42  ;;  %v5061_v49 = vadd.f32 %v848_v55, %v753_v51 }
  0xc0   : > { %4544 = vset.pattern.permute.xlu2 %v7372_v60 }
  0xc1   : > { %1991 = vperm.xlu2 %4544, %v311_v17   ;;  %v316_v17 = vld [vmem:[%s7359_s1 + $0x48] sm:$0xff] }
  0xc2   : > { %v813_v30 = vpop.f32.mrf.mxu1  ;;  %v755_v11 = vpop.f32.mrf.mxu2  ;;  %1797 = vperm.xlu0 %4547, %v316_v17  }
  0xc3   : > { %v718_v12 = vpop.f32.mrf.mxu0  ;;  %v850_v2 = vpop.f32.mrf.mxu3 }
  0xc4   : > { %v5072_v56 = vadd.f32 %v813_v30, %v718_v12  ;;  %v5075_v51 = vadd.f32 %v850_v2, %v755_v11  ;;  %v5097_v11 = vpack.c.bf16 %v4890_v46, %v4887_v45  ;;  %v315_v12 = vld [vmem:[%s7359_s1 + $0x40] sm:$0xff] }
  0xc5   : > { %4196 = vmatmul.msk.bf16.gmra.mxu1 %vm639_vm2, %v5068_v52  ;;  %2007 = vperm.xlu1 %4546, %v315_v12  }
  0xc6   : > { %4179 = vmatmul.msk.bf16.gmra.mxu0 %vm639_vm2, %v5039_v63 }
  0xc7   : > { %4147 = vmatmul.msk.bf16.gmra.mxu2 %vm639_vm2, %v4876_v43 }
  0xc8   : > { %4163 = vmatmul.msk.bf16.gmra.mxu3 %vm639_vm2, %v5015_v62 }
  0xc9   : > { %4545 = vset.pattern.permute.xlu2 %v7370_v16 }
  0xca   : > { %v815_v21 = vpop.f32.mrf.mxu1  ;;  %v758_v22 = vpop.f32.mrf.mxu2  ;;  %1787 = vperm.xlu2 %4545, %v314_v37   ;;  %4551 = vset.pattern.permute.xlu0 %v7372_v60 }
  0xcb   : > { %v720_v42 = vpop.f32.mrf.mxu0  ;;  %v853_v30 = vpop.f32.mrf.mxu3 }
  0xcc   : > { %v5088_v55 = vadd.f32 %v815_v21, %v720_v42  ;;  %v5090_v43 = vadd.f32 %v853_v30, %v758_v22  ;;  %v317_v30 = vld [vmem:[%s7359_s1 + $0x50] sm:$0xff] }
  0xcd   : > { %4549 = vset.pattern.permute.xlu1 %v7370_v16  ;;  %2015 = vperm.xlu0 %4551, %v317_v30  }
  0xce   : > { %1802 = vperm.xlu1 %4549, %v317_v30  }
  0xd2   : > { %v818_v62 = vpop.f32.mrf.mxu1  ;;  %v760_v2 = vpop.f32.mrf.mxu2  ;;  %1792 = vperm.xlu2 %4545, %v315_v12   ;;  %v5126_v12 = vpack.c.bf16 %v4736_v23, %v4919_v8 }
  0xd3   : > { %v723_v21 = vpop.f32.mrf.mxu0  ;;  %v855_v42 = vpop.f32.mrf.mxu3 }
  0xd4   : > { %v5105_v22 = vadd.f32 %v818_v62, %v723_v21  ;;  %v5107_v45 = vadd.f32 %v855_v42, %v760_v2 }
  0xd5   : > { %4197 = vmatmul.msk.bf16.gmra.mxu1 %vm639_vm2, %v5097_v11 }
  0xd6   : > { %7485 = vst [vmem:[#allocation2_spill] sm:$0xff] %v5107_v45  ;;  %4180 = vmatmul.msk.bf16.gmra.mxu0 %vm639_vm2, %v5068_v52  ;;  %4552 = vset.pattern.permute.xlu1 %v7372_v60  ;;  %v5248_v45 = vpop.permute.xlu1 %1975 }
  0xd7   : > { %4148 = vmatmul.msk.bf16.gmra.mxu2 %vm639_vm2, %v4908_v6  ;;  %7498 = vst [vmem:[#allocation13_spill] sm:$0xff] %v5248_v45 }
  0xd8   : > { %4164 = vmatmul.msk.bf16.gmra.mxu3 %vm639_vm2, %v5039_v63 }
  0xda   : > { %v820_v46 = vpop.f32.mrf.mxu1  ;;  %v763_v37 = vpop.f32.mrf.mxu2  ;;  %4548 = vset.pattern.permute.xlu2 %v7372_v60 }
  0xdb   : > { %v725_v62 = vpop.f32.mrf.mxu0  ;;  %v858_v6 = vpop.f32.mrf.mxu3  ;;  %2011 = vperm.xlu2 %4548, %v316_v17  }
  0xdc   : > { %v5120_v2 = vadd.f32 %v820_v46, %v725_v62  ;;  %v5122_v21 = vadd.f32 %v858_v6, %v763_v37 }
  0xde   : > { %7486 = vst [vmem:[#allocation3_spill] sm:$0xff] %v5122_v21 }
  0xe2   : > { %v823_v63 = vpop.f32.mrf.mxu1  ;;  %v765_v42 = vpop.f32.mrf.mxu2 }
  0xe3   : > { %v728_v27 = vpop.f32.mrf.mxu0  ;;  %v860_v46 = vpop.f32.mrf.mxu3  ;;  %4550 = vset.pattern.permute.xlu2 %v7370_v16 }
  0xe4   : > { %v5131_v59 = vadd.f32 %v823_v63, %v728_v27  ;;  %v5134_v37 = vadd.f32 %v860_v46, %v765_v42  ;;  %v318_v27 = vld [vmem:[%s7359_s1 + $0x58] sm:$0xff] }
  0xe5   : > { %4198 = vmatmul.msk.bf16.gmra.mxu1 %vm639_vm2, %v5126_v12  ;;  %2019 = vperm.xlu1 %4552, %v318_v27  }
  0xe6   : > { %7487 = vst [vmem:[#allocation4_spill] sm:$0xff] %v5134_v37  ;;  %4181 = vmatmul.msk.bf16.gmra.mxu0 %vm639_vm2, %v5097_v11  ;;  %1807 = vperm.xlu2 %4550, %v318_v27  }
  0xe7   : > { %4149 = vmatmul.msk.bf16.gmra.mxu2 %vm639_vm2, %v4938_v34  ;;  %v320_v34 = vld [vmem:[%s7359_s1 + $0x68] sm:$0xff] }
  0xe8   : > { %4165 = vmatmul.msk.bf16.gmra.mxu3 %vm639_vm2, %v5068_v52  ;;  %v5155_v52 = vpack.c.bf16 %v4722_v15, %v4739_v24  ;;  %2027 = vperm.xlu0 %4551, %v320_v34  }
  0xea   : > { %v825_v23 = vpop.f32.mrf.mxu1  ;;  %v768_v8 = vpop.f32.mrf.mxu2 }
  0xeb   : > { %v730_v17 = vpop.f32.mrf.mxu0  ;;  %v863_v62 = vpop.f32.mrf.mxu3 }
  0xec   : > { %v5146_v30 = vadd.f32 %v825_v23, %v730_v17  ;;  %v5148_v6 = vadd.f32 %v863_v62, %v768_v8  ;;  %v321_v17 = vld [vmem:[%s7359_s1 + $0x70] sm:$0xff] }
  0xed   : > { %4553 = vset.pattern.permute.xlu1 %v7370_v16 }
  0xee   : > { %7488 = vst [vmem:[#allocation5_spill] sm:$0xff] %v5148_v6  ;;  %1817 = vperm.xlu1 %4553, %v320_v34  }
  0xf0   : > { %2031 = vperm.xlu0 %4551, %v321_v17  }
  0xf2   : > { %v828_v63 = vpop.f32.mrf.mxu1  ;;  %v770_v42 = vpop.f32.mrf.mxu2 }
  0xf3   : > { %v733_v46 = vpop.f32.mrf.mxu0  ;;  %v865_v8 = vpop.f32.mrf.mxu3 }
  0xf4   : > { %v5160_v23 = vadd.f32 %v828_v63, %v733_v46  ;;  %v5162_v27 = vadd.f32 %v865_v8, %v770_v42 }
  0xf5   : > { %4199 = vmatmul.msk.bf16.gmra.mxu1 %vm639_vm2, %v5155_v52 }
  0xf6   : > { %7489 = vst [vmem:[#allocation6_spill] sm:$0xff] %v5162_v27  ;;  %4182 = vmatmul.msk.bf16.gmra.mxu0 %vm639_vm2, %v5126_v12  ;;  %1822 = vperm.xlu1 %4553, %v321_v17   ;;  %v5241_v27 = vpack.c.bf16 %v4800_v54, %v4797_v53 }
  0xf7   : > { %4150 = vmatmul.msk.bf16.gmra.mxu2 %vm639_vm2, %v4757_v36  ;;  %v5179_v36 = vpack.c.bf16 %v4730_v19, %v4727_v18 }
  0xf8   : > { %4166 = vmatmul.msk.bf16.gmra.mxu3 %vm639_vm2, %v5097_v11  ;;  %v319_v11 = vld [vmem:[%s7359_s1 + $0x60] sm:$0xff] }
  0xf9   : > { %1812 = vperm.xlu2 %4550, %v319_v11  }
  0xfa   : > { %v830_v15 = vpop.f32.mrf.mxu1  ;;  %v773_v24 = vpop.f32.mrf.mxu2 }
  0xfb   : > { %v735_v62 = vpop.f32.mrf.mxu0  ;;  %v868_v63 = vpop.f32.mrf.mxu3 }
  0xfc   : > { %v5173_v34 = vadd.f32 %v830_v15, %v735_v62  ;;  %v5175_v42 = vadd.f32 %v868_v63, %v773_v24  ;;  %v7491_v24 = vmov 0  }
  0xfd   : > { %4557 = vset.pattern.permute.xlu0 %v7491_v24 }
  0xfe   : > { %7490 = vst [vmem:[#allocation7_spill] sm:$0xff] %v5175_v42  ;;  %4556 = vset.pattern.permute.xlu1 %v7372_v60  ;;  %v323_v42 = vld [vmem:[%s7359_s1 + $0x80] sm:$0xff] }
 0x101   : > { %4554 = vset.pattern.permute.xlu2 %v7372_v60  ;;  %v324_v60 = vld [vmem:[%s7359_s1 + $0x88] sm:$0xff] }
 0x102   : > { %v833_v46 = vpop.f32.mrf.mxu1  ;;  %v775_v8 = vpop.f32.mrf.mxu2  ;;  %2023 = vperm.xlu2 %4554, %v319_v11   ;;  %1837 = vperm.xlu0 %4557, %v324_v60  }
 0x103   : > { %v738_v16 = vpop.f32.mrf.mxu0  ;;  %v870_v17 = vpop.f32.mrf.mxu3 }
 0x104   : > { %v5186_v15 = vadd.f32 %v833_v46, %v738_v16  ;;  %v5190_v18 = vadd.f32 %v870_v17, %v775_v8  ;;  %v322_v16 = vld [vmem:[%s7359_s1 + $0x78] sm:$0xff]  ;;  %v5225_v11 = vpop.permute.xlu0 %1752 }
 0x105   : > { %4200 = vmatmul.msk.bf16.gmra.mxu1 %vm639_vm2, %v5179_v36  ;;  %2035 = vperm.xlu1 %4556, %v322_v16   ;;  %7495 = vst [vmem:[#allocation11_spill] sm:$0xff] %v5225_v11 }
 0x106   : > { %7492 = vst [vmem:[#allocation8_spill] sm:$0xff] %v5190_v18  ;;  %4183 = vmatmul.msk.bf16.gmra.mxu0 %vm639_vm2, %v5155_v52 }
 0x107   : > { %4151 = vmatmul.msk.bf16.gmra.mxu2 %vm639_vm2, %v4746_v31  ;;  %v5208_v31 = vpack.c.bf16 %v4769_v40, %v4766_v39 }
 0x108   : > { %4167 = vmatmul.msk.bf16.gmra.mxu3 %vm639_vm2, %v5126_v12 }
 0x10a   : > { %v835_v19 = vpop.f32.mrf.mxu1  ;;  %v778_v62 = vpop.f32.mrf.mxu2  ;;  %4555 = vset.pattern.permute.xlu2 %v7491_v24 }
 0x10b   : > { %v740_v63 = vpop.f32.mrf.mxu0  ;;  %v873_v8 = vpop.f32.mrf.mxu3  ;;  %1827 = vperm.xlu2 %4555, %v322_v16  }
 0x10c   : > { %v5202_v46 = vadd.f32 %v835_v19, %v740_v63  ;;  %v5204_v17 = vadd.f32 %v873_v8, %v778_v62  ;;  %v4511_v8 = vld [vmem:[%s7364_s6 + $0x38] sm:$0xff]  ;;  %v5245_v21 = vpop.permute.xlu0 %1757 }
 0x10d   : > { %2039 = vperm.xlu1 %4556, %v323_v42   ;;  %2647 = vmatpush.bf16.msra.mxu1 %v4511_v8  ;;  %7497 = vst [vmem:[#allocation12_spill] sm:$0xff] %v5245_v21 }
 0x10e   : > { %7493 = vst [vmem:[#allocation9_spill] sm:$0xff] %v5204_v17 }
 0x112   : > { %v1256_v12 = vpop.f32.mrf.mxu1  ;;  %v780_v18 = vpop.f32.mrf.mxu2 }
 0x113   : > { %v1162_v19 = vpop.f32.mrf.mxu0  ;;  %v875_v39 = vpop.f32.mrf.mxu3  ;;  %1832 = vperm.xlu2 %4555, %v323_v42  }
 0x114   : > { %v5219_v40 = vadd.f32 %v875_v39, %v780_v18  ;;  %v325_v18 = vld [vmem:[%s7359_s1 + $0x90] sm:$0xff] }
 0x115   : > { %4201 = vmatmul.msk.bf16.gmra.mxu1 %vm639_vm2, %v5208_v31  ;;  %4559 = vset.pattern.permute.xlu1 %v7491_v24 }
 0x116   : > { %7494 = vst [vmem:[#allocation10_spill] sm:$0xff] %v5219_v40  ;;  %4184 = vmatmul.msk.bf16.gmra.mxu0 %vm639_vm2, %v5179_v36  ;;  %1842 = vperm.xlu1 %4559, %v325_v18   ;;  %v7496_v40 = vmov 1  }
 0x117   : > { %4152 = vmatmul.msk.bf16.gmra.mxu2 %vm639_vm2, %v4783_v50  ;;  %4561 = vset.pattern.permute.xlu0 %v7496_v40 }
 0x118   : > { %4168 = vmatmul.msk.bf16.gmra.mxu3 %vm639_vm2, %v5155_v52  ;;  %2047 = vperm.xlu0 %4561, %v325_v18  }
 0x11a   : > { %v1258_v62 = vpop.f32.mrf.mxu1  ;;  %v896_v63 = vpop.f32.mrf.mxu2 }
 0x11b   : > { %v976_v16 = vadd.f32 %v896_v63, %v5001_v57  ;;  %v1164_v39 = vpop.f32.mrf.mxu0  ;;  %v1067_v50 = vpop.f32.mrf.mxu3  ;;  %4558 = vset.pattern.permute.xlu2 %v7496_v40 }
 0x11c   : > { %v1163_v52 = vadd.f32 %v1162_v19, %v1067_v50  ;;  %2043 = vperm.xlu2 %4558, %v324_v60  }
 0x11d   : > { %v1910_v17 = vmul.f32 %v5225_v11, %v976_v16  ;;  %v326_v16 = vld [vmem:[%s7359_s1 + $0x98] sm:$0xff] }
 0x11e   : > { %v1336_v6 = vadd.f32 %v1256_v12, %v1163_v52  ;;  %4562 = vset.pattern.permute.xlu1 %v7496_v40 }
 0x11f   : > { %2051 = vperm.xlu1 %4562, %v326_v16  }
 0x120   : > { %v5243_v57 = vadd.f32 %v1910_v17, %v1336_v6 }
 0x122   : > { %v1261_v37 = vpop.f32.mrf.mxu1  ;;  %v898_v63 = vpop.f32.mrf.mxu2 }
 0x123   : > { %v977_v8 = vadd.f32 %v898_v63, %v5008_v13  ;;  %v1167_v42 = vpop.f32.mrf.mxu0  ;;  %v1069_v19 = vpop.f32.mrf.mxu3 }
 0x124   : > { %v1165_v53 = vadd.f32 %v1164_v39, %v1069_v19  ;;  %v5259_v13 = vpop.permute.xlu2 %1762  ;;  %4560 = vset.pattern.permute.xlu2 %v7491_v24 }
 0x125   : > { %4202 = vmatmul.msk.bf16.gmra.mxu1 %vm639_vm2, %v5241_v27  ;;  %v1911_v54 = vmul.f32 %v5245_v21, %v977_v8  ;;  %7499 = vst [vmem:[#allocation14_spill] sm:$0xff] %v5259_v13  ;;  %1847 = vperm.xlu2 %4560, %v326_v16  }
 0x126   : > { %4185 = vmatmul.msk.bf16.gmra.mxu0 %vm639_vm2, %v5208_v31  ;;  %v1337_v6 = vadd.f32 %v1258_v62, %v1165_v53 }
 0x127   : > { %4153 = vmatmul.msk.bf16.gmra.mxu2 %vm639_vm2, %v4814_v0  ;;  %v5269_v0 = vpop.permute.xlu1 %1979  ;;  %4563 = vset.pattern.permute.xlu1 %v7491_v24 }
 0x128   : > { %v5261_v12 = vadd.f32 %v1911_v54, %v1337_v6  ;;  %4169 = vmatmul.msk.bf16.gmra.mxu3 %vm639_vm2, %v5179_v36  ;;  %7500 = vst [vmem:[#allocation15_spill] sm:$0xff] %v5269_v0  ;;  %v5275_v36 = vpack.c.bf16 %v4832_v5, %v4829_v3 }
 0x12a   : > { %v1263_v17 = vpop.f32.mrf.mxu1  ;;  %v901_v18 = vpop.f32.mrf.mxu2 }
 0x12b   : > { %v978_v39 = vadd.f32 %v901_v18, %v5019_v28  ;;  %v1169_v60 = vpop.f32.mrf.mxu0  ;;  %v1072_v50 = vpop.f32.mrf.mxu3 }
 0x12c   : > { %v1168_v52 = vadd.f32 %v1167_v42, %v1072_v50  ;;  %v5277_v19 = vpop.permute.xlu2 %1767  ;;  %v328_v42 = vld [vmem:[%s7359_s1 + $0xa8] sm:$0xff] }
 0x12d   : > { %v1912_v62 = vmul.f32 %v5259_v13, %v978_v39  ;;  %7501 = vst [vmem:[#allocation16_spill] sm:$0xff] %v5277_v19  ;;  %1857 = vperm.xlu1 %4563, %v328_v42   ;;  %2059 = vperm.xlu0 %4561, %v328_v42   ;;  %v5308_v42 = vpack.c.bf16 %v4864_v26, %v4861_v25  ;;  %v5322_v26 = vpop.permute.xlu0 %1983 }
 0x12e   : > { %v1338_v63 = vadd.f32 %v1261_v37, %v1168_v52  ;;  %7505 = vst [vmem:[#allocation20_spill] sm:$0xff] %v5322_v26 }
 0x12f   : > { %v5293_v18 = vpop.permute.xlu1 %1987 }
 0x130   : > { %v5279_v28 = vadd.f32 %v1912_v62, %v1338_v63  ;;  %7502 = vst [vmem:[#allocation17_spill] sm:$0xff] %v5293_v18 }
 0x132   : > { %v1266_v8 = vpop.f32.mrf.mxu1  ;;  %v903_v53 = vpop.f32.mrf.mxu2 }
 0x133   : > { %v979_v54 = vadd.f32 %v903_v53, %v5030_v38  ;;  %v1172_v6 = vpop.f32.mrf.mxu0  ;;  %v1074_v3 = vpop.f32.mrf.mxu3 }
 0x134   : > { %v1170_v5 = vadd.f32 %v1169_v60, %v1074_v3  ;;  %v329_v60 = vld [vmem:[%s7359_s1 + $0xb0] sm:$0xff]  ;;  %v5303_v62 = vpop.permute.xlu2 %1772 }
 0x135   : > { %4203 = vmatmul.msk.bf16.gmra.mxu1 %vm639_vm2, %v5275_v36  ;;  %v1913_v37 = vmul.f32 %v5277_v19, %v979_v54  ;;  %7503 = vst [vmem:[#allocation18_spill] sm:$0xff] %v5303_v62  ;;  %1862 = vperm.xlu1 %4563, %v329_v60  }
 0x136   : > { %4186 = vmatmul.msk.bf16.gmra.mxu0 %vm639_vm2, %v5241_v27  ;;  %v1339_v38 = vadd.f32 %v1263_v17, %v1170_v5  ;;  %2063 = vperm.xlu0 %4561, %v329_v60  }
 0x137   : > { %4154 = vmatmul.msk.bf16.gmra.mxu2 %vm639_vm2, %v4846_v20  ;;  %v5310_v3 = vpop.permute.xlu1 %1777 }
 0x138   : > { %v5295_v39 = vadd.f32 %v1913_v37, %v1339_v38  ;;  %4170 = vmatmul.msk.bf16.gmra.mxu3 %vm639_vm2, %v5208_v31  ;;  %7504 = vst [vmem:[#allocation19_spill] sm:$0xff] %v5310_v3  ;;  %v327_v37 = vld [vmem:[%s7359_s1 + $0xa0] sm:$0xff] }
 0x139   : > { %1852 = vperm.xlu2 %4560, %v327_v37  }
 0x13a   : > { %v1268_v16 = vpop.f32.mrf.mxu1  ;;  %v906_v50 = vpop.f32.mrf.mxu2 }
 0x13b   : > { %v980_v52 = vadd.f32 %v906_v50, %v5046_v33  ;;  %v1174_v63 = vpop.f32.mrf.mxu0  ;;  %v1077_v20 = vpop.f32.mrf.mxu3 }
 0x13c   : > { %v1173_v17 = vadd.f32 %v1172_v6, %v1077_v20 }
 0x13d   : > { %v1914_v53 = vmul.f32 %v5303_v62, %v980_v52  ;;  %4566 = vset.pattern.permute.xlu1 %v7496_v40 }
 0x13e   : > { %v1340_v31 = vadd.f32 %v1266_v8, %v1173_v17  ;;  %4567 = vset.pattern.permute.xlu0 %v7491_v24 }
 0x140   : > { %v5312_v5 = vadd.f32 %v1914_v53, %v1340_v31  ;;  %v5339_v31 = vpop.permute.xlu1 %1782 }
 0x141   : > { %7507 = vst [vmem:[#allocation22_spill] sm:$0xff] %v5339_v31  ;;  %4564 = vset.pattern.permute.xlu2 %v7496_v40 }
 0x142   : > { %v1271_v54 = vpop.f32.mrf.mxu1  ;;  %v908_v33 = vpop.f32.mrf.mxu2  ;;  %2055 = vperm.xlu2 %4564, %v327_v37   ;;  %v331_v37 = vld [vmem:[%s7359_s1 + $0xc0] sm:$0xff] }
 0x143   : > { %v981_v38 = vadd.f32 %v908_v33, %v5059_v14  ;;  %v1177_v6 = vpop.f32.mrf.mxu0  ;;  %v1079_v25 = vpop.f32.mrf.mxu3 }
 0x144   : > { %v1175_v8 = vadd.f32 %v1174_v63, %v1079_v25  ;;  %v5329_v14 = vpop.permute.xlu2 %1991  ;;  %v330_v63 = vld [vmem:[%s7359_s1 + $0xb8] sm:$0xff]  ;;  %v5343_v25 = vpop.permute.xlu0 %1995 }
 0x145   : > { %4204 = vmatmul.msk.bf16.gmra.mxu1 %vm639_vm2, %v5308_v42  ;;  %v1915_v50 = vmul.f32 %v5310_v3, %v981_v38  ;;  %7506 = vst [vmem:[#allocation21_spill] sm:$0xff] %v5329_v14  ;;  %2067 = vperm.xlu1 %4566, %v330_v63  }
 0x146   : > { %4187 = vmatmul.msk.bf16.gmra.mxu0 %vm639_vm2, %v5275_v36  ;;  %v1341_v60 = vadd.f32 %v1268_v16, %v1175_v8  ;;  %7508 = vst [vmem:[#allocation23_spill] sm:$0xff] %v5343_v25 }
 0x147   : > { %4155 = vmatmul.msk.bf16.gmra.mxu2 %vm639_vm2, %v4878_v44 }
 0x148   : > { %v5331_v20 = vadd.f32 %v1915_v50, %v1341_v60  ;;  %4171 = vmatmul.msk.bf16.gmra.mxu3 %vm639_vm2, %v5241_v27  ;;  %v5347_v27 = vpack.c.bf16 %v4896_v48, %v4893_v47 }
 0x14a   : > { %v1273_v52 = vpop.f32.mrf.mxu1  ;;  %v911_v17 = vpop.f32.mrf.mxu2  ;;  %4565 = vset.pattern.permute.xlu2 %v7491_v24 }
 0x14b   : > { %v982_v53 = vadd.f32 %v911_v17, %v5072_v56  ;;  %v1179_v33 = vpop.f32.mrf.mxu0  ;;  %v1082_v44 = vpop.f32.mrf.mxu3  ;;  %1867 = vperm.xlu2 %4565, %v330_v63  }
 0x14c   : > { %v1178_v16 = vadd.f32 %v1177_v6, %v1082_v44  ;;  %v5349_v56 = vpop.permute.xlu2 %1787  ;;  %v332_v6 = vld [vmem:[%s7359_s1 + $0xc8] sm:$0xff] }
 0x14d   : > { %v1916_v38 = vmul.f32 %v5339_v31, %v982_v53  ;;  %7509 = vst [vmem:[#allocation24_spill] sm:$0xff] %v5349_v56  ;;  %2071 = vperm.xlu1 %4566, %v331_v37   ;;  %1877 = vperm.xlu0 %4567, %v332_v6  }
 0x14e   : > { %v1342_v8 = vadd.f32 %v1271_v54, %v1178_v16 }
 0x150   : > { %v5351_v60 = vadd.f32 %v1916_v38, %v1342_v8  ;;  %v5370_v8 = vpop.permute.xlu0 %1999 }
 0x151   : > { %7511 = vst [vmem:[#allocation26_spill] sm:$0xff] %v5370_v8 }
 0x152   : > { %v1276_v50 = vpop.f32.mrf.mxu1  ;;  %v913_v17 = vpop.f32.mrf.mxu2 }
 0x153   : > { %v983_v53 = vadd.f32 %v913_v17, %v5088_v55  ;;  %v1182_v44 = vpop.f32.mrf.mxu0  ;;  %v1084_v47 = vpop.f32.mrf.mxu3  ;;  %1872 = vperm.xlu2 %4565, %v331_v37  }
 0x154   : > { %v1180_v48 = vadd.f32 %v1179_v33, %v1084_v47  ;;  %v5368_v55 = vpop.permute.xlu1 %2003  ;;  %v333_v33 = vld [vmem:[%s7359_s1 + $0xd0] sm:$0xff]  ;;  %v5380_v47 = vpop.permute.xlu2 %1792 }
 0x155   : > { %4205 = vmatmul.msk.bf16.gmra.mxu1 %vm639_vm2, %v5347_v27  ;;  %v1917_v54 = vmul.f32 %v5349_v56, %v983_v53  ;;  %7510 = vst [vmem:[#allocation25_spill] sm:$0xff] %v5368_v55  ;;  %4569 = vset.pattern.permute.xlu1 %v7491_v24 }
 0x156   : > { %4188 = vmatmul.msk.bf16.gmra.mxu0 %vm639_vm2, %v5308_v42  ;;  %v1343_v16 = vadd.f32 %v1273_v52, %v1180_v48  ;;  %7512 = vst [vmem:[#allocation27_spill] sm:$0xff] %v5380_v47  ;;  %1882 = vperm.xlu1 %4569, %v333_v33  }
 0x157   : > { %4156 = vmatmul.msk.bf16.gmra.mxu2 %vm639_vm2, %v4910_v7  ;;  %4571 = vset.pattern.permute.xlu0 %v7496_v40 }
 0x158   : > { %v5372_v17 = vadd.f32 %v1917_v54, %v1343_v16  ;;  %4172 = vmatmul.msk.bf16.gmra.mxu3 %vm639_vm2, %v5275_v36  ;;  %2079 = vperm.xlu0 %4571, %v333_v33   ;;  %v5387_v54 = vpack.c.bf16 %v4925_v10, %v4922_v9  ;;  %v5394_v62 = vpop.permute.xlu0 %1797 }
 0x159   : > { %7514 = vst [vmem:[#allocation29_spill] sm:$0xff] %v5394_v62 }
 0x15a   : > { %v1278_v38 = vpop.f32.mrf.mxu1  ;;  %v916_v63 = vpop.f32.mrf.mxu2 }
 0x15b   : > { %v984_v53 = vadd.f32 %v916_v63, %v5105_v22  ;;  %v1184_v7 = vpop.f32.mrf.mxu0  ;;  %v1087_v52 = vpop.f32.mrf.mxu3  ;;  %4568 = vset.pattern.permute.xlu2 %v7496_v40 }
 0x15c   : > { %v1183_v48 = vadd.f32 %v1182_v44, %v1087_v52  ;;  %v5389_v63 = vpop.permute.xlu1 %2007  ;;  %2075 = vperm.xlu2 %4568, %v332_v6  }
 0x15d   : > { %v1918_v36 = vmul.f32 %v5380_v47, %v984_v53  ;;  %7513 = vst [vmem:[#allocation28_spill] sm:$0xff] %v5389_v63 }
 0x15e   : > { %v1344_v16 = vadd.f32 %v1276_v50, %v1183_v48  ;;  %4572 = vset.pattern.permute.xlu1 %v7496_v40 }
 0x160   : > { %v5391_v56 = vadd.f32 %v1918_v36, %v1344_v16 }
 0x162   : > { %v1281_v22 = vpop.f32.mrf.mxu1  ;;  %v918_v31 = vpop.f32.mrf.mxu2 }
 0x163   : > { %v985_v3 = vadd.f32 %v918_v31, %v5120_v2  ;;  %v1187_v37 = vpop.f32.mrf.mxu0  ;;  %v1089_v44 = vpop.f32.mrf.mxu3 }
 0x164   : > { %v1185_v9 = vadd.f32 %v1184_v7, %v1089_v44  ;;  %v5405_v2 = vpop.permute.xlu2 %2011  ;;  %v5415_v6 = vpop.permute.xlu1 %1802  ;;  %4570 = vset.pattern.permute.xlu2 %v7491_v24 }
 0x165   : > { %4206 = vmatmul.msk.bf16.gmra.mxu1 %vm639_vm2, %v5387_v54  ;;  %v1919_v10 = vmul.f32 %v5394_v62, %v985_v3  ;;  %7515 = vst [vmem:[#allocation30_spill] sm:$0xff] %v5405_v2  ;;  %v334_v3 = vld [vmem:[%s7359_s1 + $0xd8] sm:$0xff] }
 0x166   : > { %4189 = vmatmul.msk.bf16.gmra.mxu0 %vm639_vm2, %v5347_v27  ;;  %v1345_v31 = vadd.f32 %v1278_v38, %v1185_v9  ;;  %7516 = vst [vmem:[#allocation31_spill] sm:$0xff] %v5415_v6  ;;  %2083 = vperm.xlu1 %4572, %v334_v3  }
 0x167   : > { %4157 = vmatmul.msk.bf16.gmra.mxu2 %vm639_vm2, %v4940_v35  ;;  %1887 = vperm.xlu2 %4570, %v334_v3  }
 0x168   : > { %v5407_v33 = vadd.f32 %v1919_v10, %v1345_v31  ;;  %4173 = vmatmul.msk.bf16.gmra.mxu3 %vm639_vm2, %v5308_v42  ;;  %v618_v42 = vpack.c.bf16 %v4952_v32, %v4949_v41  ;;  %v336_v10 = vld [vmem:[%s7359_s1 + $0xe8] sm:$0xff] }
 0x169   : > { %2091 = vperm.xlu0 %4571, %v336_v10  }
 0x16a   : > { %v1283_v50 = vpop.f32.mrf.mxu1  ;;  %v921_v53 = vpop.f32.mrf.mxu2 }
 0x16b   : > { %v986_v7 = vadd.f32 %v921_v53, %v5131_v59  ;;  %v1189_v52 = vpop.f32.mrf.mxu0  ;;  %v1092_v35 = vpop.f32.mrf.mxu3 }
 0x16c   : > { %v1188_v48 = vadd.f32 %v1187_v37, %v1092_v35  ;;  %v5421_v44 = vpop.permute.xlu2 %1807  ;;  %v5436_v3 = vpop.permute.xlu1 %2019 }
 0x16d   : > { %v1920_v38 = vmul.f32 %v5415_v6, %v986_v7  ;;  %7517 = vst [vmem:[#allocation32_spill] sm:$0xff] %v5421_v44 }
 0x16e   : > { %v1346_v36 = vadd.f32 %v1281_v22, %v1188_v48  ;;  %4573 = vset.pattern.permute.xlu1 %v7491_v24  ;;  %7518 = vst [vmem:[#allocation33_spill] sm:$0xff] %v5436_v3 }
 0x16f   : > { %1897 = vperm.xlu1 %4573, %v336_v10  }
 0x170   : > { %v5423_v9 = vadd.f32 %v1920_v38, %v1346_v36 }
 0x172   : > { %v1286_v16 = vpop.f32.mrf.mxu1  ;;  %v923_v59 = vpop.f32.mrf.mxu2 }
 0x173   : > { %v987_v37 = vadd.f32 %v923_v59, %v5146_v30  ;;  %v1192_v31 = vpop.f32.mrf.mxu0  ;;  %v1094_v41 = vpop.f32.mrf.mxu3 }
 0x174   : > { %v1190_v22 = vadd.f32 %v1189_v52, %v1094_v41  ;;  %v337_v52 = vld [vmem:[%s7359_s1 + $0xf0] sm:$0xff]  ;;  %v5446_v36 = vpop.permute.xlu2 %1812  ;;  %v7520_v41 = vrot.slane %v4952_v32, 7 }
 0x175   : > { %4207 = vmatmul.msk.bf16.gmra.mxu1 %vm639_vm2, %v618_v42  ;;  %v1921_v53 = vmul.f32 %v5421_v44, %v987_v37  ;;  %7519 = vst [vmem:[#allocation34_spill] sm:$0xff] %v5446_v36  ;;  %2095 = vperm.xlu0 %4571, %v337_v52  }
 0x176   : > { %4190 = vmatmul.msk.bf16.gmra.mxu0 %vm639_vm2, %v5387_v54  ;;  %v1347_v30 = vadd.f32 %v1283_v50, %v1190_v22 }
 0x177   : > { %4158 = vmatmul.msk.bf16.gmra.mxu2 %vm639_vm2, %v4978_v29  ;;  %1902 = vperm.xlu1 %4573, %v337_v52  }
 0x178   : > { %v5438_v35 = vadd.f32 %v1921_v53, %v1347_v30  ;;  %4174 = vmatmul.msk.bf16.gmra.mxu3 %vm639_vm2, %v5347_v27  ;;  %v501_v27 = vsel %vm403_vm0, %v7520_v41, 0.0  ;;  %v5452_v53 = vpop.permute.xlu1 %1817 }
 0x179   : > { %7521 = vst [vmem:[#allocation35_spill] sm:$0xff] %v5452_v53 }
 0x17a   : > { %v1288_v7 = vpop.f32.mrf.mxu1  ;;  %v926_v48 = vpop.f32.mrf.mxu2 }
 0x17b   : > { %v988_v38 = vadd.f32 %v926_v48, %v5160_v23  ;;  %v1194_v59 = vpop.f32.mrf.mxu0  ;;  %v1097_v29 = vpop.f32.mrf.mxu3  ;;  %v335_v48 = vld [vmem:[%s7359_s1 + $0xe0] sm:$0xff] }
 0x17c   : > { %v1193_v50 = vadd.f32 %v1192_v31, %v1097_v29  ;;  %v880_v29 = vpack.c.bf16 0.0, %v501_v27  ;;  %1892 = vperm.xlu2 %4570, %v335_v48  }
 0x17d   : > { %v1922_v10 = vmul.f32 %v5446_v36, %v988_v38  ;;  %v7522_v38 = vmov 0.0|0.0   ;;  %v4581_v36 = vld [vmem:[%s4713_s20 + $0x10] sm:$0xff] }
 0x17e   : > { %v1348_v37 = vadd.f32 %v1286_v16, %v1193_v50  ;;  %v5462_v16 = vpop.permute.xlu0 %2015 }
 0x17f   : > { %4576 = vset.pattern.permute.xlu1 %v7496_v40  ;;  %7523 = vst [vmem:[#allocation36_spill] sm:$0xff] %v5462_v16 }
 0x180   : > { %v5454_v30 = vadd.f32 %v1922_v10, %v1348_v37  ;;  %v5477_v44 = vpop.permute.xlu1 %1822 }
 0x181   : > { %7525 = vst [vmem:[#allocation38_spill] sm:$0xff] %v5477_v44 }
 0x182   : > { %v1291_v22 = vpop.f32.mrf.mxu1  ;;  %v928_v23 = vpop.f32.mrf.mxu2 }
 0x183   : > { %v989_v52 = vadd.f32 %v928_v23, %v5173_v34  ;;  %v1197_v31 = vpop.f32.mrf.mxu0  ;;  %v1099_v32 = vpop.f32.mrf.mxu3 }
 0x184   : > { %v1195_v50 = vadd.f32 %v1194_v59, %v1099_v32  ;;  %v5467_v34 = vpop.permute.xlu2 %2023  ;;  %v506_v59 = vrot.slane %v4581_v36, 1  ;;  %v4582_v32 = vld [vmem:[%s4713_s20 + $0x18] sm:$0xff]  ;;  %4574 = vset.pattern.permute.xlu2 %v7496_v40 }
 0x185   : > { %1330 = vmatmul.bf16.gmra.mxu1 %v7522_v38  ;;  %v1923_v10 = vmul.f32 %v5452_v53, %v989_v52  ;;  %7524 = vst [vmem:[#allocation37_spill] sm:$0xff] %v5467_v34  ;;  %v508_v52 = vrot.slane %v4582_v32, 1  ;;  %v4583_v53 = vld [vmem:[%s4713_s20 + $0x20] sm:$0xff]  ;;  %2087 = vperm.xlu2 %4574, %v335_v48  }
 0x186   : > { %4191 = vmatmul.msk.bf16.gmra.mxu0 %vm639_vm2, %v618_v42  ;;  %v1349_v37 = vadd.f32 %v1288_v7, %v1195_v50  ;;  %v510_v42 = vrot.slane %v4583_v53, 1  ;;  %v4584_v50 = vld [vmem:[%s4713_s20] sm:$0xff]  ;;  %v5483_v32 = vpop.permute.xlu0 %2027 }
 0x187   : > { %4159 = vmatmul.msk.bf16.gmra.mxu2 %vm639_vm2, %v880_v29  ;;  %7526 = vst [vmem:[#allocation39_spill] sm:$0xff] %v5483_v32  ;;  %v509_v53 = vsel %vm502_vm3, %v506_v59, %v508_v52 }
 0x188   : > { %v5469_v27 = vadd.f32 %v1923_v10, %v1349_v37  ;;  %4175 = vmatmul.msk.bf16.gmra.mxu3 %vm639_vm2, %v5387_v54  ;;  %v503_v10 = vrot.slane %v4584_v50, 1  ;;  %v4585_v37 = vld [vmem:[%s4713_s20 + $0x8] sm:$0xff] }
 0x189   : > { %v504_v6 = vrot.slane %v4585_v37, 1 }
 0x18a   : > { %v1293_v41 = vpop.f32.mrf.mxu1  ;;  %v931_v23 = vpop.f32.mrf.mxu2 }
 0x18b   : > { %v990_v29 = vadd.f32 %v931_v23, %v5186_v15  ;;  %v1199_v7 = vpop.f32.mrf.mxu0  ;;  %v1102_v54 = vpop.f32.mrf.mxu3  ;;  %v511_v15 = vsel %vm502_vm3, %v508_v52, %v510_v42  ;;  %v505_v23 = vsel %vm502_vm3, %v503_v10, %v504_v6  ;;  %v507_v40 = vsel %vm502_vm3, %v504_v6, %v506_v59 }
 0x18c   : > { %v1198_v62 = vadd.f32 %v1197_v31, %v1102_v54  ;;  %v5489_v50 = vpop.permute.xlu2 %1827  ;;  %v5493_v31 = vpack.c.bf16 %v511_v15, %v509_v53  ;;  %v1371_v13 = vpack.c.bf16 %v507_v40, %v505_v23  ;;  %v5503_v59 = vpop.permute.xlu1 %2035  ;;  %v4510_v53 = vld [vmem:[%s7364_s6 + $0x30] sm:$0xff]  ;;  %v338_v15 = vld [vmem:[%s7359_s1 + $0xf8] sm:$0xff] }
 0x18d   : > { %v1924_v36 = vmul.f32 %v5477_v44, %v990_v29  ;;  %7527 = vst [vmem:[#allocation40_spill] sm:$0xff] %v5489_v50  ;;  %v599_v29 = vsel %vm502_vm3, 0.0, %v503_v10  ;;  %4575 = vset.pattern.permute.xlu2 %v7491_v24  ;;  %2099 = vperm.xlu1 %4576, %v338_v15  }
 0x18e   : > { %v1350_v47 = vadd.f32 %v1291_v22, %v1198_v62  ;;  %v7387_v62 = vmov 0.0   ;;  %7528 = vst [vmem:[#allocation41_spill] sm:$0xff] %v5503_v59  ;;  %1907 = vperm.xlu2 %4575, %v338_v15   ;;  %2648 = vmatpush.bf16.msra.mxu1 %v4510_v53 }
 0x18f   : > { %v1370_v6 = vpack.c.bf16 %v599_v29, %v7387_v62 }
 0x190   : > { %v5491_v37 = vadd.f32 %v1924_v36, %v1350_v47  ;;  %v5505_v36 = vpop.permute.xlu0 %2031 }
 0x191   : > { %7529 = vst [vmem:[#allocation42_spill] sm:$0xff] %v5505_v36 }
 0x192   : > { %v1296_v19 = vpop.f32.mrf.mxu1  ;;  %v933_v48 = vpop.f32.mrf.mxu2 }
 0x193   : > { %v991_v54 = vadd.f32 %v933_v48, %v5202_v46  ;;  %v1202_v44 = vpop.f32.mrf.mxu0  ;;  %v1104_v52 = vpop.f32.mrf.mxu3  ;;  %v4586_v48 = vld [vmem:[%s4713_s20 + $0x28] sm:$0xff] }
 0x194   : > { %v1200_v22 = vadd.f32 %v1199_v7, %v1104_v52  ;;  %v5517_v40 = vpop.permute.xlu2 %1832  ;;  %v512_v29 = vrot.slane %v4586_v48, 1 }
 0x195   : > { %v1925_v47 = vmul.f32 %v5489_v50, %v991_v54  ;;  %7530 = vst [vmem:[#allocation43_spill] sm:$0xff] %v5517_v40  ;;  %v4587_v54 = vld [vmem:[%s4713_s20 + $0x30] sm:$0xff] }
 0x196   : > { %4243 = vmatmul.msk.bf16.vlgmr.msra.gmra.mxu0 %vm639_vm2, %v5493_v31  ;;  %v1351_v46 = vadd.f32 %v1293_v41, %v1200_v22  ;;  %v514_v52 = vrot.slane %v4587_v54, 1 }
 0x197   : > { %4210 = vmatmul.msk.bf16.vlgmr.msra.gmra.mxu2 %vm639_vm2, %v1371_v13 }
 0x198   : > { %v5507_v24 = vadd.f32 %v1925_v47, %v1351_v46  ;;  %4226 = vmatmul.msk.bf16.vlgmr.msra.gmra.mxu3 %vm639_vm2, %v1370_v6  ;;  %v513_v46 = vsel %vm502_vm3, %v510_v42, %v512_v29  ;;  %v515_v62 = vsel %vm502_vm3, %v512_v29, %v514_v52  ;;  %v5531_v53 = vpop.permute.xlu0 %1837 }
 0x199   : > { %v5528_v11 = vpack.c.bf16 %v515_v62, %v513_v46  ;;  %7532 = vst [vmem:[#allocation45_spill] sm:$0xff] %v5531_v53 }
 0x19a   : > { %v1298_v10 = vpop.f32.mrf.mxu1  ;;  %v936_v7 = vpop.f32.mrf.mxu2 }
 0x19b   : > { %v992_v23 = vadd.f32 %v936_v7, %v5011_v61  ;;  %v1204_v41 = vpop.f32.mrf.mxu0  ;;  %v1107_v6 = vpop.f32.mrf.mxu3 }
 0x19c   : > { %v1203_v22 = vadd.f32 %v1202_v44, %v1107_v6  ;;  %v5524_v7 = vpop.permute.xlu1 %2039 }
 0x19d   : > { %v1926_v47 = vmul.f32 %v5517_v40, %v992_v23  ;;  %7531 = vst [vmem:[#allocation44_spill] sm:$0xff] %v5524_v7 }
 0x19e   : > { %v1352_v50 = vadd.f32 %v1296_v19, %v1203_v22  ;;  %v5538_v19 = vpop.permute.xlu2 %2043 }
 0x19f   : > { %7533 = vst [vmem:[#allocation46_spill] sm:$0xff] %v5538_v19 }
 0x1a0   : > { %v5526_v21 = vadd.f32 %v1926_v47, %v1352_v50  ;;  %v4588_v47 = vld [vmem:[%s4713_s20 + $0x38] sm:$0xff] }
 0x1a1   : > { %v516_v46 = vrot.slane %v4588_v47, 1 }
 0x1a2   : > { %v1301_v61 = vpop.f32.mrf.mxu1  ;;  %v938_v48 = vpop.f32.mrf.mxu2 }
 0x1a3   : > { %v993_v15 = vadd.f32 %v938_v48, %v5021_v4  ;;  %v1207_v44 = vpop.f32.mrf.mxu0  ;;  %v1109_v23 = vpop.f32.mrf.mxu3  ;;  %v4589_v48 = vld [vmem:[%s4713_s20 + $0x40] sm:$0xff] }
 0x1a4   : > { %v1205_v42 = vadd.f32 %v1204_v41, %v1109_v23  ;;  %v5544_v41 = vpop.permute.xlu1 %1842 }
 0x1a5   : > { %v1927_v29 = vmul.f32 %v5531_v53, %v993_v15  ;;  %7535 = vst [vmem:[#allocation48_spill] sm:$0xff] %v5544_v41  ;;  %v518_v15 = vrot.slane %v4589_v48, 1 }
 0x1a6   : > { %4244 = vmatmul.msk.bf16.gmra.mxu0 %vm639_vm2, %v5528_v11  ;;  %v1353_v50 = vadd.f32 %v1298_v10, %v1205_v42  ;;  %v517_v10 = vsel %vm502_vm3, %v514_v52, %v516_v46 }
 0x1a7   : > { %4211 = vmatmul.msk.bf16.gmra.mxu2 %vm639_vm2, %v5493_v31  ;;  %v519_v42 = vsel %vm502_vm3, %v516_v46, %v518_v15 }
 0x1a8   : > { %v5540_v4 = vadd.f32 %v1927_v29, %v1353_v50  ;;  %4227 = vmatmul.msk.bf16.gmra.mxu3 %vm639_vm2, %v1371_v13  ;;  %v5551_v50 = vpop.permute.xlu2 %1847 }
 0x1a9   : > { %7536 = vst [vmem:[#allocation49_spill] sm:$0xff] %v5551_v50 }
 0x1aa   : > { %v1303_v62 = vpop.f32.mrf.mxu1  ;;  %7534 = vst [vmem:[#allocation47_spill] sm:$0xff] %v5540_v4  ;;  %v941_v54 = vpop.f32.mrf.mxu2  ;;  %v5555_v4 = vpack.c.bf16 %v519_v42, %v517_v10  ;;  %v4590_v42 = vld [vmem:[%s4713_s20 + $0x48] sm:$0xff] }
 0x1ab   : > { %v994_v6 = vadd.f32 %v941_v54, %v5032_v58  ;;  %v1209_v22 = vpop.f32.mrf.mxu0  ;;  %v1112_v23 = vpop.f32.mrf.mxu3 }
 0x1ac   : > { %v1208_v53 = vadd.f32 %v1207_v44, %v1112_v23 }
 0x1ad   : > { %v1928_v40 = vmul.f32 %v5544_v41, %v994_v6 }
 0x1ae   : > { %v1354_v29 = vadd.f32 %v1301_v61, %v1208_v53 }
 0x1b0   : > { %v5553_v58 = vadd.f32 %v1928_v40, %v1354_v29  ;;  %v5563_v40 = vpop.permute.xlu1 %2051  ;;  %v5570_v23 = vpop.permute.xlu2 %1852  ;;  %v520_v29 = vrot.slane %v4590_v42, 1 }
 0x1b1   : > { %7537 = vst [vmem:[#allocation50_spill] sm:$0xff] %v5563_v40 }
 0x1b2   : > { %v1306_v13 = vpop.f32.mrf.mxu1  ;;  %v943_v54 = vpop.f32.mrf.mxu2  ;;  %7539 = vst [vmem:[#allocation52_spill] sm:$0xff] %v5570_v23 }
 0x1b3   : > { %v995_v47 = vadd.f32 %v943_v54, %v5049_v1  ;;  %v1212_v48 = vpop.f32.mrf.mxu0  ;;  %v1114_v44 = vpop.f32.mrf.mxu3  ;;  %v4591_v54 = vld [vmem:[%s4713_s20 + $0x50] sm:$0xff] }
 0x1b4   : > { %v1210_v6 = vadd.f32 %v1209_v22, %v1114_v44 }
 0x1b5   : > { %v1929_v52 = vmul.f32 %v5551_v50, %v995_v47  ;;  %v522_v47 = vrot.slane %v4591_v54, 1 }
 0x1b6   : > { %4245 = vmatmul.msk.bf16.gmra.mxu0 %vm639_vm2, %v5555_v4  ;;  %v1355_v61 = vadd.f32 %v1303_v62, %v1210_v6  ;;  %v521_v6 = vsel %vm502_vm3, %v518_v15, %v520_v29 }
 0x1b7   : > { %4212 = vmatmul.msk.bf16.gmra.mxu2 %vm639_vm2, %v5528_v11 }
 0x1b8   : > { %v5565_v46 = vadd.f32 %v1929_v52, %v1355_v61  ;;  %4228 = vmatmul.msk.bf16.gmra.mxu3 %vm639_vm2, %v5493_v31  ;;  %v523_v52 = vsel %vm502_vm3, %v520_v29, %v522_v47  ;;  %v5577_v41 = vpop.permute.xlu1 %1857 }
 0x1b9   : > { %7540 = vst [vmem:[#allocation53_spill] sm:$0xff] %v5577_v41 }
 0x1ba   : > { %v1308_v53 = vpop.f32.mrf.mxu1  ;;  %7538 = vst [vmem:[#allocation51_spill] sm:$0xff] %v5565_v46  ;;  %v946_v1 = vpop.f32.mrf.mxu2  ;;  %v5581_v46 = vpack.c.bf16 %v523_v52, %v521_v6 }
 0x1bb   : > { %v996_v22 = vadd.f32 %v946_v1, %v5061_v49  ;;  %v1214_v10 = vpop.f32.mrf.mxu0  ;;  %v1117_v44 = vpop.f32.mrf.mxu3 }
 0x1bc   : > { %v1213_v50 = vadd.f32 %v1212_v48, %v1117_v44  ;;  %v5584_v48 = vpop.permute.xlu0 %2047 }
 0x1bd   : > { %v1930_v62 = vmul.f32 %v5570_v23, %v996_v22  ;;  %7542 = vst [vmem:[#allocation55_spill] sm:$0xff] %v5584_v48 }
 0x1be   : > { %v1356_v61 = vadd.f32 %v1306_v13, %v1213_v50  ;;  %v5591_v13 = vpop.permute.xlu2 %2055 }
 0x1bf   : > { %7543 = vst [vmem:[#allocation56_spill] sm:$0xff] %v5591_v13 }
 0x1c0   : > { %v5579_v49 = vadd.f32 %v1930_v62, %v1356_v61  ;;  %v5598_v6 = vpop.permute.xlu1 %1862  ;;  %v4592_v61 = vld [vmem:[%s4713_s20 + $0x58] sm:$0xff] }
 0x1c1   : > { %7545 = vst [vmem:[#allocation58_spill] sm:$0xff] %v5598_v6 }
 0x1c2   : > { %v1311_v31 = vpop.f32.mrf.mxu1  ;;  %7541 = vst [vmem:[#allocation54_spill] sm:$0xff] %v5579_v49  ;;  %v948_v1 = vpop.f32.mrf.mxu2 }
 0x1c3   : > { %v997_v42 = vadd.f32 %v948_v1, %v5075_v51  ;;  %v1217_v54 = vpop.f32.mrf.mxu0  ;;  %v1119_v22 = vpop.f32.mrf.mxu3  ;;  %v524_v1 = vrot.slane %v4592_v61, 1 }
 0x1c4   : > { %v1215_v15 = vadd.f32 %v1214_v10, %v1119_v22 }
 0x1c5   : > { %v1931_v29 = vmul.f32 %v5577_v41, %v997_v42  ;;  %v4593_v42 = vld [vmem:[%s4713_s20 + $0x60] sm:$0xff] }
 0x1c6   : > { %4246 = vmatmul.msk.bf16.gmra.mxu0 %vm639_vm2, %v5581_v46  ;;  %v1357_v50 = vadd.f32 %v1308_v53, %v1215_v15  ;;  %v526_v22 = vrot.slane %v4593_v42, 1  ;;  %v5603_v15 = vpop.permute.xlu0 %2059  ;;  %v7549_v42 = vld [vmem:[#allocation2_spill] sm:$0xff] }
 0x1c7   : > { %4213 = vmatmul.msk.bf16.gmra.mxu2 %vm639_vm2, %v5555_v4  ;;  %7546 = vst [vmem:[#allocation59_spill] sm:$0xff] %v5603_v15 }
 0x1c8   : > { %v5593_v51 = vadd.f32 %v1931_v29, %v1357_v50  ;;  %4229 = vmatmul.msk.bf16.gmra.mxu3 %vm639_vm2, %v5528_v11  ;;  %v525_v29 = vsel %vm502_vm3, %v522_v47, %v524_v1  ;;  %v527_v11 = vsel %vm502_vm3, %v524_v1, %v526_v22 }
 0x1c9   : > { %v5611_v61 = vpack.c.bf16 %v527_v11, %v525_v29  ;;  %v7553_v29 = vld [vmem:[#allocation3_spill] sm:$0xff] }
 0x1ca   : > { %v1313_v44 = vpop.f32.mrf.mxu1  ;;  %7544 = vst [vmem:[#allocation57_spill] sm:$0xff] %v5593_v51  ;;  %v951_v62 = vpop.f32.mrf.mxu2 }
 0x1cb   : > { %v998_v10 = vadd.f32 %v951_v62, %v5090_v43  ;;  %v1219_v52 = vpop.f32.mrf.mxu0  ;;  %v1122_v41 = vpop.f32.mrf.mxu3 }
 0x1cc   : > { %v1218_v23 = vadd.f32 %v1217_v54, %v1122_v41  ;;  %v5607_v43 = vpop.permute.xlu2 %1867 }
 0x1cd   : > { %v1932_v53 = vmul.f32 %v5598_v6, %v998_v10  ;;  %7547 = vst [vmem:[#allocation60_spill] sm:$0xff] %v5607_v43 }
 0x1ce   : > { %v1358_v50 = vadd.f32 %v1311_v31, %v1218_v23  ;;  %v5619_v23 = vpop.permute.xlu1 %2067  ;;  %v5621_v1 = vpop.permute.xlu0 %2063 }
 0x1cf   : > { %7550 = vst [vmem:[#allocation2_spill] sm:$0xff] %v5619_v23 }
 0x1d0   : > { %v5609_v62 = vadd.f32 %v1932_v53, %v1358_v50  ;;  %7551 = vst [vmem:[#allocation62_spill] sm:$0xff] %v5621_v1 }
 0x1d2   : > { %v1316_v51 = vpop.f32.mrf.mxu1  ;;  %7548 = vst [vmem:[#allocation61_spill] sm:$0xff] %v5609_v62  ;;  %v953_v49 = vpop.f32.mrf.mxu2 }
 0x1d3   : > { %v999_v13 = vadd.f32 %v953_v49, %v7549_v42  ;;  %v1222_v41 = vpop.f32.mrf.mxu0  ;;  %v1124_v54 = vpop.f32.mrf.mxu3  ;;  %v4594_v42 = vld [vmem:[%s4713_s20 + $0x68] sm:$0xff] }
 0x1d4   : > { %v1220_v10 = vadd.f32 %v1219_v52, %v1124_v54  ;;  %v5628_v11 = vpop.permute.xlu2 %1872  ;;  %v528_v54 = vrot.slane %v4594_v42, 1  ;;  %v7558_v42 = vld [vmem:[#allocation4_spill] sm:$0xff] }
 0x1d5   : > { %v1933_v47 = vmul.f32 %v5607_v43, %v999_v13  ;;  %7554 = vst [vmem:[#allocation3_spill] sm:$0xff] %v5628_v11  ;;  %v4595_v43 = vld [vmem:[%s4713_s20 + $0x70] sm:$0xff] }
 0x1d6   : > { %4247 = vmatmul.msk.bf16.gmra.mxu0 %vm639_vm2, %v5611_v61  ;;  %v1359_v31 = vadd.f32 %v1313_v44, %v1220_v10  ;;  %v530_v6 = vrot.slane %v4595_v43, 1 }
 0x1d7   : > { %4214 = vmatmul.msk.bf16.gmra.mxu2 %vm639_vm2, %v5581_v46 }
 0x1d8   : > { %v5623_v49 = vadd.f32 %v1933_v47, %v1359_v31  ;;  %4230 = vmatmul.msk.bf16.gmra.mxu3 %vm639_vm2, %v5555_v4  ;;  %v529_v47 = vsel %vm502_vm3, %v526_v22, %v528_v54  ;;  %v531_v31 = vsel %vm502_vm3, %v528_v54, %v530_v6  ;;  %v5635_v4 = vpop.permute.xlu1 %2071 }
 0x1d9   : > { %7555 = vst [vmem:[#allocation64_spill] sm:$0xff] %v5635_v4  ;;  %v5641_v1 = vpack.c.bf16 %v531_v31, %v529_v47  ;;  %v7561_v47 = vld [vmem:[#allocation5_spill] sm:$0xff] }
 0x1da   : > { %v1318_v53 = vpop.f32.mrf.mxu1  ;;  %7552 = vst [vmem:[#allocation63_spill] sm:$0xff] %v5623_v49  ;;  %v956_v52 = vpop.f32.mrf.mxu2 }
 0x1db   : > { %v1000_v13 = vadd.f32 %v956_v52, %v7553_v29  ;;  %v1224_v50 = vpop.f32.mrf.mxu0  ;;  %v1127_v23 = vpop.f32.mrf.mxu3 }
 0x1dc   : > { %v1223_v44 = vadd.f32 %v1222_v41, %v1127_v23  ;;  %v5639_v29 = vpop.permute.xlu0 %1877 }
 0x1dd   : > { %v1934_v10 = vmul.f32 %v5628_v11, %v1000_v13  ;;  %7557 = vst [vmem:[#allocation66_spill] sm:$0xff] %v5639_v29 }
 0x1de   : > { %v1360_v49 = vadd.f32 %v1316_v51, %v1223_v44  ;;  %v5649_v51 = vpop.permute.xlu2 %2075 }
 0x1df   : > { %7559 = vst [vmem:[#allocation4_spill] sm:$0xff] %v5649_v51 }
 0x1e0   : > { %v5637_v62 = vadd.f32 %v1934_v10, %v1360_v49 }
 0x1e2   : > { %7556 = vst [vmem:[#allocation65_spill] sm:$0xff] %v5637_v62  ;;  %v958_v52 = vpop.f32.mrf.mxu2  ;;  %v1321_v23 = vpop.f32.mrf.mxu1 }
 0x1e3   : > { %v1001_v43 = vadd.f32 %v958_v52, %v7558_v42  ;;  %v1227_v41 = vpop.f32.mrf.mxu0  ;;  %v1129_v13 = vpop.f32.mrf.mxu3  ;;  %v4596_v42 = vld [vmem:[%s4713_s20 + $0x78] sm:$0xff] }
 0x1e4   : > { %v1225_v22 = vadd.f32 %v1224_v50, %v1129_v13  ;;  %v5656_v50 = vpop.permute.xlu1 %1882  ;;  %v4597_v13 = vld [vmem:[%s4713_s20 + $0x80] sm:$0xff] }
 0x1e5   : > { %v1935_v54 = vmul.f32 %v5639_v29, %v1001_v43  ;;  %7562 = vst [vmem:[#allocation5_spill] sm:$0xff] %v5656_v50  ;;  %v532_v43 = vrot.slane %v4596_v42, 1  ;;  %v534_v29 = vrot.slane %v4597_v13, 1  ;;  %v7564_v42 = vld [vmem:[#allocation6_spill] sm:$0xff] }
 0x1e6   : > { %4248 = vmatmul.msk.bf16.gmra.mxu0 %vm639_vm2, %v5641_v1  ;;  %v1361_v49 = vadd.f32 %v1318_v53, %v1225_v22 }
 0x1e7   : > { %4215 = vmatmul.msk.bf16.gmra.mxu2 %vm639_vm2, %v5611_v61  ;;  %v533_v22 = vsel %vm502_vm3, %v530_v6, %v532_v43 }
 0x1e8   : > { %v5651_v44 = vadd.f32 %v1935_v54, %v1361_v49  ;;  %4231 = vmatmul.msk.bf16.gmra.mxu3 %vm639_vm2, %v5581_v46  ;;  %v535_v54 = vsel %vm502_vm3, %v532_v43, %v534_v29  ;;  %v5663_v49 = vpop.permute.xlu2 %1887 }
 0x1e9   : > { %7563 = vst [vmem:[#allocation68_spill] sm:$0xff] %v5663_v49 }
 0x1ea   : > { %7560 = vst [vmem:[#allocation67_spill] sm:$0xff] %v5651_v44  ;;  %v961_v10 = vpop.f32.mrf.mxu2  ;;  %v1323_v62 = vpop.f32.mrf.mxu1  ;;  %v5667_v44 = vpack.c.bf16 %v535_v54, %v533_v22  ;;  %v4598_v22 = vld [vmem:[%s4713_s20 + $0x88] sm:$0xff] }
 0x1eb   : > { %v1002_v31 = vadd.f32 %v961_v10, %v7561_v47  ;;  %v1229_v52 = vpop.f32.mrf.mxu0  ;;  %v1132_v11 = vpop.f32.mrf.mxu3  ;;  %v536_v54 = vrot.slane %v4598_v22, 1  ;;  %v7571_v22 = vld [vmem:[#allocation8_spill] sm:$0xff] }
 0x1ec   : > { %v1228_v4 = vadd.f32 %v1227_v41, %v1132_v11  ;;  %v5673_v6 = vpop.permute.xlu1 %2083 }
 0x1ed   : > { %v1936_v53 = vmul.f32 %v5656_v50, %v1002_v31  ;;  %7565 = vst [vmem:[#allocation6_spill] sm:$0xff] %v5673_v6 }
 0x1ee   : > { %v1362_v46 = vadd.f32 %v1321_v23, %v1228_v4 }
 0x1f0   : > { %v5665_v10 = vadd.f32 %v1936_v53, %v1362_v46  ;;  %v7567_v53 = vld [vmem:[#allocation7_spill] sm:$0xff]  ;;  %v4599_v46 = vld [vmem:[%s4713_s20 + $0x90] sm:$0xff] }
 0x1f2   : > { %v963_v47 = vpop.f32.mrf.mxu2  ;;  %v1326_v4 = vpop.f32.mrf.mxu1 }
 0x1f3   : > { %v1003_v51 = vadd.f32 %v963_v47, %v7564_v42  ;;  %v1232_v13 = vpop.f32.mrf.mxu0  ;;  %v1134_v15 = vpop.f32.mrf.mxu3  ;;  %v538_v47 = vrot.slane %v4599_v46, 1 }
 0x1f4   : > { %v1230_v11 = vadd.f32 %v1229_v52, %v1134_v15  ;;  %v5682_v52 = vpop.permute.xlu2 %1892 }
 0x1f5   : > { %v1937_v41 = vmul.f32 %v5663_v49, %v1003_v51  ;;  %7568 = vst [vmem:[#allocation7_spill] sm:$0xff] %v5682_v52 }
 0x1f6   : > { %4249 = vmatmul.msk.bf16.gmra.mxu0 %vm639_vm2, %v5667_v44  ;;  %v1363_v23 = vadd.f32 %v1323_v62, %v1230_v11  ;;  %v537_v62 = vsel %vm502_vm3, %v534_v29, %v536_v54  ;;  %v539_v11 = vsel %vm502_vm3, %v536_v54, %v538_v47 }
 0x1f7   : > { %4216 = vmatmul.msk.bf16.gmra.mxu2 %vm639_vm2, %v5641_v1 }
 0x1f8   : > { %v5677_v31 = vadd.f32 %v1937_v41, %v1363_v23  ;;  %4232 = vmatmul.msk.bf16.gmra.mxu3 %vm639_vm2, %v5611_v61  ;;  %v5689_v61 = vpop.permute.xlu1 %1897 }
 0x1f9   : > { %7569 = vst [vmem:[#allocation70_spill] sm:$0xff] %v5689_v61 }
 0x1fa   : > { %7566 = vst [vmem:[#allocation69_spill] sm:$0xff] %v5677_v31  ;;  %v966_v43 = vpop.f32.mrf.mxu2  ;;  %v1328_v23 = vpop.f32.mrf.mxu1  ;;  %v5693_v31 = vpack.c.bf16 %v539_v11, %v537_v62 }
 0x1fb   : > { %v1004_v15 = vadd.f32 %v966_v43, %v7567_v53  ;;  %v1234_v51 = vpop.f32.mrf.mxu0  ;;  %v1137_v42 = vpop.f32.mrf.mxu3 }
 0x1fc   : > { %v1233_v49 = vadd.f32 %v1232_v13, %v1137_v42 }
 0x1fd   : > { %v1938_v50 = vmul.f32 %v5682_v52, %v1004_v15 }
 0x1fe   : > { %v1364_v41 = vadd.f32 %v1326_v4, %v1233_v49  ;;  %v5701_v49 = vpop.permute.xlu2 %2087 }
 0x1ff   : > { %7572 = vst [vmem:[#allocation8_spill] sm:$0xff] %v5701_v49 }
 0x200   : > { %v5691_v43 = vadd.f32 %v1938_v50, %v1364_v41  ;;  %v5707_v42 = vpop.permute.xlu1 %1902  ;;  %v4600_v41 = vld [vmem:[%s4713_s20 + $0x98] sm:$0xff] }
 0x201   : > { %7574 = vst [vmem:[#allocation73_spill] sm:$0xff] %v5707_v42 }
 0x202   : > { %7570 = vst [vmem:[#allocation71_spill] sm:$0xff] %v5691_v43  ;;  %v968_v53 = vpop.f32.mrf.mxu2  ;;  %v1331_v11 = vpop.f32.mrf.mxu1 }
 0x203   : > { %v1005_v6 = vadd.f32 %v968_v53, %v7571_v22  ;;  %v1237_v46 = vpop.f32.mrf.mxu0  ;;  %v1139_v13 = vpop.f32.mrf.mxu3  ;;  %v540_v53 = vrot.slane %v4600_v41, 1  ;;  %v4601_v22 = vld [vmem:[%s4713_s20 + $0xa0] sm:$0xff] }
 0x204   : > { %v1235_v15 = vadd.f32 %v1234_v51, %v1139_v13  ;;  %v7575_v51 = vld [vmem:[#allocation9_spill] sm:$0xff]  ;;  %v542_v13 = vrot.slane %v4601_v22, 1 }
 0x205   : > { %v1939_v29 = vmul.f32 %v5689_v61, %v1005_v6 }
 0x206   : > { %4250 = vmatmul.msk.bf16.gmra.mxu0 %vm639_vm2, %v5693_v31  ;;  %v1365_v50 = vadd.f32 %v1328_v23, %v1235_v15  ;;  %v5720_v41 = vpop.permute.xlu2 %1907 }
 0x207   : > { %4217 = vmatmul.msk.bf16.gmra.mxu2 %vm639_vm2, %v5667_v44 }
 0x208   : > { %v5703_v4 = vadd.f32 %v1939_v29, %v1365_v50  ;;  %4233 = vmatmul.msk.bf16.gmra.mxu3 %vm639_vm2, %v5641_v1  ;;  %v541_v29 = vsel %vm502_vm3, %v538_v47, %v540_v53  ;;  %v543_v50 = vsel %vm502_vm3, %v540_v53, %v542_v13 }
 0x20a   : > { %7573 = vst [vmem:[#allocation72_spill] sm:$0xff] %v5703_v4  ;;  %v971_v54 = vpop.f32.mrf.mxu2 }
 0x20b   : > { %v1006_v62 = vadd.f32 %v971_v54, %v7575_v51  ;;  %v1239_v6 = vpop.f32.mrf.mxu0  ;;  %v1142_v61 = vpop.f32.mrf.mxu3  ;;  %v5717_v54 = vpack.c.bf16 %v543_v50, %v541_v29  ;;  %v7577_v51 = vld [vmem:[#allocation10_spill] sm:$0xff]  ;;  %v4603_v50 = vld [vmem:[%s4713_s20 + $0xb0] sm:$0xff] }
 0x20c   : > { %v1238_v23 = vadd.f32 %v1237_v46, %v1142_v61  ;;  %7578 = vst [vmem:[#allocation10_spill] sm:$0xff] %v5720_v41  ;;  %v1333_v46 = vpop.f32.mrf.mxu1 }
 0x20d   : > { %v1940_v15 = vmul.f32 %v5707_v42, %v1006_v62 }
 0x20e   : > { %v1366_v1 = vadd.f32 %v1331_v11, %v1238_v23 }
 0x210   : > { %v5715_v52 = vadd.f32 %v1940_v15, %v1366_v1  ;;  %v4602_v15 = vld [vmem:[%s4713_s20 + $0xa8] sm:$0xff] }
 0x211   : > { %v544_v29 = vrot.slane %v4602_v15, 1 }
 0x212   : > { %7576 = vst [vmem:[#allocation9_spill] sm:$0xff] %v5715_v52  ;;  %v973_v4 = vpop.f32.mrf.mxu2 }
 0x213   : > { %v1007_v43 = vadd.f32 %v973_v4, %v7577_v51  ;;  %v1638_v22 = vpop.f32.mrf.mxu0  ;;  %v1144_v61 = vpop.f32.mrf.mxu3  ;;  %v4513_v51 = vld [vmem:[%s7364_s6 + $0x68] sm:$0xff] }
 0x214   : > { %v1240_v62 = vadd.f32 %v1239_v6, %v1144_v61  ;;  %v546_v6 = vrot.slane %v4603_v50, 1  ;;  %v545_v61 = vsel %vm502_vm3, %v542_v13, %v544_v29  ;;  %2860 = vmatpush.bf16.msrb.mxu3 %v4513_v51  ;;  %v4515_v50 = vld [vmem:[%s7364_s6 + $0x18] sm:$0xff] }
 0x215   : > { %v1941_v47 = vmul.f32 %v5720_v41, %v1007_v43  ;;  %3043 = vmatpush.bf16.msrb.mxu0 %v4515_v50  ;;  %v4605_v50 = vld [vmem:[%s4713_s20 + $0xc0] sm:$0xff] }
 0x216   : > { %4251 = vmatmul.msk.bf16.gmra.mxu0 %vm639_vm2, %v5717_v54  ;;  %v1367_v11 = vadd.f32 %v1333_v46, %v1240_v62  ;;  %v547_v46 = vsel %vm502_vm3, %v544_v29, %v546_v6  ;;  %v550_v41 = vrot.slane %v4605_v50, 1 }
 0x217   : > { %4218 = vmatmul.msk.bf16.gmra.mxu2 %vm639_vm2, %v5693_v31  ;;  %v5744_v15 = vpack.c.bf16 %v547_v46, %v545_v61  ;;  %v5773_v46 = vld [vmem:[%s7363_s5] ss:$0 sm:$0xff] }
 0x218   : > { %v5727_v53 = vadd.f32 %v1941_v47, %v1367_v11  ;;  %4234 = vmatmul.msk.bf16.gmra.mxu3 %vm639_vm2, %v5667_v44  ;;  %v5742_v47 = vld [vmem:[%s7361_s3] ss:$0 sm:$0xff] }
 0x21a   : > { %7579 = vst [vmem:[#allocation74_spill] sm:$0xff] %v5727_v53  ;;  %v1449_v4 = vpop.f32.mrf.mxu2 }
 0x21b   : > { %v1640_v23 = vpop.f32.mrf.mxu0  ;;  %v1544_v1 = vpop.f32.mrf.mxu3 }
 0x21c   : > { %v1545_v43 = vadd.f32 %v1544_v1, %v1449_v4  ;;  %v5749_v4 = vld [vmem:[%s7362_s4] ss:$0 sm:$0xff]  ;;  %v4507_v1 = vld [vmem:[%s7364_s6 + $0x48] sm:$0xff] }
 0x21d   : > { %3147 = vmatpush.bf16.msrb.mxu1 %v4507_v1 }
 0x21e   : > { %v1718_v62 = vadd.f32 %v1638_v22, %v1545_v43  ;;  %v4509_v22 = vld [vmem:[%s7364_s6 + $0x8] sm:$0xff] }
 0x21f   : > { %2750 = vmatpush.bf16.msrb.mxu2 %v4509_v22  ;;  %v4604_v22 = vld [vmem:[%s4713_s20 + $0xb8] sm:$0xff] }
 0x220   : > { %v2102_v44 = vmul.f32 %v5248_v45, %v1718_v62 }
 0x222   : > { %v1451_v11 = vpop.f32.mrf.mxu2  ;;  %v2134_v29 = vadd.f32 %v2102_v44, %v5243_v57 }
 0x223   : > { %v1643_v13 = vpop.f32.mrf.mxu0  ;;  %v1546_v43 = vpop.f32.mrf.mxu3 }
 0x224   : > { %v5762_v51 = vadd.f32 %v5742_v47, %v2134_v29  ;;  %v1547_v61 = vadd.f32 %v1546_v43, %v1451_v11  ;;  %v548_v43 = vrot.slane %v4604_v22, 1 }
 0x226   : > { %7580 = vst [vmem:[#allocation75_spill] sm:$0xff] %v5762_v51  ;;  %4252 = vmatmul.msk.bf16.gmra.mxu0 %vm639_vm2, %v5744_v15  ;;  %v2206_v57 = vmul.f32 %v5749_v4, %v5762_v51  ;;  %v1719_v62 = vadd.f32 %v1640_v23, %v1547_v61  ;;  %v549_v1 = vsel %vm502_vm3, %v546_v6, %v548_v43 }
 0x227   : > { %4219 = vmatmul.msk.bf16.gmra.mxu2 %vm639_vm2, %v5717_v54  ;;  %v551_v61 = vsel %vm502_vm3, %v548_v43, %v550_v41 }
 0x228   : > { %v2103_v44 = vmul.f32 %v5269_v0, %v1719_v62  ;;  %4235 = vmatmul.msk.bf16.gmra.mxu3 %vm639_vm2, %v5693_v31  ;;  %v2242_v42 = vadd.f32 %v5773_v46, %v2206_v57 }
 0x22a   : > { %v1454_v11 = vpop.f32.mrf.mxu2  ;;  %v2135_v51 = vadd.f32 %v2103_v44, %v5261_v12  ;;  %v5787_v31 = vmax.f32 %v2242_v42, 0.0  ;;  %v5793_v44 = vpack.c.bf16 %v551_v61, %v549_v1 }
 0x22b   : > { %v1645_v29 = vpop.f32.mrf.mxu0  ;;  %v1549_v45 = vpop.f32.mrf.mxu3 }
 0x22c   : > { %v5783_v53 = vadd.f32 %v5742_v47, %v2135_v51  ;;  %v1550_v23 = vadd.f32 %v1549_v45, %v1454_v11  ;;  %7582 = vst [vmem:[#allocation77_spill] sm:$0xff] %v5787_v31  ;;  %v2338_v45 = vrot.slane %v5787_v31, 7 }
 0x22e   : > { %7581 = vst [vmem:[#allocation76_spill] sm:$0xff] %v5783_v53  ;;  %v2207_v62 = vmul.f32 %v5749_v4, %v5783_v53  ;;  %v1720_v22 = vadd.f32 %v1643_v13, %v1550_v23  ;;  %v7418_v23 = vrot.slane %v5787_v31, 1 }
 0x230   : > { %v2243_v50 = vadd.f32 %v5773_v46, %v2207_v62  ;;  %v2104_v57 = vmul.f32 %v5322_v26, %v1720_v22  ;;  %v2434_v22 = vsel %vm403_vm0, 0.0, %v2338_v45 }
 0x232   : > { %v1456_v12 = vpop.f32.mrf.mxu2  ;;  %v2275_v11 = vmax.f32 %v2243_v50, 0.0  ;;  %v2136_v6 = vadd.f32 %v2104_v57, %v5279_v28 }
 0x233   : > { %v1648_v51 = vpop.f32.mrf.mxu0  ;;  %v1551_v43 = vpop.f32.mrf.mxu3 }
 0x234   : > { %v2339_v42 = vrot.slane %v2275_v11, 7  ;;  %v2437_v0 = vrot.slane %v2275_v11, 1  ;;  %v5798_v52 = vadd.f32 %v5742_v47, %v2136_v6  ;;  %v1552_v13 = vadd.f32 %v1551_v43, %v1456_v12  ;;  %v4606_v43 = vld [vmem:[%s4713_s20 + $0xc8] sm:$0xff] }
 0x235   : > { %v5806_v28 = vpack.c.bf16 %v2275_v11, %v5787_v31 }
 0x236   : > { %7583 = vst [vmem:[#allocation78_spill] sm:$0xff] %v5798_v52  ;;  %4253 = vmatmul.msk.bf16.gmra.mxu0 %vm639_vm2, %v5793_v44  ;;  %v2208_v1 = vmul.f32 %v5749_v4, %v5798_v52  ;;  %v1721_v61 = vadd.f32 %v1645_v29, %v1552_v13  ;;  %v2340_v62 = vsel %vm403_vm0, %v2338_v45, %v2339_v42  ;;  %v552_v45 = vrot.slane %v4606_v43, 1  ;;  %v4607_v13 = vld [vmem:[%s4713_s20 + $0xd0] sm:$0xff] }
 0x237   : > { %4220 = vmatmul.msk.bf16.gmra.mxu2 %vm639_vm2, %v5744_v15  ;;  %v5812_v50 = vpack.c.bf16 %v2340_v62, %v2434_v22  ;;  %v2438_v57 = vsel %vm502_vm3, %v7418_v23, %v2437_v0  ;;  %v554_v62 = vrot.slane %v4607_v13, 1 }
 0x238   : > { %v2244_v12 = vadd.f32 %v5773_v46, %v2208_v1  ;;  %v2105_v6 = vmul.f32 %v5293_v18, %v1721_v61  ;;  %4236 = vmatmul.msk.bf16.gmra.mxu3 %vm639_vm2, %v5717_v54  ;;  %v553_v54 = vsel %vm502_vm3, %v550_v41, %v552_v45 }
 0x239   : > { %4274 = vmatmul.msk.bf16.vlgmr.msra.gmra.mxu1 %vm2592_vm4, %v5812_v50  ;;  %v555_v18 = vsel %vm502_vm3, %v552_v45, %v554_v62 }
 0x23a   : > { %v1459_v11 = vpop.f32.mrf.mxu2  ;;  %v2276_v22 = vmax.f32 %v2244_v12, 0.0  ;;  %v2137_v52 = vadd.f32 %v2105_v6, %v5295_v39 }
 0x23b   : > { %v1650_v29 = vpop.f32.mrf.mxu0  ;;  %v1554_v23 = vpop.f32.mrf.mxu3 }
 0x23c   : > { %v2439_v26 = vrot.slane %v2276_v22, 1  ;;  %v5827_v1 = vadd.f32 %v5742_v47, %v2137_v52  ;;  %v1555_v61 = vadd.f32 %v1554_v23, %v1459_v11  ;;  %v5838_v52 = vpack.c.bf16 %v555_v18, %v553_v54 }
 0x23d   : > { %v2341_v45 = vrot.slane %v2276_v22, 7 }
 0x23e   : > { %7584 = vst [vmem:[#allocation79_spill] sm:$0xff] %v5827_v1  ;;  %v2209_v53 = vmul.f32 %v5749_v4, %v5827_v1  ;;  %v1722_v31 = vadd.f32 %v1648_v51, %v1555_v61  ;;  %v2440_v43 = vsel %vm502_vm3, %v2437_v0, %v2439_v26 }
 0x23f   : > { %v5834_v13 = vpack.c.bf16 %v2440_v43, %v2438_v57  ;;  %v2342_v57 = vsel %vm403_vm0, %v2339_v42, %v2341_v45 }
 0x240   : > { %v2245_v39 = vadd.f32 %v5773_v46, %v2209_v53  ;;  %v2106_v12 = vmul.f32 %v5329_v14, %v1722_v31 }
 0x242   : > { %v1461_v6 = vpop.f32.mrf.mxu2  ;;  %v2277_v11 = vmax.f32 %v2245_v39, 0.0  ;;  %v2138_v41 = vadd.f32 %v2106_v12, %v5312_v5  ;;  %v4608_v12 = vld [vmem:[%s4713_s20 + $0xd8] sm:$0xff] }
 0x243   : > { %v1653_v23 = vpop.f32.mrf.mxu0  ;;  %v1556_v49 = vpop.f32.mrf.mxu3  ;;  %v556_v42 = vrot.slane %v4608_v12, 1 }
 0x244   : > { %v5842_v1 = vadd.f32 %v5742_v47, %v2138_v41  ;;  %v1557_v51 = vadd.f32 %v1556_v49, %v1461_v6  ;;  %v2343_v0 = vrot.slane %v2277_v11, 7  ;;  %v5846_v53 = vpack.c.bf16 %v2277_v11, %v2276_v22  ;;  %v4609_v6 = vld [vmem:[%s4713_s20 + $0xe0] sm:$0xff] }
 0x245   : > { %v2441_v18 = vrot.slane %v2277_v11, 1  ;;  %v558_v11 = vrot.slane %v4609_v6, 1 }
 0x246   : > { %7585 = vst [vmem:[#allocation80_spill] sm:$0xff] %v5842_v1  ;;  %4254 = vmatmul.msk.bf16.gmra.mxu0 %vm639_vm2, %v5838_v52  ;;  %v2210_v5 = vmul.f32 %v5749_v4, %v5842_v1  ;;  %v1723_v31 = vadd.f32 %v1650_v29, %v1557_v51  ;;  %v2344_v49 = vsel %vm403_vm0, %v2341_v45, %v2343_v0 }
 0x247   : > { %4221 = vmatmul.msk.bf16.gmra.mxu2 %vm639_vm2, %v5793_v44  ;;  %v5854_v61 = vpack.c.bf16 %v2344_v49, %v2342_v57  ;;  %v2442_v54 = vsel %vm502_vm3, %v2439_v26, %v2441_v18  ;;  %v559_v57 = vsel %vm502_vm3, %v556_v42, %v558_v11 }
 0x248   : > { %v2246_v22 = vadd.f32 %v5773_v46, %v2210_v5  ;;  %v2107_v43 = vmul.f32 %v5343_v25, %v1723_v31  ;;  %4237 = vmatmul.msk.bf16.gmra.mxu3 %vm639_vm2, %v5744_v15  ;;  %v557_v15 = vsel %vm502_vm3, %v554_v62, %v556_v42 }
 0x249   : > { %4275 = vmatmul.msk.bf16.gmra.mxu1 %vm2592_vm4, %v5854_v61 }
 0x24a   : > { %v1464_v39 = vpop.f32.mrf.mxu2  ;;  %v2278_v41 = vmax.f32 %v2246_v22, 0.0  ;;  %v2139_v45 = vadd.f32 %v2107_v43, %v5331_v20 }
 0x24b   : > { %v1655_v29 = vpop.f32.mrf.mxu0  ;;  %v1559_v26 = vpop.f32.mrf.mxu3 }
 0x24c   : > { %v5867_v51 = vadd.f32 %v5742_v47, %v2139_v45  ;;  %v1560_v5 = vadd.f32 %v1559_v26, %v1464_v39  ;;  %v2443_v31 = vrot.slane %v2278_v41, 1  ;;  %v5878_v45 = vpack.c.bf16 %v559_v57, %v557_v15 }
 0x24d   : > { %v2345_v42 = vrot.slane %v2278_v41, 7 }
 0x24e   : > { %7586 = vst [vmem:[#allocation81_spill] sm:$0xff] %v5867_v51  ;;  %v2211_v49 = vmul.f32 %v5749_v4, %v5867_v51  ;;  %v1724_v25 = vadd.f32 %v1653_v23, %v1560_v5  ;;  %v2444_v12 = vsel %vm502_vm3, %v2441_v18, %v2443_v31 }
 0x24f   : > { %v5874_v6 = vpack.c.bf16 %v2444_v12, %v2442_v54  ;;  %v2346_v15 = vsel %vm403_vm0, %v2343_v0, %v2345_v42 }
 0x250   : > { %v2247_v20 = vadd.f32 %v5773_v46, %v2211_v49  ;;  %v2108_v22 = vmul.f32 %v5370_v8, %v1724_v25 }
 0x252   : > { %v1466_v43 = vpop.f32.mrf.mxu2  ;;  %v2279_v26 = vmax.f32 %v2247_v20, 0.0  ;;  %v2140_v62 = vadd.f32 %v2108_v22, %v5351_v60  ;;  %v4610_v22 = vld [vmem:[%s4713_s20 + $0xe8] sm:$0xff] }
 0x253   : > { %v1658_v39 = vpop.f32.mrf.mxu0  ;;  %v1561_v1 = vpop.f32.mrf.mxu3  ;;  %v560_v0 = vrot.slane %v4610_v22, 1 }
 0x254   : > { %v5882_v51 = vadd.f32 %v5742_v47, %v2140_v62  ;;  %v1562_v23 = vadd.f32 %v1561_v1, %v1466_v43  ;;  %v2347_v18 = vrot.slane %v2279_v26, 7  ;;  %v5886_v54 = vpack.c.bf16 %v2279_v26, %v2278_v41  ;;  %v4611_v43 = vld [vmem:[%s4713_s20 + $0xf0] sm:$0xff] }
 0x255   : > { %v2445_v25 = vrot.slane %v2279_v26, 1  ;;  %v562_v26 = vrot.slane %v4611_v43, 1 }
 0x256   : > { %7587 = vst [vmem:[#allocation82_spill] sm:$0xff] %v5882_v51  ;;  %4255 = vmatmul.msk.bf16.gmra.mxu0 %vm639_vm2, %v5878_v45  ;;  %v2212_v60 = vmul.f32 %v5749_v4, %v5882_v51  ;;  %v1725_v5 = vadd.f32 %v1655_v29, %v1562_v23  ;;  %v2348_v1 = vsel %vm403_vm0, %v2345_v42, %v2347_v18 }
 0x257   : > { %4222 = vmatmul.msk.bf16.gmra.mxu2 %vm639_vm2, %v5838_v52  ;;  %v5894_v57 = vpack.c.bf16 %v2348_v1, %v2346_v15  ;;  %v2446_v49 = vsel %vm502_vm3, %v2443_v31, %v2445_v25  ;;  %v563_v15 = vsel %vm502_vm3, %v560_v0, %v562_v26 }
 0x258   : > { %v2248_v41 = vadd.f32 %v5773_v46, %v2212_v60  ;;  %v2109_v12 = vmul.f32 %v5368_v55, %v1725_v5  ;;  %4238 = vmatmul.msk.bf16.gmra.mxu3 %vm639_vm2, %v5793_v44  ;;  %v561_v44 = vsel %vm502_vm3, %v558_v11, %v560_v0 }
 0x259   : > { %4276 = vmatmul.msk.bf16.gmra.mxu1 %vm2592_vm4, %v5894_v57 }
 0x25a   : > { %v1469_v20 = vpop.f32.mrf.mxu2  ;;  %v2280_v62 = vmax.f32 %v2248_v41, 0.0  ;;  %v2141_v42 = vadd.f32 %v2109_v12, %v5372_v17 }
 0x25b   : > { %v1660_v29 = vpop.f32.mrf.mxu0  ;;  %v1564_v31 = vpop.f32.mrf.mxu3 }
 0x25c   : > { %v5907_v23 = vadd.f32 %v5742_v47, %v2141_v42  ;;  %v1565_v60 = vadd.f32 %v1564_v31, %v1469_v20  ;;  %v2447_v5 = vrot.slane %v2280_v62, 1  ;;  %v5918_v42 = vpack.c.bf16 %v563_v15, %v561_v44 }
 0x25d   : > { %v2349_v0 = vrot.slane %v2280_v62, 7 }
 0x25e   : > { %7588 = vst [vmem:[#allocation83_spill] sm:$0xff] %v5907_v23  ;;  %v2213_v1 = vmul.f32 %v5749_v4, %v5907_v23  ;;  %v1726_v55 = vadd.f32 %v1658_v39, %v1565_v60  ;;  %v2448_v22 = vsel %vm502_vm3, %v2445_v25, %v2447_v5 }
 0x25f   : > { %v5914_v43 = vpack.c.bf16 %v2448_v22, %v2446_v49  ;;  %v2350_v44 = vsel %vm403_vm0, %v2347_v18, %v2349_v0 }
 0x260   : > { %v2249_v17 = vadd.f32 %v5773_v46, %v2213_v1  ;;  %v2110_v41 = vmul.f32 %v5389_v63, %v1726_v55 }
 0x262   : > { %v1471_v12 = vpop.f32.mrf.mxu2  ;;  %v2281_v31 = vmax.f32 %v2249_v17, 0.0  ;;  %v2142_v11 = vadd.f32 %v2110_v41, %v5391_v56  ;;  %v4612_v41 = vld [vmem:[%s4713_s20 + $0xf8] sm:$0xff] }
 0x263   : > { %v1663_v20 = vpop.f32.mrf.mxu0  ;;  %v1566_v51 = vpop.f32.mrf.mxu3  ;;  %v564_v18 = vrot.slane %v4612_v41, 1 }
 0x264   : > { %v5922_v23 = vadd.f32 %v5742_v47, %v2142_v11  ;;  %v1567_v39 = vadd.f32 %v1566_v51, %v1471_v12  ;;  %v2351_v25 = vrot.slane %v2281_v31, 7  ;;  %v5926_v49 = vpack.c.bf16 %v2281_v31, %v2280_v62 }
 0x265   : > { %v2449_v55 = vrot.slane %v2281_v31, 1 }
 0x266   : > { %7589 = vst [vmem:[#allocation84_spill] sm:$0xff] %v5922_v23  ;;  %4256 = vmatmul.msk.bf16.gmra.mxu0 %vm639_vm2, %v5918_v42  ;;  %v2214_v56 = vmul.f32 %v5749_v4, %v5922_v23  ;;  %v1727_v60 = vadd.f32 %v1660_v29, %v1567_v39  ;;  %v2352_v15 = vsel %vm403_vm0, %v2349_v0, %v2351_v25  ;;  %v7621_v23 = vld [vmem:[#allocation65_spill] sm:$0xff] }
 0x267   : > { %4223 = vmatmul.msk.bf16.gmra.mxu2 %vm639_vm2, %v5878_v45  ;;  %v5934_v51 = vpack.c.bf16 %v2352_v15, %v2350_v44  ;;  %v2450_v1 = vsel %vm502_vm3, %v2447_v5, %v2449_v55 }
 0x268   : > { %v2250_v22 = vadd.f32 %v5773_v46, %v2214_v56  ;;  %v2111_v62 = vmul.f32 %v5405_v2, %v1727_v60  ;;  %4239 = vmatmul.msk.bf16.gmra.mxu3 %vm639_vm2, %v5838_v52  ;;  %v565_v56 = vsel %vm502_vm3, %v562_v26, %v564_v18  ;;  %v600_v52 = vsel %vm502_vm3, %v564_v18, 0.0 }
 0x269   : > { %4277 = vmatmul.msk.bf16.gmra.mxu1 %vm2592_vm4, %v5934_v51 }
 0x26a   : > { %v1474_v17 = vpop.f32.mrf.mxu2  ;;  %v2282_v12 = vmax.f32 %v2250_v22, 0.0  ;;  %v2143_v31 = vadd.f32 %v2111_v62, %v5407_v33 }
 0x26b   : > { %v1665_v29 = vpop.f32.mrf.mxu0  ;;  %v1569_v11 = vpop.f32.mrf.mxu3 }
 0x26c   : > { %v5946_v5 = vadd.f32 %v5742_v47, %v2143_v31  ;;  %v1570_v0 = vadd.f32 %v1569_v11, %v1474_v17  ;;  %v2451_v39 = vrot.slane %v2282_v12, 1  ;;  %v1388_v31 = vpack.c.bf16 %v600_v52, %v565_v56 }
 0x26d   : > { %v2353_v11 = vrot.slane %v2282_v12, 7 }
 0x26e   : > { %7590 = vst [vmem:[#allocation85_spill] sm:$0xff] %v5946_v5  ;;  %v2215_v60 = vmul.f32 %v5749_v4, %v5946_v5  ;;  %v1728_v44 = vadd.f32 %v1663_v20, %v1570_v0  ;;  %v2452_v15 = vsel %vm502_vm3, %v2449_v55, %v2451_v39  ;;  %v4508_v20 = vld [vmem:[%s7364_s6] sm:$0xff] }
 0x26f   : > { %v5953_v41 = vpack.c.bf16 %v2452_v15, %v2450_v1  ;;  %v4512_v55 = vld [vmem:[%s7364_s6 + $0x60] sm:$0xff]  ;;  %v4514_v1 = vld [vmem:[%s7364_s6 + $0x10] sm:$0xff]  ;;  %2751 = vmatpush.bf16.msrb.mxu2 %v4508_v20 }
 0x270   : > { %v2251_v33 = vadd.f32 %v5773_v46, %v2215_v60  ;;  %v2112_v22 = vmul.f32 %v5462_v16, %v1728_v44  ;;  %v2354_v60 = vsel %vm403_vm0, %v2351_v25, %v2353_v11  ;;  %2861 = vmatpush.bf16.msrb.mxu3 %v4512_v55  ;;  %3044 = vmatpush.bf16.msrb.mxu0 %v4514_v1  ;;  %v7620_v16 = vld [vmem:[#allocation64_spill] sm:$0xff] }
 0x272   : > { %v1476_v62 = vpop.f32.mrf.mxu2  ;;  %v2283_v2 = vmax.f32 %v2251_v33, 0.0  ;;  %v2144_v26 = vadd.f32 %v2112_v22, %v5423_v9 }
 0x273   : > { %v1668_v17 = vpop.f32.mrf.mxu0  ;;  %v1571_v18 = vpop.f32.mrf.mxu3 }
 0x274   : > { %v5968_v0 = vadd.f32 %v5742_v47, %v2144_v26  ;;  %v1572_v56 = vadd.f32 %v1571_v18, %v1476_v62  ;;  %v2355_v9 = vrot.slane %v2283_v2, 7  ;;  %v5971_v52 = vpack.c.bf16 %v2283_v2, %v2282_v12 }
 0x275   : > { %v2453_v44 = vrot.slane %v2283_v2, 1 }
 0x276   : > { %7591 = vst [vmem:[#allocation86_spill] sm:$0xff] %v5968_v0  ;;  %4257 = vmatmul.msk.bf16.gmra.mxu0 %vm639_vm2, %v1388_v31  ;;  %v2216_v15 = vmul.f32 %v5749_v4, %v5968_v0  ;;  %v1729_v33 = vadd.f32 %v1665_v29, %v1572_v56  ;;  %v2356_v22 = vsel %vm403_vm0, %v2353_v11, %v2355_v9 }
 0x277   : > { %4224 = vmatmul.msk.bf16.gmra.mxu2 %vm639_vm2, %v5918_v42  ;;  %v5979_v62 = vpack.c.bf16 %v2356_v22, %v2354_v60  ;;  %v2454_v12 = vsel %vm502_vm3, %v2451_v39, %v2453_v44 }
 0x278   : > { %v2252_v26 = vadd.f32 %v5773_v46, %v2216_v15  ;;  %v2113_v18 = vmul.f32 %v5436_v3, %v1729_v33  ;;  %4240 = vmatmul.msk.bf16.gmra.mxu3 %vm639_vm2, %v5878_v45 }
 0x279   : > { %4278 = vmatmul.msk.bf16.gmra.mxu1 %vm2592_vm4, %v5979_v62 }
 0x27a   : > { %v1479_v2 = vpop.f32.mrf.mxu2  ;;  %v2284_v29 = vmax.f32 %v2252_v26, 0.0  ;;  %v2145_v11 = vadd.f32 %v2113_v18, %v5438_v35 }
 0x27b   : > { %v1670_v25 = vpop.f32.mrf.mxu0  ;;  %v1574_v20 = vpop.f32.mrf.mxu3 }
 0x27c   : > { %v5990_v55 = vadd.f32 %v5742_v47, %v2145_v11  ;;  %v1575_v39 = vadd.f32 %v1574_v20, %v1479_v2  ;;  %v2455_v1 = vrot.slane %v2284_v29, 1  ;;  %v2357_v3 = vrot.slane %v2284_v29, 7 }
 0x27e   : > { %7592 = vst [vmem:[#allocation87_spill] sm:$0xff] %v5990_v55  ;;  %v2217_v56 = vmul.f32 %v5749_v4, %v5990_v55  ;;  %v1730_v60 = vadd.f32 %v1668_v17, %v1575_v39  ;;  %v2456_v45 = vsel %vm502_vm3, %v2453_v44, %v2455_v1 }
 0x27f   : > { %v5995_v15 = vpack.c.bf16 %v2456_v45, %v2454_v12 }
 0x280   : > { %v2253_v33 = vadd.f32 %v5773_v46, %v2217_v56  ;;  %v2114_v22 = vmul.f32 %v5467_v34, %v1730_v60  ;;  %v7614_v34 = vld [vmem:[#allocation61_spill] sm:$0xff] }
 0x282   : > { %v1481_v26 = vpop.f32.mrf.mxu2  ;;  %v2285_v18 = vmax.f32 %v2253_v33, 0.0  ;;  %v2146_v11 = vadd.f32 %v2114_v22, %v5454_v30  ;;  %v2358_v30 = vsel %vm403_vm0, %v2355_v9, %v2357_v3 }
 0x283   : > { %v1673_v35 = vpop.f32.mrf.mxu0  ;;  %v1576_v2 = vpop.f32.mrf.mxu3 }
 0x284   : > { %v6001_v20 = vadd.f32 %v5742_v47, %v2146_v11  ;;  %v1577_v55 = vadd.f32 %v1576_v2, %v1481_v26  ;;  %v2359_v17 = vrot.slane %v2285_v18, 7  ;;  %v6004_v44 = vpack.c.bf16 %v2285_v18, %v2284_v29 }
 0x285   : > { %v2457_v12 = vrot.slane %v2285_v18, 1 }
 0x286   : > { %7593 = vst [vmem:[#allocation88_spill] sm:$0xff] %v6001_v20  ;;  %1712 = vmatmul.bf16.gmra.mxu0 %v7522_v38  ;;  %v2218_v39 = vmul.f32 %v5749_v4, %v6001_v20  ;;  %v1731_v56 = vadd.f32 %v1670_v25, %v1577_v55  ;;  %v2360_v60 = vsel %vm403_vm0, %v2357_v3, %v2359_v17 }
 0x287   : > { %4225 = vmatmul.msk.bf16.gmra.mxu2 %vm639_vm2, %v1388_v31  ;;  %v6011_v45 = vpack.c.bf16 %v2360_v60, %v2358_v30  ;;  %v2458_v33 = vsel %vm502_vm3, %v2455_v1, %v2457_v12 }
 0x288   : > { %v2254_v22 = vadd.f32 %v5773_v46, %v2218_v39  ;;  %v2115_v29 = vmul.f32 %v5483_v32, %v1731_v56  ;;  %4241 = vmatmul.msk.bf16.gmra.mxu3 %vm639_vm2, %v5918_v42  ;;  %v7613_v32 = vld [vmem:[#allocation62_spill] sm:$0xff] }
 0x289   : > { %4279 = vmatmul.msk.bf16.gmra.mxu1 %vm2592_vm4, %v6011_v45 }
 0x28a   : > { %v1484_v31 = vpop.f32.mrf.mxu2  ;;  %v2286_v55 = vmax.f32 %v2254_v22, 0.0  ;;  %v2147_v9 = vadd.f32 %v2115_v29, %v5469_v27 }
 0x28b   : > { %v1675_v25 = vpop.f32.mrf.mxu0  ;;  %v1579_v3 = vpop.f32.mrf.mxu3 }
 0x28c   : > { %v6022_v26 = vadd.f32 %v5742_v47, %v2147_v9  ;;  %v1580_v1 = vadd.f32 %v1579_v3, %v1484_v31  ;;  %v2459_v18 = vrot.slane %v2286_v55, 1  ;;  %v2361_v9 = vrot.slane %v2286_v55, 7 }
 0x28e   : > { %7594 = vst [vmem:[#allocation89_spill] sm:$0xff] %v6022_v26  ;;  %v2219_v11 = vmul.f32 %v5749_v4, %v6022_v26  ;;  %v1732_v2 = vadd.f32 %v1673_v35, %v1580_v1  ;;  %v2460_v42 = vsel %vm502_vm3, %v2457_v12, %v2459_v18 }
 0x28f   : > { %v6027_v39 = vpack.c.bf16 %v2460_v42, %v2458_v33 }
 0x290   : > { %v2255_v56 = vadd.f32 %v5773_v46, %v2219_v11  ;;  %v2116_v30 = vmul.f32 %v5505_v36, %v1732_v2 }
 0x292   : > { %v1486_v60 = vpop.f32.mrf.mxu2  ;;  %v2287_v22 = vmax.f32 %v2255_v56, 0.0  ;;  %v2148_v29 = vadd.f32 %v2116_v30, %v5491_v37  ;;  %v2362_v37 = vsel %vm403_vm0, %v2359_v17, %v2361_v9 }
 0x293   : > { %v1678_v27 = vpop.f32.mrf.mxu0  ;;  %v1581_v31 = vpop.f32.mrf.mxu3 }
 0x294   : > { %v6033_v3 = vadd.f32 %v5742_v47, %v2148_v29  ;;  %v1582_v26 = vadd.f32 %v1581_v31, %v1486_v60  ;;  %v2363_v35 = vrot.slane %v2287_v22, 7  ;;  %v6036_v12 = vpack.c.bf16 %v2287_v22, %v2286_v55 }
 0x295   : > { %v2461_v33 = vrot.slane %v2287_v22, 1 }
 0x296   : > { %7595 = vst [vmem:[#allocation90_spill] sm:$0xff] %v6033_v3  ;;  %3045 = vmatmul.bf16.vlgmr.msrb.gmra.mxu0 %v7522_v38  ;;  %v2220_v1 = vmul.f32 %v5749_v4, %v6033_v3  ;;  %v1733_v11 = vadd.f32 %v1675_v25, %v1582_v26  ;;  %v2364_v2 = vsel %vm403_vm0, %v2361_v9, %v2363_v35 }
 0x297   : > { %2752 = vmatmul.bf16.vlgmr.msrb.gmra.mxu2 %v7522_v38  ;;  %v6043_v42 = vpack.c.bf16 %v2364_v2, %v2362_v37  ;;  %v2462_v56 = vsel %vm502_vm3, %v2459_v18, %v2461_v33 }
 0x298   : > { %v2256_v30 = vadd.f32 %v5773_v46, %v2220_v1  ;;  %v2117_v55 = vmul.f32 %v5503_v59, %v1733_v11  ;;  %4325 = vmatmul.msk.bf16.vlgmr.msrb.gmra.mxu3 %vm2592_vm4, %v5854_v61 }
 0x299   : > { %4280 = vmatmul.msk.bf16.gmra.mxu1 %vm2592_vm4, %v6043_v42 }
 0x29a   : > { %v1489_v60 = vpop.f32.mrf.mxu2  ;;  %v2288_v26 = vmax.f32 %v2256_v30, 0.0  ;;  %v2149_v17 = vadd.f32 %v2117_v55, %v5507_v24 }
 0x29b   : > { %v1680_v25 = vpop.f32.mrf.mxu0  ;;  %v1584_v22 = vpop.f32.mrf.mxu3 }
 0x29c   : > { %v6054_v29 = vadd.f32 %v5742_v47, %v2149_v17  ;;  %v1585_v18 = vadd.f32 %v1584_v22, %v1489_v60  ;;  %v2463_v9 = vrot.slane %v2288_v26, 1  ;;  %v2365_v3 = vrot.slane %v2288_v26, 7  ;;  %v4506_v60 = vld [vmem:[%s7364_s6 + $0x40] sm:$0xff] }
 0x29d   : > { %3148 = vmatpush.bf16.msrb.mxu1 %v4506_v60 }
 0x29e   : > { %7596 = vst [vmem:[#allocation91_spill] sm:$0xff] %v6054_v29  ;;  %v2221_v31 = vmul.f32 %v5749_v4, %v6054_v29  ;;  %v1734_v1 = vadd.f32 %v1678_v27, %v1585_v18  ;;  %v2464_v11 = vsel %vm502_vm3, %v2461_v33, %v2463_v9  ;;  %v7607_v29 = vld [vmem:[#allocation54_spill] sm:$0xff] }
 0x29f   : > { %v6059_v37 = vpack.c.bf16 %v2464_v11, %v2462_v56  ;;  %v2366_v11 = vsel %vm403_vm0, %v2363_v35, %v2365_v3  ;;  %v7599_v35 = vld [vmem:[#allocation47_spill] sm:$0xff] }
 0x2a0   : > { %v2257_v2 = vadd.f32 %v5773_v46, %v2221_v31  ;;  %v2118_v30 = vmul.f32 %v5524_v7, %v1734_v1 }
 0x2a1   : > { %7597 = vst [vmem:[#allocation92_spill] sm:$0xff] %v6059_v37 }
 0x2a2   : > { %v1491_v59 = vpop.f32.mrf.mxu2  ;;  %v2289_v55 = vmax.f32 %v2257_v2, 0.0  ;;  %v2150_v17 = vadd.f32 %v2118_v30, %v5526_v21 }
 0x2a3   : > { %v1683_v24 = vpop.f32.mrf.mxu0  ;;  %v1586_v22 = vpop.f32.mrf.mxu3 }
 0x2a4   : > { %v6068_v27 = vadd.f32 %v5742_v47, %v2150_v17  ;;  %v1587_v33 = vadd.f32 %v1586_v22, %v1491_v59  ;;  %v2367_v56 = vrot.slane %v2289_v55, 7  ;;  %v6072_v18 = vpack.c.bf16 %v2289_v55, %v2288_v26 }
 0x2a5   : > { %v2465_v21 = vrot.slane %v2289_v55, 1 }
 0x2a6   : > { %7598 = vst [vmem:[#allocation93_spill] sm:$0xff] %v6068_v27  ;;  %4353 = vmatmul.msk.bf16.gmra.mxu0 %vm2592_vm4, %v5806_v28  ;;  %v2222_v31 = vmul.f32 %v5749_v4, %v6068_v27  ;;  %v1735_v1 = vadd.f32 %v1680_v25, %v1587_v33  ;;  %v2368_v2 = vsel %vm403_vm0, %v2365_v3, %v2367_v56 }
 0x2a7   : > { %4298 = vmatmul.msk.bf16.gmra.mxu2 %vm2592_vm4, %v5812_v50  ;;  %v6080_v59 = vpack.c.bf16 %v2368_v2, %v2366_v11  ;;  %v2466_v30 = vsel %vm502_vm3, %v2463_v9, %v2465_v21 }
 0x2a8   : > { %v2258_v17 = vadd.f32 %v5773_v46, %v2222_v31  ;;  %v2119_v26 = vmul.f32 %v5538_v19, %v1735_v1  ;;  %4326 = vmatmul.msk.bf16.gmra.mxu3 %vm2592_vm4, %v5894_v57 }
 0x2a9   : > { %4281 = vmatmul.msk.bf16.gmra.mxu1 %vm2592_vm4, %v6080_v59 }
 0x2aa   : > { %v1494_v50 = vpop.f32.mrf.mxu2  ;;  %v2290_v55 = vmax.f32 %v2258_v17, 0.0  ;;  %v2151_v60 = vadd.f32 %v2119_v26, %v7599_v35 }
 0x2ab   : > { %v1685_v25 = vpop.f32.mrf.mxu0  ;;  %v1589_v3 = vpop.f32.mrf.mxu3 }
 0x2ac   : > { %v6091_v22 = vadd.f32 %v5742_v47, %v2151_v60  ;;  %v1590_v9 = vadd.f32 %v1589_v3, %v1494_v50  ;;  %v2467_v33 = vrot.slane %v2290_v55, 1  ;;  %v2369_v7 = vrot.slane %v2290_v55, 7 }
 0x2ae   : > { %7600 = vst [vmem:[#allocation47_spill] sm:$0xff] %v6091_v22  ;;  %v2223_v31 = vmul.f32 %v5749_v4, %v6091_v22  ;;  %v1736_v1 = vadd.f32 %v1683_v24, %v1590_v9  ;;  %v2468_v11 = vsel %vm502_vm3, %v2465_v21, %v2467_v33 }
 0x2af   : > { %v6096_v2 = vpack.c.bf16 %v2468_v11, %v2466_v30 }
 0x2b0   : > { %v2259_v19 = vadd.f32 %v5773_v46, %v2223_v31  ;;  %v2120_v17 = vmul.f32 %v5584_v48, %v1736_v1  ;;  %v2370_v31 = vsel %vm403_vm0, %v2367_v56, %v2369_v7  ;;  %v7603_v56 = vld [vmem:[#allocation51_spill] sm:$0xff] }
 0x2b1   : > { %7601 = vst [vmem:[#allocation94_spill] sm:$0xff] %v6096_v2 }
 0x2b2   : > { %v1496_v27 = vpop.f32.mrf.mxu2  ;;  %v2291_v35 = vmax.f32 %v2259_v19, 0.0  ;;  %v2152_v60 = vadd.f32 %v2120_v17, %v5553_v58 }
 0x2b3   : > { %v1688_v26 = vpop.f32.mrf.mxu0  ;;  %v1591_v50 = vpop.f32.mrf.mxu3 }
 0x2b4   : > { %v6102_v3 = vadd.f32 %v5742_v47, %v2152_v60  ;;  %v1592_v22 = vadd.f32 %v1591_v50, %v1496_v27  ;;  %v2371_v24 = vrot.slane %v2291_v35, 7  ;;  %v6106_v21 = vpack.c.bf16 %v2291_v35, %v2290_v55 }
 0x2b5   : > { %v2469_v30 = vrot.slane %v2291_v35, 1 }
 0x2b6   : > { %7602 = vst [vmem:[#allocation95_spill] sm:$0xff] %v6102_v3  ;;  %4354 = vmatmul.msk.bf16.gmra.mxu0 %vm2592_vm4, %v5846_v53  ;;  %v2224_v19 = vmul.f32 %v5749_v4, %v6102_v3  ;;  %v1737_v58 = vadd.f32 %v1685_v25, %v1592_v22  ;;  %v6112_v9 = vpop.f32.mrf.mxu1  ;;  %v2372_v27 = vsel %vm403_vm0, %v2369_v7, %v2371_v24  ;;  %v7606_v3 = vld [vmem:[#allocation56_spill] sm:$0xff] }
 0x2b7   : > { %4299 = vmatmul.msk.bf16.gmra.mxu2 %vm2592_vm4, %v5854_v61  ;;  %v6116_v1 = vpack.c.bf16 %v2372_v27, %v2370_v31  ;;  %v2470_v11 = vsel %vm502_vm3, %v2467_v33, %v2469_v30 }
 0x2b8   : > { %v2260_v55 = vadd.f32 %v5773_v46, %v2224_v19  ;;  %v2121_v17 = vmul.f32 %v5563_v40, %v1737_v58  ;;  %4327 = vmatmul.msk.bf16.gmra.mxu3 %vm2592_vm4, %v5934_v51 }
 0x2b9   : > { %4282 = vmatmul.msk.bf16.gmra.mxu1 %vm2592_vm4, %v6116_v1 }
 0x2ba   : > { %v1499_v61 = vpop.f32.mrf.mxu2  ;;  %v2292_v22 = vmax.f32 %v2260_v55, 0.0  ;;  %v2153_v35 = vadd.f32 %v2121_v17, %v7603_v56 }
 0x2bb   : > { %v1690_v25 = vpop.f32.mrf.mxu0  ;;  %v1594_v7 = vpop.f32.mrf.mxu3 }
 0x2bc   : > { %v6127_v60 = vadd.f32 %v5742_v47, %v2153_v35  ;;  %v1595_v33 = vadd.f32 %v1594_v7, %v1499_v61  ;;  %v2471_v50 = vrot.slane %v2292_v22, 1  ;;  %v2373_v7 = vrot.slane %v2292_v22, 7 }
 0x2be   : > { %7604 = vst [vmem:[#allocation51_spill] sm:$0xff] %v6127_v60  ;;  %v2225_v19 = vmul.f32 %v5749_v4, %v6127_v60  ;;  %v1738_v58 = vadd.f32 %v1688_v26, %v1595_v33  ;;  %v6131_v31 = vpop.f32.mrf.mxu1  ;;  %v2472_v27 = vsel %vm502_vm3, %v2469_v30, %v2471_v50 }
 0x2bf   : > { %v6134_v40 = vpack.c.bf16 %v2472_v27, %v2470_v11  ;;  %v2374_v27 = vsel %vm403_vm0, %v2371_v24, %v2373_v7  ;;  %v7610_v24 = vld [vmem:[#allocation57_spill] sm:$0xff] }
 0x2c0   : > { %v2261_v55 = vadd.f32 %v5773_v46, %v2225_v19  ;;  %v2122_v17 = vmul.f32 %v7606_v3, %v1738_v58 }
 0x2c1   : > { %7605 = vst [vmem:[#allocation96_spill] sm:$0xff] %v6134_v40 }
 0x2c2   : > { %v1501_v56 = vpop.f32.mrf.mxu2  ;;  %v2293_v35 = vmax.f32 %v2261_v55, 0.0  ;;  %v2154_v61 = vadd.f32 %v2122_v17, %v7607_v29 }
 0x2c3   : > { %v1693_v48 = vpop.f32.mrf.mxu0  ;;  %v1596_v36 = vpop.f32.mrf.mxu3 }
 0x2c4   : > { %v6140_v60 = vadd.f32 %v5742_v47, %v2154_v61  ;;  %v1597_v26 = vadd.f32 %v1596_v36, %v1501_v56  ;;  %v2375_v30 = vrot.slane %v2293_v35, 7  ;;  %v6144_v11 = vpack.c.bf16 %v2293_v35, %v2292_v22  ;;  %v7609_v56 = vld [vmem:[#allocation59_spill] sm:$0xff] }
 0x2c5   : > { %v2473_v33 = vrot.slane %v2293_v35, 1 }
 0x2c6   : > { %7608 = vst [vmem:[#allocation54_spill] sm:$0xff] %v6140_v60  ;;  %4355 = vmatmul.msk.bf16.gmra.mxu0 %vm2592_vm4, %v5886_v54  ;;  %v2226_v19 = vmul.f32 %v5749_v4, %v6140_v60  ;;  %v1739_v29 = vadd.f32 %v1690_v25, %v1597_v26  ;;  %v6150_v58 = vpop.f32.mrf.mxu1  ;;  %v2376_v36 = vsel %vm403_vm0, %v2373_v7, %v2375_v30 }
 0x2c7   : > { %4300 = vmatmul.msk.bf16.gmra.mxu2 %vm2592_vm4, %v5894_v57  ;;  %v6154_v55 = vpack.c.bf16 %v2376_v36, %v2374_v27  ;;  %v2474_v17 = vsel %vm502_vm3, %v2471_v50, %v2473_v33 }
 0x2c8   : > { %v2262_v22 = vadd.f32 %v5773_v46, %v2226_v19  ;;  %v2123_v61 = vmul.f32 %v7609_v56, %v1739_v29  ;;  %4328 = vmatmul.msk.bf16.gmra.mxu3 %vm2592_vm4, %v5979_v62 }
 0x2c9   : > { %4283 = vmatmul.msk.bf16.gmra.mxu1 %vm2592_vm4, %v6154_v55 }
 0x2ca   : > { %v1504_v57 = vpop.f32.mrf.mxu2  ;;  %v2294_v35 = vmax.f32 %v2262_v22, 0.0  ;;  %v2155_v26 = vadd.f32 %v2123_v61, %v7610_v24 }
 0x2cb   : > { %v1695_v25 = vpop.f32.mrf.mxu0  ;;  %v1599_v7 = vpop.f32.mrf.mxu3 }
 0x2cc   : > { %v6165_v27 = vadd.f32 %v5742_v47, %v2155_v26  ;;  %v1600_v50 = vadd.f32 %v1599_v7, %v1504_v57  ;;  %v2475_v36 = vrot.slane %v2294_v35, 1  ;;  %v2377_v7 = vrot.slane %v2294_v35, 7 }
 0x2ce   : > { %7611 = vst [vmem:[#allocation57_spill] sm:$0xff] %v6165_v27  ;;  %v2227_v19 = vmul.f32 %v5749_v4, %v6165_v27  ;;  %v1740_v29 = vadd.f32 %v1693_v48, %v1600_v50  ;;  %v6169_v56 = vpop.f32.mrf.mxu1  ;;  %v2476_v60 = vsel %vm502_vm3, %v2473_v33, %v2475_v36 }
 0x2cf   : > { %v6172_v3 = vpack.c.bf16 %v2476_v60, %v2474_v17 }
 0x2d0   : > { %v2263_v22 = vadd.f32 %v5773_v46, %v2227_v19  ;;  %v2124_v61 = vmul.f32 %v7613_v32, %v1740_v29  ;;  %v2378_v29 = vsel %vm403_vm0, %v2375_v30, %v2377_v7  ;;  %v7617_v30 = vld [vmem:[#allocation63_spill] sm:$0xff] }
 0x2d1   : > { %7612 = vst [vmem:[#allocation97_spill] sm:$0xff] %v6172_v3  ;;  %v7634_v3 = vld [vmem:[#allocation71_spill] sm:$0xff] }
 0x2d2   : > { %v1506_v24 = vpop.f32.mrf.mxu2  ;;  %v2295_v26 = vmax.f32 %v2263_v22, 0.0  ;;  %v2156_v57 = vadd.f32 %v2124_v61, %v7614_v34 }
 0x2d3   : > { %v1698_v20 = vpop.f32.mrf.mxu0  ;;  %v1601_v0 = vpop.f32.mrf.mxu3 }
 0x2d4   : > { %v6178_v27 = vadd.f32 %v5742_v47, %v2156_v57  ;;  %v1602_v48 = vadd.f32 %v1601_v0, %v1506_v24  ;;  %v2379_v60 = vrot.slane %v2295_v26, 7  ;;  %v6182_v33 = vpack.c.bf16 %v2295_v26, %v2294_v35  ;;  %v7616_v24 = vld [vmem:[#allocation2_spill] sm:$0xff] }
 0x2d5   : > { %v2477_v17 = vrot.slane %v2295_v26, 1 }
 0x2d6   : > { %7615 = vst [vmem:[#allocation61_spill] sm:$0xff] %v6178_v27  ;;  %4356 = vmatmul.msk.bf16.gmra.mxu0 %vm2592_vm4, %v5926_v49  ;;  %v2228_v50 = vmul.f32 %v5749_v4, %v6178_v27  ;;  %v1741_v34 = vadd.f32 %v1695_v25, %v1602_v48  ;;  %v6188_v19 = vpop.f32.mrf.mxu1  ;;  %v2380_v0 = vsel %vm403_vm0, %v2377_v7, %v2379_v60 }
 0x2d7   : > { %4301 = vmatmul.msk.bf16.gmra.mxu2 %vm2592_vm4, %v5934_v51  ;;  %v6192_v22 = vpack.c.bf16 %v2380_v0, %v2378_v29  ;;  %v2478_v61 = vsel %vm502_vm3, %v2475_v36, %v2477_v17 }
 0x2d8   : > { %v2264_v35 = vadd.f32 %v5773_v46, %v2228_v50  ;;  %v2125_v57 = vmul.f32 %v7616_v24, %v1741_v34  ;;  %4329 = vmatmul.msk.bf16.gmra.mxu3 %vm2592_vm4, %v6011_v45 }
 0x2d9   : > { %4284 = vmatmul.msk.bf16.gmra.mxu1 %vm2592_vm4, %v6192_v22 }
 0x2da   : > { %v1509_v51 = vpop.f32.mrf.mxu2  ;;  %v2296_v26 = vmax.f32 %v2264_v35, 0.0  ;;  %v2157_v48 = vadd.f32 %v2125_v57, %v7617_v30 }
 0x2db   : > { %v1700_v25 = vpop.f32.mrf.mxu0  ;;  %v1604_v7 = vpop.f32.mrf.mxu3 }
 0x2dc   : > { %v6203_v29 = vadd.f32 %v5742_v47, %v2157_v48  ;;  %v1605_v36 = vadd.f32 %v1604_v7, %v1509_v51  ;;  %v2479_v0 = vrot.slane %v2296_v26, 1  ;;  %v2381_v7 = vrot.slane %v2296_v26, 7 }
 0x2de   : > { %7618 = vst [vmem:[#allocation63_spill] sm:$0xff] %v6203_v29  ;;  %v2229_v50 = vmul.f32 %v5749_v4, %v6203_v29  ;;  %v1742_v34 = vadd.f32 %v1698_v20, %v1605_v36  ;;  %v6207_v24 = vpop.f32.mrf.mxu1  ;;  %v2480_v27 = vsel %vm502_vm3, %v2477_v17, %v2479_v0 }
 0x2df   : > { %v6210_v32 = vpack.c.bf16 %v2480_v27, %v2478_v61 }
 0x2e0   : > { %v2265_v35 = vadd.f32 %v5773_v46, %v2229_v50  ;;  %v2126_v57 = vmul.f32 %v7620_v16, %v1742_v34  ;;  %v2382_v34 = vsel %vm403_vm0, %v2379_v60, %v2381_v7  ;;  %v7624_v60 = vld [vmem:[#allocation67_spill] sm:$0xff]  ;;  %v6248_v16 = vpop.permute.xlu0 %2079 }
 0x2e1   : > { %7619 = vst [vmem:[#allocation98_spill] sm:$0xff] %v6210_v32 }
 0x2e2   : > { %v1511_v30 = vpop.f32.mrf.mxu2  ;;  %v2297_v48 = vmax.f32 %v2265_v35, 0.0  ;;  %v2158_v51 = vadd.f32 %v2126_v57, %v7621_v23  ;;  %7626 = vst [vmem:[#allocation99_spill] sm:$0xff] %v6248_v16 }
 0x2e3   : > { %v1703_v5 = vpop.f32.mrf.mxu0  ;;  %v1606_v63 = vpop.f32.mrf.mxu3 }
 0x2e4   : > { %v6216_v29 = vadd.f32 %v5742_v47, %v2158_v51  ;;  %v1607_v20 = vadd.f32 %v1606_v63, %v1511_v30  ;;  %v2383_v27 = vrot.slane %v2297_v48, 7  ;;  %v6220_v17 = vpack.c.bf16 %v2297_v48, %v2296_v26  ;;  %v7623_v30 = vld [vmem:[#allocation4_spill] sm:$0xff] }
 0x2e5   : > { %v2481_v61 = vrot.slane %v2297_v48, 1 }
 0x2e6   : > { %7622 = vst [vmem:[#allocation65_spill] sm:$0xff] %v6216_v29  ;;  %4357 = vmatmul.msk.bf16.gmra.mxu0 %vm2592_vm4, %v5971_v52  ;;  %v2230_v36 = vmul.f32 %v5749_v4, %v6216_v29  ;;  %v1743_v23 = vadd.f32 %v1700_v25, %v1607_v20  ;;  %v6226_v50 = vpop.f32.mrf.mxu1  ;;  %v2384_v63 = vsel %vm403_vm0, %v2381_v7, %v2383_v27 }
 0x2e7   : > { %4302 = vmatmul.msk.bf16.gmra.mxu2 %vm2592_vm4, %v5979_v62  ;;  %v6230_v35 = vpack.c.bf16 %v2384_v63, %v2382_v34  ;;  %v2482_v57 = vsel %vm502_vm3, %v2479_v0, %v2481_v61 }
 0x2e8   : > { %v2266_v26 = vadd.f32 %v5773_v46, %v2230_v36  ;;  %v2127_v51 = vmul.f32 %v7623_v30, %v1743_v23  ;;  %4330 = vmatmul.msk.bf16.gmra.mxu3 %vm2592_vm4, %v6043_v42 }
 0x2e9   : > { %4285 = vmatmul.msk.bf16.gmra.mxu1 %vm2592_vm4, %v6230_v35 }
 0x2ea   : > { %v1514_v62 = vpop.f32.mrf.mxu2  ;;  %v2298_v48 = vmax.f32 %v2266_v26, 0.0  ;;  %v2159_v20 = vadd.f32 %v2127_v51, %v7624_v60 }
 0x2eb   : > { %v1705_v25 = vpop.f32.mrf.mxu0  ;;  %v1609_v7 = vpop.f32.mrf.mxu3 }
 0x2ec   : > { %v6241_v34 = vadd.f32 %v5742_v47, %v2159_v20  ;;  %v1610_v0 = vadd.f32 %v1609_v7, %v1514_v62  ;;  %v2483_v63 = vrot.slane %v2298_v48, 1  ;;  %v2385_v7 = vrot.slane %v2298_v48, 7 }
 0x2ee   : > { %7625 = vst [vmem:[#allocation67_spill] sm:$0xff] %v6241_v34  ;;  %v2231_v36 = vmul.f32 %v5749_v4, %v6241_v34  ;;  %v1744_v23 = vadd.f32 %v1703_v5, %v1610_v0  ;;  %v6245_v30 = vpop.f32.mrf.mxu1  ;;  %v2484_v29 = vsel %vm502_vm3, %v2481_v61, %v2483_v63  ;;  %v6258_v5 = vld [vmem:[%s7361_s3] ss:$0 sm:$0xff] }
 0x2ef   : > { %v6250_v8 = vpack.c.bf16 %v2484_v29, %v2482_v57  ;;  %v6272_v0 = vld [vmem:[%s7362_s4] ss:$0 sm:$0xff] }
 0x2f0   : > { %v2267_v26 = vadd.f32 %v5773_v46, %v2231_v36  ;;  %v2128_v51 = vmul.f32 %v6248_v16, %v1744_v23 }
 0x2f1   : > { %7627 = vst [vmem:[#allocation100_spill] sm:$0xff] %v6250_v8  ;;  %v7633_v8 = vld [vmem:[#allocation8_spill] sm:$0xff] }
 0x2f2   : > { %v1516_v47 = vpop.f32.mrf.mxu2  ;;  %v2299_v62 = vmax.f32 %v2267_v26, 0.0  ;;  %v2160_v20 = vadd.f32 %v2128_v51, %v5665_v10  ;;  %v2386_v51 = vsel %vm403_vm0, %v2383_v27, %v2385_v7 }
 0x2f3   : > { %v1708_v60 = vpop.f32.mrf.mxu0  ;;  %v1611_v4 = vpop.f32.mrf.mxu3 }
 0x2f4   : > { %v6261_v61 = vadd.f32 %v6258_v5, %v2160_v20  ;;  %v1612_v29 = vadd.f32 %v1611_v4, %v1516_v47  ;;  %v2387_v46 = vrot.slane %v2299_v62, 7  ;;  %v6265_v57 = vpack.c.bf16 %v2299_v62, %v2298_v48  ;;  %v7629_v4 = vld [vmem:[#allocation6_spill] sm:$0xff] }
 0x2f5   : > { %v2485_v10 = vrot.slane %v2299_v62, 1  ;;  %v6286_v62 = vld [vmem:[%s7363_s5] ss:$0 sm:$0xff] }
 0x2f6   : > { %7628 = vst [vmem:[#allocation101_spill] sm:$0xff] %v6261_v61  ;;  %4358 = vmatmul.msk.bf16.gmra.mxu0 %vm2592_vm4, %v6004_v44  ;;  %v2232_v36 = vmul.f32 %v6272_v0, %v6261_v61  ;;  %v1745_v23 = vadd.f32 %v1705_v25, %v1612_v29  ;;  %v6276_v26 = vpop.f32.mrf.mxu1  ;;  %v2388_v48 = vsel %vm403_vm0, %v2385_v7, %v2387_v46  ;;  %v7630_v29 = vld [vmem:[#allocation69_spill] sm:$0xff] }
 0x2f7   : > { %4303 = vmatmul.msk.bf16.gmra.mxu2 %vm2592_vm4, %v6011_v45  ;;  %v6280_v47 = vpack.c.bf16 %v2388_v48, %v2386_v51  ;;  %v2486_v45 = vsel %vm502_vm3, %v2483_v63, %v2485_v10 }
 0x2f8   : > { %v2268_v20 = vadd.f32 %v6286_v62, %v2232_v36  ;;  %v2129_v61 = vmul.f32 %v7629_v4, %v1745_v23  ;;  %4331 = vmatmul.msk.bf16.gmra.mxu3 %vm2592_vm4, %v6080_v59 }
 0x2f9   : > { %4286 = vmatmul.msk.bf16.gmra.mxu1 %vm2592_vm4, %v6280_v47 }
 0x2fa   : > { %v1519_v25 = vpop.f32.mrf.mxu2  ;;  %v2300_v7 = vmax.f32 %v2268_v20, 0.0  ;;  %v2161_v63 = vadd.f32 %v2129_v61, %v7630_v29 }
 0x2fb   : > { %v1710_v27 = vpop.f32.mrf.mxu0  ;;  %v1614_v51 = vpop.f32.mrf.mxu3 }
 0x2fc   : > { %v6296_v48 = vadd.f32 %v6258_v5, %v2161_v63  ;;  %v1615_v16 = vadd.f32 %v1614_v51, %v1519_v25  ;;  %v2487_v34 = vrot.slane %v2300_v7, 1  ;;  %v2389_v51 = vrot.slane %v2300_v7, 7 }
 0x2fe   : > { %7631 = vst [vmem:[#allocation69_spill] sm:$0xff] %v6296_v48  ;;  %v2233_v36 = vmul.f32 %v6272_v0, %v6296_v48  ;;  %v1746_v23 = vadd.f32 %v1708_v60, %v1615_v16  ;;  %v6300_v4 = vpop.f32.mrf.mxu1  ;;  %v2488_v14 = vsel %vm502_vm3, %v2485_v10, %v2487_v34  ;;  %v6315_v10 = vpop.permute.xlu0 %2091 }
 0x2ff   : > { %v6303_v38 = vpack.c.bf16 %v2488_v14, %v2486_v45  ;;  %7636 = vst [vmem:[#allocation103_spill] sm:$0xff] %v6315_v10 }
 0x300   : > { %v2269_v20 = vadd.f32 %v6286_v62, %v2233_v36  ;;  %v2130_v61 = vmul.f32 %v7633_v8, %v1746_v23 }
 0x301   : > { %7632 = vst [vmem:[#allocation102_spill] sm:$0xff] %v6303_v38 }
 0x302   : > { %v1521_v29 = vpop.f32.mrf.mxu2  ;;  %v2301_v63 = vmax.f32 %v2269_v20, 0.0  ;;  %v2162_v25 = vadd.f32 %v2130_v61, %v7634_v3 }
 0x303   : > { %v1713_v32 = vpop.f32.mrf.mxu0  ;;  %v1616_v40 = vpop.f32.mrf.mxu3 }
 0x304   : > { %v6309_v48 = vadd.f32 %v6258_v5, %v2162_v25  ;;  %v1617_v16 = vadd.f32 %v1616_v40, %v1521_v29  ;;  %v2391_v14 = vrot.slane %v2301_v63, 7  ;;  %v6313_v60 = vpack.c.bf16 %v2301_v63, %v2300_v7 }
 0x305   : > { %v2489_v45 = vrot.slane %v2301_v63, 1  ;;  %v2390_v40 = vsel %vm403_vm0, %v2387_v46, %v2389_v51  ;;  %v7637_v46 = vld [vmem:[#allocation72_spill] sm:$0xff] }
 0x306   : > { %7635 = vst [vmem:[#allocation71_spill] sm:$0xff] %v6309_v48  ;;  %4359 = vmatmul.msk.bf16.gmra.mxu0 %vm2592_vm4, %v6036_v12  ;;  %v2234_v3 = vmul.f32 %v6272_v0, %v6309_v48  ;;  %v1747_v36 = vadd.f32 %v1710_v27, %v1617_v16  ;;  %v6321_v23 = vpop.f32.mrf.mxu1  ;;  %v2392_v20 = vsel %vm403_vm0, %v2389_v51, %v2391_v14  ;;  %v4521_v48 = vld [vmem:[%s7364_s6 + $0x58] sm:$0xff]  ;;  %v6346_v8 = vpop.permute.xlu0 %2095 }
 0x307   : > { %4304 = vmatmul.msk.bf16.gmra.mxu2 %vm2592_vm4, %v6043_v42  ;;  %v6325_v61 = vpack.c.bf16 %v2392_v20, %v2390_v40  ;;  %v2490_v7 = vsel %vm502_vm3, %v2487_v34, %v2489_v45  ;;  %7639 = vst [vmem:[#allocation104_spill] sm:$0xff] %v6346_v8  ;;  %3461 = vmatpush.bf16.msra.mxu3 %v4521_v48 }
 0x308   : > { %v2270_v29 = vadd.f32 %v6286_v62, %v2234_v3  ;;  %v2131_v25 = vmul.f32 %v6315_v10, %v1747_v36  ;;  %4332 = vmatmul.msk.bf16.gmra.mxu3 %vm2592_vm4, %v6116_v1 }
 0x309   : > { %4287 = vmatmul.msk.bf16.gmra.mxu1 %vm2592_vm4, %v6325_v61 }
 0x30a   : > { %v1524_v42 = vpop.f32.mrf.mxu2  ;;  %v2302_v63 = vmax.f32 %v2270_v29, 0.0  ;;  %v2163_v16 = vadd.f32 %v2131_v25, %v7637_v46 }
 0x30b   : > { %v1715_v27 = vpop.f32.mrf.mxu0  ;;  %v1619_v51 = vpop.f32.mrf.mxu3 }
 0x30c   : > { %v6336_v40 = vadd.f32 %v6258_v5, %v2163_v16  ;;  %v1620_v34 = vadd.f32 %v1619_v51, %v1524_v42  ;;  %v2491_v20 = vrot.slane %v2302_v63, 1  ;;  %v2393_v38 = vrot.slane %v2302_v63, 7 }
 0x30e   : > { %7638 = vst [vmem:[#allocation72_spill] sm:$0xff] %v6336_v40  ;;  %v2235_v3 = vmul.f32 %v6272_v0, %v6336_v40  ;;  %v1748_v36 = vadd.f32 %v1713_v32, %v1620_v34  ;;  %v6340_v10 = vpop.f32.mrf.mxu1  ;;  %v2492_v29 = vsel %vm502_vm3, %v2489_v45, %v2491_v20  ;;  %v7641_v34 = vld [vmem:[#allocation9_spill] sm:$0xff] }
 0x30f   : > { %v6348_v25 = vpack.c.bf16 %v2492_v29, %v2490_v7 }
 0x310   : > { %v2271_v46 = vadd.f32 %v6286_v62, %v2235_v3  ;;  %v2132_v42 = vmul.f32 %v6346_v8, %v1748_v36  ;;  %v6362_v36 = vpop.permute.xlu1 %2099 }
 0x311   : > { %7640 = vst [vmem:[#allocation105_spill] sm:$0xff] %v6348_v25 }
 0x312   : > { %v1526_v16 = vpop.f32.mrf.mxu2  ;;  %v2303_v32 = vmax.f32 %v2271_v46, 0.0  ;;  %v2164_v40 = vadd.f32 %v2132_v42, %v7641_v34  ;;  %7643 = vst [vmem:[#allocation106_spill] sm:$0xff] %v6362_v36 }
 0x313   : > { %v6352_v51 = vpop.f32.mrf.mxu0  ;;  %v1621_v2 = vpop.f32.mrf.mxu3 }
 0x314   : > { %v6356_v37 = vadd.f32 %v6258_v5, %v2164_v40  ;;  %v1622_v45 = vadd.f32 %v1621_v2, %v1526_v16  ;;  %v2395_v7 = vrot.slane %v2303_v32, 7  ;;  %v6360_v3 = vpack.c.bf16 %v2303_v32, %v2302_v63  ;;  %v4517_v63 = vld [vmem:[%s7364_s6 + $0x78] sm:$0xff]  ;;  %v4519_v16 = vld [vmem:[%s7364_s6 + $0x28] sm:$0xff] }
 0x315   : > { %v2493_v48 = vrot.slane %v2303_v32, 1  ;;  %v2394_v2 = vsel %vm403_vm0, %v2391_v14, %v2393_v38  ;;  %3253 = vmatpush.bf16.msra.mxu2 %v4517_v63  ;;  %3565 = vmatpush.bf16.msra.mxu0 %v4519_v16 }
 0x316   : > { %7642 = vst [vmem:[#allocation9_spill] sm:$0xff] %v6356_v37  ;;  %4360 = vmatmul.msk.bf16.gmra.mxu0 %vm2592_vm4, %v6072_v18  ;;  %v2236_v29 = vmul.f32 %v6272_v0, %v6356_v37  ;;  %v6368_v46 = vpop.f32.mrf.mxu1  ;;  %v1749_v40 = vadd.f32 %v1715_v27, %v1622_v45  ;;  %v2396_v42 = vsel %vm403_vm0, %v2393_v38, %v2395_v7 }
 0x317   : > { %4305 = vmatmul.msk.bf16.gmra.mxu2 %vm2592_vm4, %v6080_v59  ;;  %v6378_v59 = vpack.c.bf16 %v2396_v42, %v2394_v2  ;;  %v2494_v32 = vsel %vm502_vm3, %v2491_v20, %v2493_v48  ;;  %v4523_v20 = vld [vmem:[%s7364_s6 + $0x88] sm:$0xff]  ;;  %v7644_v2 = vld [vmem:[#allocation74_spill] sm:$0xff] }
 0x318   : > { %v2272_v34 = vadd.f32 %v6286_v62, %v2236_v29  ;;  %v2133_v27 = vmul.f32 %v6362_v36, %v1749_v40  ;;  %4333 = vmatmul.msk.bf16.gmra.mxu3 %vm2592_vm4, %v6154_v55  ;;  %3671 = vmatpush.bf16.msra.mxu1 %v4523_v20 }
 0x319   : > { %4288 = vmatmul.msk.bf16.gmra.mxu1 %vm2592_vm4, %v6378_v59 }
 0x31a   : > { %v2753_v38 = vpop.f32.mrf.mxu2  ;;  %v2304_v29 = vmax.f32 %v2272_v34, 0.0  ;;  %v2165_v40 = vadd.f32 %v2133_v27, %v7644_v2 }
 0x31b   : > { %v2754_v14 = vadd.f32 %v2753_v38, %v6112_v9  ;;  %v6388_v45 = vpop.f32.mrf.mxu0  ;;  %v2863_v42 = vpop.f32.mrf.mxu3 }
 0x31c   : > { %v6395_v36 = vadd.f32 %v6258_v5, %v2165_v40  ;;  %v2495_v37 = vrot.slane %v2304_v29, 1 }
 0x31d   : > { %v6397_v63 = vadd.f32 %v2863_v42, %v2754_v14  ;;  %v2397_v14 = vrot.slane %v2304_v29, 7 }
 0x31e   : > { %7645 = vst [vmem:[#allocation74_spill] sm:$0xff] %v6395_v36  ;;  %v2237_v9 = vmul.f32 %v6272_v0, %v6395_v36  ;;  %v6401_v38 = vpop.f32.mrf.mxu1  ;;  %v2496_v16 = vsel %vm502_vm3, %v2493_v48, %v2495_v37 }
 0x31f   : > { %v6404_v8 = vpack.c.bf16 %v2496_v16, %v2494_v32  ;;  %v2398_v32 = vsel %vm403_vm0, %v2395_v7, %v2397_v14 }
 0x320   : > { %v2273_v34 = vadd.f32 %v6286_v62, %v2237_v9 }
 0x321   : > { %7646 = vst [vmem:[#allocation107_spill] sm:$0xff] %v6404_v8 }
 0x322   : > { %v2755_v27 = vpop.f32.mrf.mxu2  ;;  %v6410_v5 = vmax.f32 %v2273_v34, 0.0 }
 0x323   : > { %v2756_v20 = vadd.f32 %v2755_v27, %v6131_v31  ;;  %v6408_v2 = vpop.f32.mrf.mxu0  ;;  %v2865_v40 = vpop.f32.mrf.mxu3 }
 0x324   : > { %v7480_v0 = vrot.slane %v6410_v5, 7  ;;  %v6418_v48 = vpack.c.bf16 %v6410_v5, %v2304_v29  ;;  %v2497_v62 = vrot.slane %v6410_v5, 1 }
 0x325   : > { %v6412_v42 = vadd.f32 %v2865_v40, %v2756_v20 }
 0x326   : > { %4361 = vmatmul.msk.bf16.gmra.mxu0 %vm2592_vm4, %v6106_v21  ;;  %v6423_v31 = vpop.f32.mrf.mxu1  ;;  %v2400_v9 = vsel %vm403_vm0, %v2397_v14, %v7480_v0  ;;  %v2498_v16 = vsel %vm502_vm3, %v2495_v37, %v2497_v62  ;;  %v2533_v29 = vsel %vm502_vm3, %v2497_v62, 0.0 }
 0x327   : > { %4306 = vmatmul.msk.bf16.gmra.mxu2 %vm2592_vm4, %v6116_v1  ;;  %v6430_v34 = vpack.c.bf16 %v2400_v9, %v2398_v32  ;;  %v6435_v20 = vpack.c.bf16 %v2533_v29, %v2498_v16 }
 0x328   : > { %4334 = vmatmul.msk.bf16.gmra.mxu3 %vm2592_vm4, %v6192_v22 }
 0x329   : > { %7647 = vst [vmem:[#allocation108_spill] sm:$0xff] %v6435_v20  ;;  %4289 = vmatmul.msk.bf16.gmra.mxu1 %vm2592_vm4, %v6430_v34 }
 0x32a   : > { %v2758_v27 = vpop.f32.mrf.mxu2 }
 0x32b   : > { %v2759_v1 = vadd.f32 %v2758_v27, %v6150_v58  ;;  %v6440_v7 = vpop.f32.mrf.mxu0  ;;  %v2868_v14 = vpop.f32.mrf.mxu3 }
 0x32d   : > { %v6442_v40 = vadd.f32 %v2868_v14, %v2759_v1 }
 0x32e   : > { %v6444_v37 = vpop.f32.mrf.mxu1 }
 0x332   : > { %v2760_v32 = vpop.f32.mrf.mxu2 }
 0x333   : > { %v2761_v62 = vadd.f32 %v2760_v32, %v6169_v56  ;;  %v6447_v9 = vpop.f32.mrf.mxu0  ;;  %v2870_v0 = vpop.f32.mrf.mxu3 }
 0x335   : > { %v6449_v16 = vadd.f32 %v2870_v0, %v2761_v62 }
 0x336   : > { %4362 = vmatmul.msk.bf16.gmra.mxu0 %vm2592_vm4, %v6144_v11  ;;  %v6455_v58 = vpop.f32.mrf.mxu1 }
 0x337   : > { %4307 = vmatmul.msk.bf16.gmra.mxu2 %vm2592_vm4, %v6154_v55 }
 0x338   : > { %4335 = vmatmul.msk.bf16.gmra.mxu3 %vm2592_vm4, %v6230_v35 }
 0x339   : > { %4376 = vmatmul.msk.bf16.vlgmr.msrb.gmra.mxu1 %vm2592_vm4, %v5806_v28 }
 0x33a   : > { %v2763_v29 = vpop.f32.mrf.mxu2 }
 0x33b   : > { %v2764_v56 = vadd.f32 %v2763_v29, %v6188_v19  ;;  %v6462_v27 = vpop.f32.mrf.mxu0  ;;  %v2873_v0 = vpop.f32.mrf.mxu3 }
 0x33d   : > { %v6464_v1 = vadd.f32 %v2873_v0, %v2764_v56 }
 0x33e   : > { %v6466_v14 = vpop.f32.mrf.mxu1 }
 0x342   : > { %v2765_v32 = vpop.f32.mrf.mxu2 }
 0x343   : > { %v2766_v55 = vadd.f32 %v2765_v32, %v6207_v24  ;;  %v6469_v62 = vpop.f32.mrf.mxu0  ;;  %v2875_v36 = vpop.f32.mrf.mxu3 }
 0x345   : > { %v6471_v20 = vadd.f32 %v2875_v36, %v2766_v55 }
 0x346   : > { %4363 = vmatmul.msk.bf16.gmra.mxu0 %vm2592_vm4, %v6182_v33  ;;  %v6477_v28 = vpop.f32.mrf.mxu1 }
 0x347   : > { %4308 = vmatmul.msk.bf16.gmra.mxu2 %vm2592_vm4, %v6192_v22 }
 0x348   : > { %4336 = vmatmul.msk.bf16.gmra.mxu3 %vm2592_vm4, %v6280_v47 }
 0x349   : > { %4377 = vmatmul.msk.bf16.gmra.mxu1 %vm2592_vm4, %v5846_v53 }
 0x34a   : > { %v2768_v19 = vpop.f32.mrf.mxu2 }
 0x34b   : > { %v2769_v24 = vadd.f32 %v2768_v19, %v6226_v50  ;;  %v6484_v29 = vpop.f32.mrf.mxu0  ;;  %v2878_v36 = vpop.f32.mrf.mxu3 }
 0x34c   : > { %7648 = vst [vmem:[#allocation109_spill] sm:$0xff] %v6484_v29 }
 0x34d   : > { %v6486_v56 = vadd.f32 %v2878_v36, %v2769_v24 }
 0x34e   : > { %v6488_v0 = vpop.f32.mrf.mxu1 }
 0x352   : > { %v2770_v32 = vpop.f32.mrf.mxu2 }
 0x353   : > { %v2771_v22 = vadd.f32 %v2770_v32, %v6245_v30  ;;  %v6491_v55 = vpop.f32.mrf.mxu0  ;;  %v2880_v8 = vpop.f32.mrf.mxu3 }
 0x354   : > { %7649 = vst [vmem:[#allocation110_spill] sm:$0xff] %v6491_v55 }
 0x355   : > { %v6493_v25 = vadd.f32 %v2880_v8, %v2771_v22 }
 0x356   : > { %4364 = vmatmul.msk.bf16.gmra.mxu0 %vm2592_vm4, %v6220_v17  ;;  %v6499_v50 = vpop.f32.mrf.mxu1 }
 0x357   : > { %7650 = vst [vmem:[#allocation111_spill] sm:$0xff] %v6493_v25  ;;  %4309 = vmatmul.msk.bf16.gmra.mxu2 %vm2592_vm4, %v6230_v35 }
 0x358   : > { %4337 = vmatmul.msk.bf16.gmra.mxu3 %vm2592_vm4, %v6325_v61 }
 0x359   : > { %4378 = vmatmul.msk.bf16.gmra.mxu1 %vm2592_vm4, %v5886_v54 }
 0x35a   : > { %v2773_v19 = vpop.f32.mrf.mxu2 }
 0x35b   : > { %v2774_v30 = vadd.f32 %v2773_v19, %v6276_v26  ;;  %v6506_v24 = vpop.f32.mrf.mxu0  ;;  %v2883_v8 = vpop.f32.mrf.mxu3 }
 0x35c   : > { %7651 = vst [vmem:[#allocation112_spill] sm:$0xff] %v6506_v24 }
 0x35d   : > { %v6508_v36 = vadd.f32 %v2883_v8, %v2774_v30 }
 0x35e   : > { %v6510_v32 = vpop.f32.mrf.mxu1 }
 0x362   : > { %v2775_v22 = vpop.f32.mrf.mxu2 }
 0x363   : > { %v2776_v35 = vadd.f32 %v2775_v22, %v6300_v4  ;;  %v6513_v55 = vpop.f32.mrf.mxu0  ;;  %v2885_v25 = vpop.f32.mrf.mxu3 }
 0x364   : > { %7652 = vst [vmem:[#allocation113_spill] sm:$0xff] %v6513_v55 }
 0x365   : > { %v6515_v29 = vadd.f32 %v2885_v25, %v2776_v35 }
 0x366   : > { %4365 = vmatmul.msk.bf16.gmra.mxu0 %vm2592_vm4, %v6265_v57  ;;  %v6521_v26 = vpop.f32.mrf.mxu1 }
 0x367   : > { %7653 = vst [vmem:[#allocation114_spill] sm:$0xff] %v6515_v29  ;;  %4310 = vmatmul.msk.bf16.gmra.mxu2 %vm2592_vm4, %v6280_v47 }
 0x368   : > { %4338 = vmatmul.msk.bf16.gmra.mxu3 %vm2592_vm4, %v6378_v59 }
 0x369   : > { %4379 = vmatmul.msk.bf16.gmra.mxu1 %vm2592_vm4, %v5926_v49 }
 0x36a   : > { %v2778_v19 = vpop.f32.mrf.mxu2 }
 0x36b   : > { %v2779_v4 = vadd.f32 %v2778_v19, %v6321_v23  ;;  %v6528_v30 = vpop.f32.mrf.mxu0  ;;  %v2888_v25 = vpop.f32.mrf.mxu3  ;;  %v4516_v23 = vld [vmem:[%s7364_s6 + $0x70] sm:$0xff] }
 0x36c   : > { %7654 = vst [vmem:[#allocation115_spill] sm:$0xff] %v6528_v30  ;;  %v4520_v19 = vld [vmem:[%s7364_s6 + $0x50] sm:$0xff]  ;;  %3254 = vmatpush.bf16.msra.mxu2 %v4516_v23 }
 0x36d   : > { %v6530_v8 = vadd.f32 %v2888_v25, %v2779_v4  ;;  %3462 = vmatpush.bf16.msra.mxu3 %v4520_v19 }
 0x36e   : > { %v6532_v22 = vpop.f32.mrf.mxu1 }
 0x36f   : > { %7655 = vst [vmem:[#allocation116_spill] sm:$0xff] %v6530_v8 }
 0x372   : > { %v2780_v35 = vpop.f32.mrf.mxu2 }
 0x373   : > { %v2781_v47 = vadd.f32 %v2780_v35, %v6340_v10  ;;  %v6535_v55 = vpop.f32.mrf.mxu0  ;;  %v2890_v29 = vpop.f32.mrf.mxu3  ;;  %v4518_v10 = vld [vmem:[%s7364_s6 + $0x20] sm:$0xff] }
 0x374   : > { %7656 = vst [vmem:[#allocation117_spill] sm:$0xff] %v6535_v55  ;;  %3566 = vmatpush.bf16.msra.mxu0 %v4518_v10 }
 0x375   : > { %v6537_v24 = vadd.f32 %v2890_v29, %v2781_v47 }
 0x376   : > { %4366 = vmatmul.msk.bf16.gmra.mxu0 %vm2592_vm4, %v6313_v60  ;;  %v6552_v29 = vpop.f32.mrf.mxu1 }
 0x377   : > { %7657 = vst [vmem:[#allocation118_spill] sm:$0xff] %v6537_v24  ;;  %4311 = vmatmul.msk.bf16.gmra.mxu2 %vm2592_vm4, %v6325_v61 }
 0x378   : > { %4339 = vmatmul.msk.bf16.gmra.mxu3 %vm2592_vm4, %v6430_v34  ;;  %v7661_v34 = vrot.slane %v6410_v5, 7 }
 0x379   : > { %4380 = vmatmul.msk.bf16.gmra.mxu1 %vm2592_vm4, %v5971_v52 }
 0x37a   : > { %v2783_v4 = vpop.f32.mrf.mxu2  ;;  %v2435_v30 = vsel %vm403_vm0, %v7661_v34, 0.0 }
 0x37b   : > { %v2784_v25 = vadd.f32 %v2783_v4, %v6368_v46  ;;  %v6559_v35 = vpop.f32.mrf.mxu0  ;;  %v2893_v47 = vpop.f32.mrf.mxu3  ;;  %v2838_v4 = vpack.c.bf16 0.0, %v2435_v30 }
 0x37c   : > { %7658 = vst [vmem:[#allocation119_spill] sm:$0xff] %v6559_v35 }
 0x37d   : > { %v6561_v55 = vadd.f32 %v2893_v47, %v2784_v25 }
 0x37e   : > { %v6563_v61 = vpop.f32.mrf.mxu1 }
 0x37f   : > { %7659 = vst [vmem:[#allocation120_spill] sm:$0xff] %v6561_v55 }
 0x382   : > { %v2785_v24 = vpop.f32.mrf.mxu2 }
 0x383   : > { %v2786_v23 = vadd.f32 %v2785_v24, %v6401_v38  ;;  %v6566_v19 = vpop.f32.mrf.mxu0  ;;  %v2895_v10 = vpop.f32.mrf.mxu3 }
 0x384   : > { %7660 = vst [vmem:[#allocation121_spill] sm:$0xff] %v6566_v19 }
 0x385   : > { %v6571_v8 = vadd.f32 %v2895_v10, %v2786_v23  ;;  %v7663_v10 = vld [vmem:[#allocation77_spill] sm:$0xff] }
 0x386   : > { %4367 = vmatmul.msk.bf16.gmra.mxu0 %vm2592_vm4, %v6360_v3  ;;  %v6577_v46 = vpop.f32.mrf.mxu1 }
 0x387   : > { %7662 = vst [vmem:[#allocation122_spill] sm:$0xff] %v6571_v8  ;;  %4312 = vmatmul.msk.bf16.gmra.mxu2 %vm2592_vm4, %v6378_v59  ;;  %v7664_v59 = vrot.slane %v7663_v10, 1  ;;  %v7665_v8 = vmov 0.0  }
 0x388   : > { %4340 = vmatmul.msk.bf16.gmra.mxu3 %vm2592_vm4, %v2838_v4 }
 0x389   : > { %4381 = vmatmul.msk.bf16.gmra.mxu1 %vm2592_vm4, %v6004_v44  ;;  %v2532_v34 = vsel %vm502_vm3, 0.0, %v7664_v59 }
 0x38a   : > { %v2788_v38 = vpop.f32.mrf.mxu2  ;;  %v3373_v35 = vpack.c.bf16 %v2532_v34, %v7665_v8 }
 0x38b   : > { %v2789_v5 = vadd.f32 %v2788_v38, %v6423_v31  ;;  %v6583_v24 = vpop.f32.mrf.mxu0  ;;  %v2898_v25 = vpop.f32.mrf.mxu3 }
 0x38d   : > { %v6585_v47 = vadd.f32 %v2898_v25, %v2789_v5 }
 0x38e   : > { %v6587_v23 = vpop.f32.mrf.mxu1 }
 0x392   : > { %v2790_v30 = vpop.f32.mrf.mxu2 }
 0x393   : > { %v2791_v4 = vadd.f32 %v2790_v30, %v6444_v37  ;;  %v6593_v19 = vpop.f32.mrf.mxu0  ;;  %v2900_v55 = vpop.f32.mrf.mxu3 }
 0x395   : > { %v6596_v31 = vadd.f32 %v2900_v55, %v2791_v4  ;;  %v4522_v55 = vld [vmem:[%s7364_s6 + $0x80] sm:$0xff] }
 0x396   : > { %4459 = vmatmul.msk.bf16.vlgmr.msra.gmra.mxu0 %vm2592_vm4, %v3373_v35  ;;  %v6601_v38 = vpop.f32.mrf.mxu1  ;;  %3672 = vmatpush.bf16.msra.mxu1 %v4522_v55 }
 0x397   : > { %4404 = vmatmul.msk.bf16.vlgmr.msra.gmra.mxu2 %vm2592_vm4, %v5846_v53 }
 0x398   : > { %4435 = vmatmul.msk.bf16.vlgmr.msra.gmra.mxu3 %vm2592_vm4, %v5834_v13 }
 0x399   : > { %4382 = vmatmul.msk.bf16.gmra.mxu1 %vm2592_vm4, %v6036_v12 }
 0x39a   : > { %v2793_v5 = vpop.f32.mrf.mxu2 }
 0x39b   : > { %v2794_v37 = vadd.f32 %v2793_v5, %v6455_v58  ;;  %v6608_v8 = vpop.f32.mrf.mxu0  ;;  %v2903_v35 = vpop.f32.mrf.mxu3 }
 0x39d   : > { %v6613_v53 = vadd.f32 %v2903_v35, %v2794_v37 }
 0x39e   : > { %v6615_v25 = vpop.f32.mrf.mxu1 }
 0x3a2   : > { %v2795_v10 = vpop.f32.mrf.mxu2 }
 0x3a3   : > { %v2796_v59 = vadd.f32 %v2795_v10, %v6466_v14  ;;  %v6618_v34 = vpop.f32.mrf.mxu0  ;;  %v2905_v30 = vpop.f32.mrf.mxu3 }
 0x3a4   : > { %7666 = vst [vmem:[#allocation77_spill] sm:$0xff] %v6618_v34 }
 0x3a5   : > { %v6620_v4 = vadd.f32 %v2905_v30, %v2796_v59 }
 0x3a6   : > { %4460 = vmatmul.msk.bf16.gmra.mxu0 %vm2592_vm4, %v5834_v13  ;;  %v6626_v58 = vpop.f32.mrf.mxu1 }
 0x3a7   : > { %4405 = vmatmul.msk.bf16.gmra.mxu2 %vm2592_vm4, %v5886_v54 }
 0x3a8   : > { %4436 = vmatmul.msk.bf16.gmra.mxu3 %vm2592_vm4, %v5874_v6 }
 0x3a9   : > { %4383 = vmatmul.msk.bf16.gmra.mxu1 %vm2592_vm4, %v6072_v18 }
 0x3aa   : > { %v2798_v5 = vpop.f32.mrf.mxu2 }
 0x3ab   : > { %v2799_v14 = vadd.f32 %v2798_v5, %v6477_v28  ;;  %v6633_v37 = vpop.f32.mrf.mxu0  ;;  %v2908_v55 = vpop.f32.mrf.mxu3 }
 0x3ac   : > { %7667 = vst [vmem:[#allocation123_spill] sm:$0xff] %v6633_v37 }
 0x3ad   : > { %v6635_v35 = vadd.f32 %v2908_v55, %v2799_v14 }
 0x3ae   : > { %v6637_v13 = vpop.f32.mrf.mxu1 }
 0x3b2   : > { %v2800_v10 = vpop.f32.mrf.mxu2 }
 0x3b3   : > { %v2801_v54 = vadd.f32 %v2800_v10, %v6488_v0  ;;  %v6640_v59 = vpop.f32.mrf.mxu0  ;;  %v2910_v30 = vpop.f32.mrf.mxu3 }
 0x3b4   : > { %7668 = vst [vmem:[#allocation124_spill] sm:$0xff] %v6640_v59 }
 0x3b5   : > { %v6642_v34 = vadd.f32 %v2910_v30, %v2801_v54 }
 0x3b6   : > { %4461 = vmatmul.msk.bf16.gmra.mxu0 %vm2592_vm4, %v5874_v6  ;;  %v6648_v28 = vpop.f32.mrf.mxu1 }
 0x3b7   : > { %7669 = vst [vmem:[#allocation125_spill] sm:$0xff] %v6642_v34  ;;  %4406 = vmatmul.msk.bf16.gmra.mxu2 %vm2592_vm4, %v5926_v49 }
 0x3b8   : > { %4437 = vmatmul.msk.bf16.gmra.mxu3 %vm2592_vm4, %v5914_v43 }
 0x3b9   : > { %4384 = vmatmul.msk.bf16.gmra.mxu1 %vm2592_vm4, %v6106_v21 }
 0x3ba   : > { %v2803_v5 = vpop.f32.mrf.mxu2 }
 0x3bb   : > { %v2804_v0 = vadd.f32 %v2803_v5, %v6499_v50  ;;  %v6655_v14 = vpop.f32.mrf.mxu0  ;;  %v2913_v55 = vpop.f32.mrf.mxu3 }
 0x3bc   : > { %7670 = vst [vmem:[#allocation126_spill] sm:$0xff] %v6655_v14 }
 0x3bd   : > { %v6657_v10 = vadd.f32 %v2913_v55, %v2804_v0 }
 0x3be   : > { %v6659_v54 = vpop.f32.mrf.mxu1 }
 0x3bf   : > { %7671 = vst [vmem:[#allocation127_spill] sm:$0xff] %v6657_v10 }
 0x3c2   : > { %v2805_v30 = vpop.f32.mrf.mxu2 }
 0x3c3   : > { %v2806_v49 = vadd.f32 %v2805_v30, %v6510_v32  ;;  %v6662_v59 = vpop.f32.mrf.mxu0  ;;  %v2915_v34 = vpop.f32.mrf.mxu3 }
 0x3c4   : > { %7672 = vst [vmem:[#allocation128_spill] sm:$0xff] %v6662_v59 }
 0x3c5   : > { %v6664_v37 = vadd.f32 %v2915_v34, %v2806_v49 }
 0x3c6   : > { %4462 = vmatmul.msk.bf16.gmra.mxu0 %vm2592_vm4, %v5914_v43  ;;  %v6670_v50 = vpop.f32.mrf.mxu1 }
 0x3c7   : > { %7673 = vst [vmem:[#allocation129_spill] sm:$0xff] %v6664_v37  ;;  %4407 = vmatmul.msk.bf16.gmra.mxu2 %vm2592_vm4, %v5971_v52 }
 0x3c8   : > { %4438 = vmatmul.msk.bf16.gmra.mxu3 %vm2592_vm4, %v5953_v41 }
 0x3c9   : > { %4385 = vmatmul.msk.bf16.gmra.mxu1 %vm2592_vm4, %v6144_v11 }
 0x3ca   : > { %v2808_v5 = vpop.f32.mrf.mxu2 }
 0x3cb   : > { %v2809_v32 = vadd.f32 %v2808_v5, %v6521_v26  ;;  %v6677_v0 = vpop.f32.mrf.mxu0  ;;  %v2918_v34 = vpop.f32.mrf.mxu3 }
 0x3cc   : > { %7674 = vst [vmem:[#allocation130_spill] sm:$0xff] %v6677_v0 }
 0x3cd   : > { %v6679_v55 = vadd.f32 %v2918_v34, %v2809_v32 }
 0x3ce   : > { %v6681_v30 = vpop.f32.mrf.mxu1 }
 0x3cf   : > { %7675 = vst [vmem:[#allocation131_spill] sm:$0xff] %v6679_v55 }
 0x3d2   : > { %v2810_v49 = vpop.f32.mrf.mxu2 }
 0x3d3   : > { %v2811_v52 = vadd.f32 %v2810_v49, %v6532_v22  ;;  %v6684_v59 = vpop.f32.mrf.mxu0  ;;  %v2920_v37 = vpop.f32.mrf.mxu3 }
 0x3d4   : > { %7676 = vst [vmem:[#allocation132_spill] sm:$0xff] %v6684_v59 }
 0x3d5   : > { %v6686_v14 = vadd.f32 %v2920_v37, %v2811_v52 }
 0x3d6   : > { %4463 = vmatmul.msk.bf16.gmra.mxu0 %vm2592_vm4, %v5953_v41  ;;  %v6692_v26 = vpop.f32.mrf.mxu1 }
 0x3d7   : > { %7677 = vst [vmem:[#allocation133_spill] sm:$0xff] %v6686_v14  ;;  %4408 = vmatmul.msk.bf16.gmra.mxu2 %vm2592_vm4, %v6004_v44 }
 0x3d8   : > { %4439 = vmatmul.msk.bf16.gmra.mxu3 %vm2592_vm4, %v5995_v15 }
 0x3d9   : > { %4386 = vmatmul.msk.bf16.gmra.mxu1 %vm2592_vm4, %v6182_v33 }
 0x3da   : > { %v2813_v5 = vpop.f32.mrf.mxu2 }
 0x3db   : > { %v2814_v22 = vadd.f32 %v2813_v5, %v6552_v29  ;;  %v6699_v32 = vpop.f32.mrf.mxu0  ;;  %v2923_v37 = vpop.f32.mrf.mxu3 }
 0x3dc   : > { %7678 = vst [vmem:[#allocation134_spill] sm:$0xff] %v6699_v32 }
 0x3dd   : > { %v6701_v34 = vadd.f32 %v2923_v37, %v2814_v22 }
 0x3de   : > { %v6703_v49 = vpop.f32.mrf.mxu1 }
 0x3df   : > { %7679 = vst [vmem:[#allocation135_spill] sm:$0xff] %v6701_v34  ;;  %v7697_v34 = vld [vmem:[#allocation12_spill] sm:$0xff] }
 0x3e0   : > { %v3787_v55 = vmul.f32 %v6412_v42, %v7697_v34 }
 0x3e2   : > { %v2815_v52 = vpop.f32.mrf.mxu2 }
 0x3e3   : > { %v2816_v44 = vadd.f32 %v2815_v52, %v6563_v61  ;;  %v6706_v59 = vpop.f32.mrf.mxu0  ;;  %v2925_v14 = vpop.f32.mrf.mxu3 }
 0x3e4   : > { %7680 = vst [vmem:[#allocation136_spill] sm:$0xff] %v6706_v59 }
 0x3e5   : > { %v6708_v0 = vadd.f32 %v2925_v14, %v2816_v44 }
 0x3e6   : > { %4464 = vmatmul.msk.bf16.gmra.mxu0 %vm2592_vm4, %v5995_v15  ;;  %v6714_v29 = vpop.f32.mrf.mxu1 }
 0x3e7   : > { %7681 = vst [vmem:[#allocation137_spill] sm:$0xff] %v6708_v0  ;;  %4409 = vmatmul.msk.bf16.gmra.mxu2 %vm2592_vm4, %v6036_v12 }
 0x3e8   : > { %4440 = vmatmul.msk.bf16.gmra.mxu3 %vm2592_vm4, %v6027_v39 }
 0x3e9   : > { %4387 = vmatmul.msk.bf16.gmra.mxu1 %vm2592_vm4, %v6220_v17 }
 0x3ea   : > { %v2818_v5 = vpop.f32.mrf.mxu2 }
 0x3eb   : > { %v2819_v61 = vadd.f32 %v2818_v5, %v6577_v46  ;;  %v6721_v22 = vpop.f32.mrf.mxu0  ;;  %v2928_v14 = vpop.f32.mrf.mxu3  ;;  %v7686_v5 = vld [vmem:[#allocation92_spill] sm:$0xff] }
 0x3ec   : > { %7682 = vst [vmem:[#allocation138_spill] sm:$0xff] %v6721_v22 }
 0x3ed   : > { %v6723_v37 = vadd.f32 %v2928_v14, %v2819_v61 }
 0x3ee   : > { %v6725_v52 = vpop.f32.mrf.mxu1 }
 0x3ef   : > { %7683 = vst [vmem:[#allocation139_spill] sm:$0xff] %v6723_v37 }
 0x3f2   : > { %v2820_v44 = vpop.f32.mrf.mxu2 }
 0x3f3   : > { %v2821_v12 = vadd.f32 %v2820_v44, %v6587_v23  ;;  %v6728_v59 = vpop.f32.mrf.mxu0  ;;  %v2930_v0 = vpop.f32.mrf.mxu3 }
 0x3f4   : > { %7684 = vst [vmem:[#allocation140_spill] sm:$0xff] %v6728_v59 }
 0x3f5   : > { %v6730_v32 = vadd.f32 %v2930_v0, %v2821_v12 }
 0x3f6   : > { %4465 = vmatmul.msk.bf16.gmra.mxu0 %vm2592_vm4, %v6027_v39  ;;  %v6736_v46 = vpop.f32.mrf.mxu1 }
 0x3f7   : > { %7685 = vst [vmem:[#allocation141_spill] sm:$0xff] %v6730_v32  ;;  %4410 = vmatmul.msk.bf16.gmra.mxu2 %vm2592_vm4, %v6072_v18 }
 0x3f8   : > { %4441 = vmatmul.msk.bf16.gmra.mxu3 %vm2592_vm4, %v7686_v5 }
 0x3f9   : > { %4388 = vmatmul.msk.bf16.gmra.mxu1 %vm2592_vm4, %v6265_v57 }
 0x3fa   : > { %v2823_v61 = vpop.f32.mrf.mxu2 }
 0x3fb   : > { %v2824_v23 = vadd.f32 %v2823_v61, %v6601_v38  ;;  %v6743_v14 = vpop.f32.mrf.mxu0  ;;  %v2933_v0 = vpop.f32.mrf.mxu3  ;;  %v7691_v61 = vld [vmem:[#allocation94_spill] sm:$0xff] }
 0x3fc   : > { %7687 = vst [vmem:[#allocation92_spill] sm:$0xff] %v6743_v14 }
 0x3fd   : > { %v6745_v44 = vadd.f32 %v2933_v0, %v2824_v23 }
 0x3fe   : > { %v6747_v12 = vpop.f32.mrf.mxu1 }
 0x3ff   : > { %7688 = vst [vmem:[#allocation142_spill] sm:$0xff] %v6745_v44 }
 0x402   : > { %v2825_v59 = vpop.f32.mrf.mxu2 }
 0x403   : > { %v2826_v18 = vadd.f32 %v2825_v59, %v6615_v25  ;;  %v6750_v32 = vpop.f32.mrf.mxu0  ;;  %v2935_v22 = vpop.f32.mrf.mxu3 }
 0x404   : > { %7689 = vst [vmem:[#allocation143_spill] sm:$0xff] %v6750_v32 }
 0x405   : > { %v6752_v37 = vadd.f32 %v2935_v22, %v2826_v18 }
 0x406   : > { %4466 = vmatmul.msk.bf16.gmra.mxu0 %vm2592_vm4, %v7686_v5  ;;  %v6758_v38 = vpop.f32.mrf.mxu1 }
 0x407   : > { %7690 = vst [vmem:[#allocation144_spill] sm:$0xff] %v6752_v37  ;;  %4411 = vmatmul.msk.bf16.gmra.mxu2 %vm2592_vm4, %v6106_v21 }
 0x408   : > { %4442 = vmatmul.msk.bf16.gmra.mxu3 %vm2592_vm4, %v7691_v61 }
 0x409   : > { %4389 = vmatmul.msk.bf16.gmra.mxu1 %vm2592_vm4, %v6313_v60 }
 0x40a   : > { %v2828_v23 = vpop.f32.mrf.mxu2 }
 0x40b   : > { %v2829_v25 = vadd.f32 %v2828_v23, %v6626_v58  ;;  %v6765_v59 = vpop.f32.mrf.mxu0  ;;  %v2938_v22 = vpop.f32.mrf.mxu3  ;;  %v3151_v23 = vadd.f32 %v6648_v28, %v6352_v51  ;;  %v3153_v51 = vadd.f32 %v6659_v54, %v6388_v45  ;;  %v3156_v45 = vadd.f32 %v6670_v50, %v6408_v2  ;;  %v7698_v54 = vld [vmem:[#allocation97_spill] sm:$0xff] }
 0x40c   : > { %7692 = vst [vmem:[#allocation94_spill] sm:$0xff] %v6765_v59  ;;  %v3158_v2 = vadd.f32 %v6681_v30, %v6440_v7  ;;  %v3161_v7 = vadd.f32 %v6692_v26, %v6447_v9  ;;  %v7701_v30 = vld [vmem:[#allocation98_spill] sm:$0xff]  ;;  %v3163_v9 = vadd.f32 %v6703_v49, %v6462_v27  ;;  %v3166_v27 = vadd.f32 %v6714_v29, %v6469_v62  ;;  %v7704_v49 = vld [vmem:[#allocation100_spill] sm:$0xff]  ;;  %v7706_v62 = vld [vmem:[#allocation109_spill] sm:$0xff] }
 0x40d   : > { %v6767_v0 = vadd.f32 %v2938_v22, %v2829_v25  ;;  %v7695_v25 = vld [vmem:[#allocation96_spill] sm:$0xff]  ;;  %v3168_v29 = vadd.f32 %v6725_v52, %v7706_v62  ;;  %v7709_v52 = vld [vmem:[#allocation110_spill] sm:$0xff] }
 0x40e   : > { %v6769_v18 = vpop.f32.mrf.mxu1 }
 0x40f   : > { %7693 = vst [vmem:[#allocation145_spill] sm:$0xff] %v6767_v0 }
 0x412   : > { %v2830_v32 = vpop.f32.mrf.mxu2 }
 0x413   : > { %v2831_v21 = vadd.f32 %v2830_v32, %v6637_v13  ;;  %v3568_v37 = vpop.f32.mrf.mxu0  ;;  %v2940_v14 = vpop.f32.mrf.mxu3  ;;  %v7696_v13 = vld [vmem:[#allocation11_spill] sm:$0xff] }
 0x414   : > { %v3786_v32 = vmul.f32 %v6397_v63, %v7696_v13 }
 0x415   : > { %v6772_v44 = vadd.f32 %v2940_v14, %v2831_v21 }
 0x416   : > { %4467 = vmatmul.msk.bf16.gmra.mxu0 %vm2592_vm4, %v7691_v61  ;;  %v6778_v58 = vpop.f32.mrf.mxu1 }
 0x417   : > { %7694 = vst [vmem:[#allocation146_spill] sm:$0xff] %v6772_v44  ;;  %4412 = vmatmul.msk.bf16.gmra.mxu2 %vm2592_vm4, %v6144_v11 }
 0x418   : > { %4443 = vmatmul.msk.bf16.gmra.mxu3 %vm2592_vm4, %v7695_v25 }
 0x419   : > { %4390 = vmatmul.msk.bf16.gmra.mxu1 %vm2592_vm4, %v6360_v3 }
 0x41a   : > { %v3256_v22 = vpop.f32.mrf.mxu2 }
 0x41b   : > { %v3336_v14 = vadd.f32 %v3256_v22, %v3151_v23  ;;  %v3570_v21 = vpop.f32.mrf.mxu0  ;;  %v3464_v11 = vpop.f32.mrf.mxu3 }
 0x41c   : > { %v6790_v59 = vadd.f32 %v3568_v37, %v3464_v11 }
 0x41d   : > { %v6788_v44 = vadd.f32 %v3786_v32, %v3336_v14 }
 0x41e   : > { %v6792_v0 = vpop.f32.mrf.mxu1 }
 0x422   : > { %v3258_v28 = vpop.f32.mrf.mxu2 }
 0x423   : > { %v3337_v63 = vadd.f32 %v3258_v28, %v3153_v51  ;;  %v3573_v13 = vpop.f32.mrf.mxu0  ;;  %v3466_v23 = vpop.f32.mrf.mxu3  ;;  %v7700_v28 = vld [vmem:[#allocation16_spill] sm:$0xff] }
 0x424   : > { %v6800_v22 = vadd.f32 %v3570_v21, %v3466_v23 }
 0x425   : > { %v6798_v10 = vadd.f32 %v3787_v55, %v3337_v63  ;;  %v7699_v55 = vld [vmem:[#allocation14_spill] sm:$0xff]  ;;  %v3789_v63 = vmul.f32 %v6449_v16, %v7700_v28 }
 0x426   : > { %4468 = vmatmul.msk.bf16.gmra.mxu0 %vm2592_vm4, %v7695_v25  ;;  %v6806_v37 = vpop.f32.mrf.mxu1  ;;  %v3788_v34 = vmul.f32 %v6442_v40, %v7699_v55 }
 0x427   : > { %4413 = vmatmul.msk.bf16.gmra.mxu2 %vm2592_vm4, %v6182_v33 }
 0x428   : > { %4444 = vmatmul.msk.bf16.gmra.mxu3 %vm2592_vm4, %v7698_v54 }
 0x429   : > { %4391 = vmatmul.msk.bf16.gmra.mxu1 %vm2592_vm4, %v6418_v48 }
 0x42a   : > { %v3261_v42 = vpop.f32.mrf.mxu2 }
 0x42b   : > { %v3338_v32 = vadd.f32 %v3261_v42, %v3156_v45  ;;  %v3469_v21 = vpop.f32.mrf.mxu3  ;;  %v3575_v33 = vpop.f32.mrf.mxu0 }
 0x42c   : > { %v6818_v11 = vadd.f32 %v3573_v13, %v3469_v21 }
 0x42d   : > { %v6816_v14 = vadd.f32 %v3788_v34, %v3338_v32  ;;  %v7702_v34 = vld [vmem:[#allocation18_spill] sm:$0xff] }
 0x42e   : > { %v6820_v51 = vpop.f32.mrf.mxu1  ;;  %v3790_v32 = vmul.f32 %v6464_v1, %v7702_v34 }
 0x432   : > { %v3263_v50 = vpop.f32.mrf.mxu2 }
 0x433   : > { %v3339_v40 = vadd.f32 %v3263_v50, %v3158_v2  ;;  %v3471_v55 = vpop.f32.mrf.mxu3  ;;  %v3578_v13 = vpop.f32.mrf.mxu0 }
 0x434   : > { %v6828_v45 = vadd.f32 %v3575_v33, %v3471_v55 }
 0x435   : > { %v6826_v23 = vadd.f32 %v3789_v63, %v3339_v40  ;;  %v7703_v63 = vld [vmem:[#allocation19_spill] sm:$0xff] }
 0x436   : > { %4469 = vmatmul.msk.bf16.gmra.mxu0 %vm2592_vm4, %v7698_v54  ;;  %v6834_v42 = vpop.f32.mrf.mxu1  ;;  %v3791_v40 = vmul.f32 %v6471_v20, %v7703_v63  ;;  %v7707_v63 = vld [vmem:[#allocation24_spill] sm:$0xff] }
 0x437   : > { %4414 = vmatmul.msk.bf16.gmra.mxu2 %vm2592_vm4, %v6220_v17 }
 0x438   : > { %4445 = vmatmul.msk.bf16.gmra.mxu3 %vm2592_vm4, %v7701_v30 }
 0x439   : > { %4487 = vmatmul.msk.bf16.vlgmr.msra.gmra.mxu1 %vm2592_vm4, %v5874_v6 }
 0x43a   : > { %v3266_v16 = vpop.f32.mrf.mxu2 }
 0x43b   : > { %v3340_v21 = vadd.f32 %v3266_v16, %v3161_v7  ;;  %v3474_v2 = vpop.f32.mrf.mxu3  ;;  %v3580_v26 = vpop.f32.mrf.mxu0  ;;  %v7705_v16 = vld [vmem:[#allocation22_spill] sm:$0xff] }
 0x43c   : > { %v6846_v17 = vadd.f32 %v3578_v13, %v3474_v2  ;;  %v3792_v34 = vmul.f32 %v6486_v56, %v7705_v16 }
 0x43d   : > { %v6844_v33 = vadd.f32 %v3790_v32, %v3340_v21 }
 0x43e   : > { %v6848_v50 = vpop.f32.mrf.mxu1 }
 0x442   : > { %v3268_v28 = vpop.f32.mrf.mxu2 }
 0x443   : > { %v3341_v1 = vadd.f32 %v3268_v28, %v3163_v9  ;;  %v3476_v6 = vpop.f32.mrf.mxu3  ;;  %v3583_v32 = vpop.f32.mrf.mxu0 }
 0x444   : > { %v6856_v7 = vadd.f32 %v3580_v26, %v3476_v6 }
 0x445   : > { %v6854_v55 = vadd.f32 %v3791_v40, %v3341_v1  ;;  %v7708_v40 = vld [vmem:[#allocation111_spill] sm:$0xff] }
 0x446   : > { %4470 = vmatmul.msk.bf16.gmra.mxu0 %vm2592_vm4, %v7701_v30  ;;  %v6862_v13 = vpop.f32.mrf.mxu1  ;;  %v3793_v1 = vmul.f32 %v7708_v40, %v7707_v63 }
 0x447   : > { %4415 = vmatmul.msk.bf16.gmra.mxu2 %vm2592_vm4, %v6265_v57 }
 0x448   : > { %4446 = vmatmul.msk.bf16.gmra.mxu3 %vm2592_vm4, %v7704_v49 }
 0x449   : > { %4488 = vmatmul.msk.bf16.gmra.mxu1 %vm2592_vm4, %v5914_v43 }
 0x44a   : > { %v3271_v20 = vpop.f32.mrf.mxu2 }
 0x44b   : > { %v3342_v21 = vadd.f32 %v3271_v20, %v3166_v27  ;;  %v3479_v57 = vpop.f32.mrf.mxu3  ;;  %v3585_v6 = vpop.f32.mrf.mxu0 }
 0x44c   : > { %v6874_v9 = vadd.f32 %v3583_v32, %v3479_v57  ;;  %v7710_v32 = vld [vmem:[#allocation102_spill] sm:$0xff]  ;;  %v7711_v57 = vld [vmem:[#allocation27_spill] sm:$0xff] }
 0x44d   : > { %v6872_v2 = vadd.f32 %v3792_v34, %v3342_v21  ;;  %v3171_v34 = vadd.f32 %v6736_v46, %v7709_v52  ;;  %v3794_v62 = vmul.f32 %v6508_v36, %v7711_v57  ;;  %v7713_v46 = vld [vmem:[#allocation29_spill] sm:$0xff]  ;;  %v7718_v57 = vld [vmem:[#allocation31_spill] sm:$0xff] }
 0x44e   : > { %v6876_v26 = vpop.f32.mrf.mxu1  ;;  %v7716_v36 = vld [vmem:[#allocation113_spill] sm:$0xff] }
 0x452   : > { %v3273_v28 = vpop.f32.mrf.mxu2 }
 0x453   : > { %v3343_v56 = vadd.f32 %v3273_v28, %v3168_v29  ;;  %v3481_v43 = vpop.f32.mrf.mxu3 }
 0x454   : > { %v6884_v27 = vadd.f32 %v3585_v6, %v3481_v43 }
 0x455   : > { %v6882_v16 = vadd.f32 %v3793_v1, %v3343_v56  ;;  %v7714_v56 = vld [vmem:[#allocation114_spill] sm:$0xff] }
 0x456   : > { %4471 = vmatmul.msk.bf16.gmra.mxu0 %vm2592_vm4, %v7704_v49  ;;  %v6890_v20 = vpop.f32.mrf.mxu1  ;;  %v3795_v6 = vmul.f32 %v7714_v56, %v7713_v46 }
 0x457   : > { %4416 = vmatmul.msk.bf16.gmra.mxu2 %vm2592_vm4, %v6313_v60  ;;  %v7712_v60 = vld [vmem:[#allocation112_spill] sm:$0xff] }
 0x458   : > { %4447 = vmatmul.msk.bf16.gmra.mxu3 %vm2592_vm4, %v7710_v32  ;;  %v3173_v40 = vadd.f32 %v6747_v12, %v7712_v60 }
 0x459   : > { %4489 = vmatmul.msk.bf16.gmra.mxu1 %vm2592_vm4, %v5953_v41 }
 0x45a   : > { %v3276_v21 = vpop.f32.mrf.mxu2 }
 0x45b   : > { %v3344_v29 = vadd.f32 %v3276_v21, %v3171_v34  ;;  %v3176_v34 = vadd.f32 %v6758_v38, %v7716_v36  ;;  %v7717_v21 = vld [vmem:[#allocation105_spill] sm:$0xff]  ;;  %v7721_v38 = vld [vmem:[#allocation32_spill] sm:$0xff] }
 0x45d   : > { %v6900_v28 = vadd.f32 %v3794_v62, %v3344_v29  ;;  %v7719_v62 = vld [vmem:[#allocation116_spill] sm:$0xff] }
 0x45e   : > { %v6902_v63 = vpop.f32.mrf.mxu1  ;;  %v3796_v29 = vmul.f32 %v7719_v62, %v7718_v57  ;;  %v7725_v57 = vld [vmem:[#allocation107_spill] sm:$0xff]  ;;  %v7726_v62 = vld [vmem:[#allocation34_spill] sm:$0xff] }
 0x462   : > { %v3278_v1 = vpop.f32.mrf.mxu2 }
 0x463   : > { %v3345_v43 = vadd.f32 %v3278_v1, %v3173_v40 }
 0x465   : > { %v6908_v52 = vadd.f32 %v3795_v6, %v3345_v43  ;;  %v7722_v6 = vld [vmem:[#allocation118_spill] sm:$0xff] }
 0x466   : > { %4472 = vmatmul.msk.bf16.gmra.mxu0 %vm2592_vm4, %v7710_v32  ;;  %v6914_v41 = vpop.f32.mrf.mxu1  ;;  %v3797_v43 = vmul.f32 %v7722_v6, %v7721_v38 }
 0x467   : > { %7715 = vst [vmem:[#allocation96_spill] sm:$0xff] %v6908_v52  ;;  %4417 = vmatmul.msk.bf16.gmra.mxu2 %vm2592_vm4, %v6360_v3  ;;  %v7720_v3 = vld [vmem:[#allocation115_spill] sm:$0xff] }
 0x468   : > { %4448 = vmatmul.msk.bf16.gmra.mxu3 %vm2592_vm4, %v7717_v21  ;;  %v3178_v46 = vadd.f32 %v6769_v18, %v7720_v3 }
 0x469   : > { %4490 = vmatmul.msk.bf16.gmra.mxu1 %vm2592_vm4, %v5995_v15 }
 0x46a   : > { %v3281_v12 = vpop.f32.mrf.mxu2 }
 0x46b   : > { %v3346_v60 = vadd.f32 %v3281_v12, %v3176_v34  ;;  %v7724_v34 = vld [vmem:[#allocation117_spill] sm:$0xff] }
 0x46c   : > { %v3181_v12 = vadd.f32 %v6778_v58, %v7724_v34  ;;  %v7729_v58 = vld [vmem:[#allocation35_spill] sm:$0xff] }
 0x46d   : > { %v6924_v40 = vadd.f32 %v3796_v29, %v3346_v60  ;;  %v7727_v29 = vld [vmem:[#allocation120_spill] sm:$0xff] }
 0x46e   : > { %v6926_v1 = vpop.f32.mrf.mxu1  ;;  %v3798_v60 = vmul.f32 %v7727_v29, %v7726_v62  ;;  %v7731_v62 = vmov 0.0|0.0   ;;  %v7733_v29 = vld [vmem:[#allocation108_spill] sm:$0xff] }
 0x472   : > { %v3283_v56 = vpop.f32.mrf.mxu2 }
 0x473   : > { %v3347_v36 = vadd.f32 %v3283_v56, %v3178_v46 }
 0x475   : > { %v6932_v52 = vadd.f32 %v3797_v43, %v3347_v36  ;;  %v7730_v43 = vld [vmem:[#allocation122_spill] sm:$0xff] }
 0x476   : > { %4473 = vmatmul.msk.bf16.gmra.mxu0 %vm2592_vm4, %v7717_v21  ;;  %v6938_v15 = vpop.f32.mrf.mxu1  ;;  %v3799_v36 = vmul.f32 %v7730_v43, %v7729_v58  ;;  %v3188_v58 = vadd.f32 %v6820_v51, %v6583_v24 }
 0x477   : > { %7723 = vst [vmem:[#allocation11_spill] sm:$0xff] %v6932_v52  ;;  %4418 = vmatmul.msk.bf16.gmra.mxu2 %vm2592_vm4, %v6418_v48  ;;  %v7728_v48 = vld [vmem:[#allocation119_spill] sm:$0xff] }
 0x478   : > { %4449 = vmatmul.msk.bf16.gmra.mxu3 %vm2592_vm4, %v7725_v57  ;;  %v3183_v38 = vadd.f32 %v6792_v0, %v7728_v48 }
 0x479   : > { %4491 = vmatmul.msk.bf16.gmra.mxu1 %vm2592_vm4, %v6027_v39 }
 0x47a   : > { %v3286_v18 = vpop.f32.mrf.mxu2 }
 0x47b   : > { %v3348_v3 = vadd.f32 %v3286_v18, %v3181_v12  ;;  %v7732_v12 = vld [vmem:[#allocation121_spill] sm:$0xff] }
 0x47c   : > { %v3186_v18 = vadd.f32 %v6806_v37, %v7732_v12  ;;  %v7735_v37 = vld [vmem:[#allocation40_spill] sm:$0xff] }
 0x47d   : > { %v6948_v46 = vadd.f32 %v3798_v60, %v3348_v3  ;;  %v7734_v60 = vld [vmem:[#allocation38_spill] sm:$0xff] }
 0x47e   : > { %v6950_v56 = vpop.f32.mrf.mxu1  ;;  %v3800_v3 = vmul.f32 %v6585_v47, %v7734_v60  ;;  %v3191_v47 = vadd.f32 %v6834_v42, %v6593_v19 }
 0x482   : > { %v3288_v6 = vpop.f32.mrf.mxu2 }
 0x483   : > { %v3349_v34 = vadd.f32 %v3288_v6, %v3183_v38 }
 0x485   : > { %v6956_v52 = vadd.f32 %v3799_v36, %v3349_v34  ;;  %v3801_v36 = vmul.f32 %v6596_v31, %v7735_v37  ;;  %v3193_v31 = vadd.f32 %v6848_v50, %v6608_v8 }
 0x486   : > { %4474 = vmatmul.msk.bf16.gmra.mxu0 %vm2592_vm4, %v7725_v57  ;;  %v6961_v39 = vpop.f32.mrf.mxu1 }
 0x487   : > { %3330 = vmatmul.bf16.gmra.mxu2 %v7731_v62 }
 0x488   : > { %4450 = vmatmul.msk.bf16.gmra.mxu3 %vm2592_vm4, %v7733_v29 }
 0x489   : > { %4492 = vmatmul.msk.bf16.gmra.mxu1 %vm2592_vm4, %v7686_v5 }
 0x48a   : > { %v3291_v0 = vpop.f32.mrf.mxu2 }
 0x48b   : > { %v3350_v48 = vadd.f32 %v3291_v0, %v3186_v18  ;;  %v7736_v18 = vld [vmem:[#allocation43_spill] sm:$0xff] }
 0x48c   : > { %v3802_v0 = vmul.f32 %v6613_v53, %v7736_v18  ;;  %v7738_v53 = vld [vmem:[#allocation77_spill] sm:$0xff] }
 0x48d   : > { %v6971_v38 = vadd.f32 %v3800_v3, %v3350_v48  ;;  %v7737_v48 = vld [vmem:[#allocation45_spill] sm:$0xff] }
 0x48e   : > { %v6973_v6 = vpop.f32.mrf.mxu1 }
 0x492   : > { %v3293_v43 = vpop.f32.mrf.mxu2 }
 0x493   : > { %v3351_v34 = vadd.f32 %v3293_v43, %v3188_v58  ;;  %v3803_v58 = vmul.f32 %v6620_v4, %v7737_v48  ;;  %v7740_v4 = vld [vmem:[#allocation123_spill] sm:$0xff] }
 0x495   : > { %v6979_v12 = vadd.f32 %v3801_v36, %v3351_v34  ;;  %v7739_v36 = vld [vmem:[#allocation48_spill] sm:$0xff] }
 0x496   : > { %v6981_v62 = vpop.f32.mrf.mxu1  ;;  %v3804_v34 = vmul.f32 %v6635_v35, %v7739_v36  ;;  %v7743_v35 = vld [vmem:[#allocation124_spill] sm:$0xff]  ;;  %v7746_v36 = vld [vmem:[#allocation13_spill] sm:$0xff] }
 0x499   : > { %4493 = vmatmul.msk.bf16.gmra.mxu1 %vm2592_vm4, %v7691_v61  ;;  %v3196_v61 = vadd.f32 %v6862_v13, %v7738_v53  ;;  %v7744_v53 = vld [vmem:[#allocation52_spill] sm:$0xff] }
 0x49a   : > { %v3296_v5 = vpop.f32.mrf.mxu2 }
 0x49b   : > { %v3352_v24 = vadd.f32 %v3296_v5, %v3191_v47  ;;  %v3198_v5 = vadd.f32 %v6876_v26, %v7740_v4 }
 0x49d   : > { %v6989_v51 = vadd.f32 %v3802_v0, %v3352_v24  ;;  %v7741_v0 = vld [vmem:[#allocation49_spill] sm:$0xff] }
 0x49e   : > { %v6991_v60 = vpop.f32.mrf.mxu1  ;;  %v7742_v24 = vld [vmem:[#allocation125_spill] sm:$0xff] }
 0x4a2   : > { %v3298_v3 = vpop.f32.mrf.mxu2 }
 0x4a3   : > { %v3353_v19 = vadd.f32 %v3298_v3, %v3193_v31  ;;  %v3805_v31 = vmul.f32 %v7742_v24, %v7741_v0  ;;  %v7748_v24 = vld [vmem:[#allocation75_spill] sm:$0xff] }
 0x4a5   : > { %v6997_v42 = vadd.f32 %v3803_v58, %v3353_v19 }
 0x4a6   : > { %v6999_v43 = vpop.f32.mrf.mxu1 }
 0x4a9   : > { %4494 = vmatmul.msk.bf16.gmra.mxu1 %vm2592_vm4, %v7695_v25  ;;  %v3201_v25 = vadd.f32 %v6890_v20, %v7743_v35 }
 0x4aa   : > { %v3301_v37 = vpop.f32.mrf.mxu2 }
 0x4ab   : > { %v3354_v8 = vadd.f32 %v3301_v37, %v3196_v61  ;;  %v7745_v61 = vld [vmem:[#allocation127_spill] sm:$0xff] }
 0x4ac   : > { %v3806_v37 = vmul.f32 %v7745_v61, %v7744_v53  ;;  %v7053_v61 = vpop.f32.mrf.mxu3 }
 0x4ad   : > { %v7007_v50 = vadd.f32 %v3804_v34, %v3354_v8  ;;  %v7026_v34 = vld [vmem:[%s7365_s7] ss:$0 sm:$0xff] }
 0x4ae   : > { %v7009_v47 = vpop.f32.mrf.mxu1 }
 0x4b2   : > { %v3303_v18 = vpop.f32.mrf.mxu2 }
 0x4b3   : > { %v3355_v13 = vadd.f32 %v3303_v18, %v3198_v5  ;;  %v7747_v18 = vld [vmem:[#allocation126_spill] sm:$0xff] }
 0x4b4   : > { %v3203_v0 = vadd.f32 %v6902_v63, %v7747_v18 }
 0x4b5   : > { %v7015_v3 = vadd.f32 %v3805_v31, %v3355_v13 }
 0x4b6   : > { %v3674_v48 = vpop.f32.mrf.mxu1 }
 0x4b7   : > { %v3754_v58 = vadd.f32 %v3674_v48, %v6790_v59  ;;  %v7750_v48 = vld [vmem:[#allocation129_spill] sm:$0xff] }
 0x4b9   : > { %v3850_v26 = vmul.f32 %v3754_v58, %v7746_v36  ;;  %4495 = vmatmul.msk.bf16.gmra.mxu1 %vm2592_vm4, %v7698_v54  ;;  %v7749_v54 = vld [vmem:[#allocation53_spill] sm:$0xff]  ;;  %v7751_v58 = vld [vmem:[#allocation15_spill] sm:$0xff]  ;;  %v7056_v36 = vpop.f32.mrf.mxu0 }
 0x4ba   : > { %v3306_v19 = vpop.f32.mrf.mxu2  ;;  %v3807_v35 = vmul.f32 %v7750_v48, %v7749_v54 }
 0x4bb   : > { %v3356_v8 = vadd.f32 %v3306_v19, %v3201_v25  ;;  %v3882_v4 = vadd.f32 %v3850_v26, %v6788_v44 }
 0x4bd   : > { %v7031_v20 = vadd.f32 %v3806_v37, %v3356_v8  ;;  %v3918_v59 = vadd.f32 %v7026_v34, %v3882_v4  ;;  %v7752_v8 = vld [vmem:[#allocation128_spill] sm:$0xff] }
 0x4be   : > { %v3676_v5 = vpop.f32.mrf.mxu1  ;;  %v3206_v4 = vadd.f32 %v6914_v41, %v7752_v8 }
 0x4bf   : > { %v3950_v31 = vadd.f32 %v3918_v59, %v7748_v24  ;;  %v3755_v13 = vadd.f32 %v3676_v5, %v6800_v22  ;;  %v7753_v59 = vld [vmem:[#allocation76_spill] sm:$0xff]  ;;  %v7754_v24 = vld [vmem:[#allocation58_spill] sm:$0xff] }
 0x4c1   : > { %v3982_v25 = vmax.f32 %v3950_v31, 0.0  ;;  %v3851_v19 = vmul.f32 %v3755_v13, %v7751_v58  ;;  %v7755_v31 = vld [vmem:[#allocation131_spill] sm:$0xff] }
 0x4c2   : > { %v3308_v44 = vpop.f32.mrf.mxu2 }
 0x4c3   : > { %v3357_v53 = vadd.f32 %v3308_v44, %v3203_v0  ;;  %4014 = vst.msk [vmem:[%s7043_s15] sm:$0xff] %vm2592_vm4, %v3982_v25  ;;  %v3883_v22 = vadd.f32 %v3851_v19, %v6798_v10  ;;  %v3808_v10 = vmul.f32 %v7755_v31, %v7754_v24  ;;  %v7756_v44 = vld [vmem:[#allocation20_spill] sm:$0xff]  ;;  %v7073_v25 = vpop.f32.mrf.mxu3  ;;  %v7757_v19 = vld [vmem:[#allocation130_spill] sm:$0xff] }
 0x4c5   : > { %v7051_v63 = vadd.f32 %v3807_v35, %v3357_v53  ;;  %v3919_v37 = vadd.f32 %v7026_v34, %v3883_v22  ;;  %v3208_v53 = vadd.f32 %v6926_v1, %v7757_v19  ;;  %v7758_v22 = vld [vmem:[#allocation78_spill] sm:$0xff]  ;;  %v7764_v19 = vld [vmem:[#allocation3_spill] sm:$0xff] }
 0x4c6   : > { %v3679_v26 = vpop.f32.mrf.mxu1 }
 0x4c7   : > { %v3951_v5 = vadd.f32 %v3919_v37, %v7753_v59  ;;  %v3756_v18 = vadd.f32 %v3679_v26, %v6818_v11  ;;  %v7079_v26 = vpop.f32.mrf.mxu0  ;;  %v7760_v59 = vld [vmem:[#allocation133_spill] sm:$0xff] }
 0x4c9   : > { %v3983_v13 = vmax.f32 %v3951_v5, 0.0  ;;  %v3852_v54 = vmul.f32 %v3756_v18, %v7756_v44  ;;  %4496 = vmatmul.msk.bf16.gmra.mxu1 %vm2592_vm4, %v7701_v30  ;;  %v7761_v18 = vld [vmem:[#allocation17_spill] sm:$0xff] }
 0x4ca   : > { %v3311_v0 = vpop.f32.mrf.mxu2 }
 0x4cb   : > { %v3358_v48 = vadd.f32 %v3311_v0, %v3206_v4  ;;  %4015 = vst.msk [vmem:[%s7043_s15 + $0x8] sm:$0xff] %vm2592_vm4, %v3983_v13  ;;  %v3884_v41 = vadd.f32 %v3852_v54, %v6816_v14  ;;  %v7759_v4 = vld [vmem:[#allocation60_spill] sm:$0xff]  ;;  %v7763_v54 = vld [vmem:[#allocation79_spill] sm:$0xff] }
 0x4cc   : > { %v3809_v14 = vmul.f32 %v7760_v59, %v7759_v4  ;;  %v7762_v13 = vld [vmem:[#allocation132_spill] sm:$0xff] }
 0x4cd   : > { %v7070_v35 = vadd.f32 %v3808_v10, %v3358_v48  ;;  %v3920_v11 = vadd.f32 %v7026_v34, %v3884_v41  ;;  %v3211_v44 = vadd.f32 %v6938_v15, %v7762_v13 }
 0x4ce   : > { %v3681_v58 = vpop.f32.mrf.mxu1 }
 0x4cf   : > { %v3952_v37 = vadd.f32 %v3920_v11, %v7758_v22  ;;  %v3757_v30 = vadd.f32 %v3681_v58, %v6828_v45  ;;  %v7094_v11 = vpop.f32.mrf.mxu3  ;;  %v7101_v4 = vpop.f32.mrf.mxu0 }
 0x4d1   : > { %v3984_v5 = vmax.f32 %v3952_v37, 0.0  ;;  %v3853_v0 = vmul.f32 %v3757_v30, %v7761_v18 }
 0x4d2   : > { %v3313_v8 = vpop.f32.mrf.mxu2 }
 0x4d3   : > { %v3359_v24 = vadd.f32 %v3313_v8, %v3208_v53  ;;  %4016 = vst.msk [vmem:[%s7043_s15 + $0x10] sm:$0xff] %vm2592_vm4, %v3984_v5  ;;  %v3885_v31 = vadd.f32 %v3853_v0, %v6826_v23  ;;  %v7765_v53 = vld [vmem:[#allocation135_spill] sm:$0xff]  ;;  %v7766_v23 = vld [vmem:[#allocation21_spill] sm:$0xff]  ;;  %v7767_v5 = vld [vmem:[#allocation134_spill] sm:$0xff] }
 0x4d4   : > { %v3810_v22 = vmul.f32 %v7765_v53, %v7764_v19  ;;  %v3213_v18 = vadd.f32 %v6950_v56, %v7767_v5  ;;  %v7768_v0 = vld [vmem:[#allocation80_spill] sm:$0xff] }
 0x4d5   : > { %v7087_v1 = vadd.f32 %v3809_v14, %v3359_v24  ;;  %v3921_v10 = vadd.f32 %v7026_v34, %v3885_v31 }
 0x4d6   : > { %v3684_v45 = vpop.f32.mrf.mxu1 }
 0x4d7   : > { %v3953_v48 = vadd.f32 %v3921_v10, %v7763_v54  ;;  %v3758_v41 = vadd.f32 %v3684_v45, %v6846_v17  ;;  %v7769_v10 = vld [vmem:[#allocation66_spill] sm:$0xff]  ;;  %v7770_v45 = vld [vmem:[#allocation137_spill] sm:$0xff]  ;;  %v7771_v54 = vld [vmem:[#allocation23_spill] sm:$0xff]  ;;  %v7123_v19 = vpop.f32.mrf.mxu0 }
 0x4d8   : > { %v3811_v13 = vmul.f32 %v7770_v45, %v7769_v10 }
 0x4d9   : > { %v3985_v37 = vmax.f32 %v3953_v48, 0.0  ;;  %v3854_v30 = vmul.f32 %v3758_v41, %v7766_v23  ;;  %4497 = vmatmul.msk.bf16.gmra.mxu1 %vm2592_vm4, %v7704_v49  ;;  %v7116_v41 = vpop.f32.mrf.mxu3  ;;  %v7773_v23 = vld [vmem:[#allocation81_spill] sm:$0xff] }
 0x4da   : > { %v3316_v58 = vpop.f32.mrf.mxu2 }
 0x4db   : > { %v3360_v8 = vadd.f32 %v3316_v58, %v3211_v44  ;;  %4017 = vst.msk [vmem:[%s7043_s15 + $0x18] sm:$0xff] %vm2592_vm4, %v3985_v37  ;;  %v3886_v17 = vadd.f32 %v3854_v30, %v6844_v33 }
 0x4dd   : > { %v7106_v15 = vadd.f32 %v3810_v22, %v3360_v8  ;;  %v3922_v59 = vadd.f32 %v7026_v34, %v3886_v17  ;;  %v7772_v22 = vld [vmem:[#allocation136_spill] sm:$0xff] }
 0x4de   : > { %v3686_v14 = vpop.f32.mrf.mxu1  ;;  %v3216_v37 = vadd.f32 %v6961_v39, %v7772_v22  ;;  %v7781_v22 = vld [vmem:[#allocation25_spill] sm:$0xff] }
 0x4df   : > { %v3954_v24 = vadd.f32 %v3922_v59, %v7768_v0  ;;  %v3759_v49 = vadd.f32 %v3686_v14, %v6856_v7  ;;  %v7774_v59 = vld [vmem:[#allocation5_spill] sm:$0xff]  ;;  %v7775_v14 = vld [vmem:[#allocation139_spill] sm:$0xff]  ;;  %v7143_v10 = vpop.f32.mrf.mxu0 }
 0x4e0   : > { %v3812_v5 = vmul.f32 %v7775_v14, %v7774_v59  ;;  %v7782_v14 = vld [vmem:[#allocation140_spill] sm:$0xff] }
 0x4e1   : > { %v3986_v44 = vmax.f32 %v3954_v24, 0.0  ;;  %v3855_v48 = vmul.f32 %v3759_v49, %v7771_v54  ;;  %v7778_v54 = vld [vmem:[#allocation82_spill] sm:$0xff] }
 0x4e2   : > { %v3318_v31 = vpop.f32.mrf.mxu2 }
 0x4e3   : > { %v3361_v33 = vadd.f32 %v3318_v31, %v3213_v18  ;;  %4018 = vst.msk [vmem:[%s7043_s15 + $0x20] sm:$0xff] %vm2592_vm4, %v3986_v44  ;;  %v3887_v58 = vadd.f32 %v3855_v48, %v6854_v55  ;;  %v7776_v55 = vld [vmem:[#allocation26_spill] sm:$0xff]  ;;  %v7140_v31 = vpop.f32.mrf.mxu3 }
 0x4e5   : > { %v7121_v56 = vadd.f32 %v3811_v13, %v3361_v33  ;;  %v3923_v7 = vadd.f32 %v7026_v34, %v3887_v58  ;;  %v7777_v13 = vld [vmem:[#allocation138_spill] sm:$0xff]  ;;  %v7779_v58 = vld [vmem:[#allocation68_spill] sm:$0xff] }
 0x4e6   : > { %v3689_v53 = vpop.f32.mrf.mxu1  ;;  %v3218_v44 = vadd.f32 %v6973_v6, %v7777_v13  ;;  %v3589_v6 = vadd.f32 %v7056_v36, %v7053_v61 }
 0x4e7   : > { %v3955_v30 = vadd.f32 %v3923_v7, %v7773_v23  ;;  %v3760_v8 = vadd.f32 %v3689_v53, %v6874_v9  ;;  %v7780_v7 = vld [vmem:[#allocation141_spill] sm:$0xff] }
 0x4e9   : > { %v3987_v18 = vmax.f32 %v3955_v30, 0.0  ;;  %v3856_v0 = vmul.f32 %v3760_v8, %v7776_v55  ;;  %4498 = vmatmul.msk.bf16.gmra.mxu1 %vm2592_vm4, %v7710_v32 }
 0x4ea   : > { %v3321_v17 = vpop.f32.mrf.mxu2 }
 0x4eb   : > { %v3362_v24 = vadd.f32 %v3321_v17, %v3216_v37  ;;  %4019 = vst.msk [vmem:[%s7043_s15 + $0x28] sm:$0xff] %vm2592_vm4, %v3987_v18  ;;  %v3888_v39 = vadd.f32 %v3856_v0, %v6872_v2  ;;  %v3813_v2 = vmul.f32 %v7780_v7, %v7779_v58  ;;  %v7160_v17 = vpop.f32.mrf.mxu3  ;;  %v7783_v18 = vld [vmem:[#allocation83_spill] sm:$0xff]  ;;  %v7787_v58 = vld [vmem:[#allocation92_spill] sm:$0xff] }
 0x4ec   : > { %v3223_v7 = vadd.f32 %v6991_v60, %v7787_v58 }
 0x4ed   : > { %v7138_v49 = vadd.f32 %v3812_v5, %v3362_v24  ;;  %v3924_v9 = vadd.f32 %v7026_v34, %v3888_v39  ;;  %v3221_v5 = vadd.f32 %v6981_v62, %v7782_v14  ;;  %v7165_v24 = vpop.f32.mrf.mxu0  ;;  %v7784_v39 = vld [vmem:[#allocation7_spill] sm:$0xff] }
 0x4ee   : > { %v3691_v45 = vpop.f32.mrf.mxu1 }
 0x4ef   : > { %v3956_v32 = vadd.f32 %v3924_v9, %v7778_v54  ;;  %v3761_v48 = vadd.f32 %v3691_v45, %v6884_v27  ;;  %v7785_v9 = vld [vmem:[#allocation142_spill] sm:$0xff] }
 0x4f0   : > { %v3814_v45 = vmul.f32 %v7785_v9, %v7784_v39  ;;  %v7794_v9 = vld [vmem:[#allocation85_spill] sm:$0xff] }
 0x4f1   : > { %v3988_v53 = vmax.f32 %v3956_v32, 0.0  ;;  %v3857_v37 = vmul.f32 %v3761_v48, %v7781_v22  ;;  %v3591_v32 = vadd.f32 %v7079_v26, %v7073_v25  ;;  %v7792_v26 = vld [vmem:[#allocation96_spill] sm:$0xff] }
 0x4f2   : > { %v3323_v33 = vpop.f32.mrf.mxu2 }
 0x4f3   : > { %v3363_v23 = vadd.f32 %v3323_v33, %v3218_v44  ;;  %4020 = vst.msk [vmem:[%s7043_s15 + $0x30] sm:$0xff] %vm2592_vm4, %v3988_v53  ;;  %v3889_v30 = vadd.f32 %v3857_v37, %v6882_v16  ;;  %v7786_v44 = vld [vmem:[#allocation28_spill] sm:$0xff]  ;;  %v7183_v22 = vpop.f32.mrf.mxu3 }
 0x4f5   : > { %v7155_v8 = vadd.f32 %v3813_v2, %v3363_v23  ;;  %v3925_v27 = vadd.f32 %v7026_v34, %v3889_v30  ;;  %v7788_v2 = vld [vmem:[#allocation84_spill] sm:$0xff]  ;;  %v7789_v23 = vld [vmem:[#allocation70_spill] sm:$0xff]  ;;  %v3603_v25 = vpop.f32.mrf.mxu0 }
 0x4f6   : > { %v3694_v59 = vpop.f32.mrf.mxu1  ;;  %v7790_v30 = vld [vmem:[#allocation144_spill] sm:$0xff] }
 0x4f7   : > { %v3957_v55 = vadd.f32 %v3925_v27, %v7783_v18  ;;  %v3762_v0 = vadd.f32 %v3694_v59, %v3589_v6  ;;  %v7791_v27 = vld [vmem:[#allocation30_spill] sm:$0xff]  ;;  %v3594_v18 = vadd.f32 %v7101_v4, %v7094_v11 }
 0x4f9   : > { %v3989_v13 = vmax.f32 %v3957_v55, 0.0  ;;  %v3858_v61 = vmul.f32 %v3762_v0, %v7786_v44  ;;  %4499 = vmatmul.msk.bf16.gmra.mxu1 %vm2592_vm4, %v7717_v21 }
 0x4fa   : > { %v3326_v16 = vpop.f32.mrf.mxu2 }
 0x4fb   : > { %v3364_v36 = vadd.f32 %v3326_v16, %v3221_v5  ;;  %4021 = vst.msk [vmem:[%s7043_s15 + $0x38] sm:$0xff] %vm2592_vm4, %v3989_v13  ;;  %v3890_v62 = vadd.f32 %v3858_v61, %v6900_v28  ;;  %v3815_v28 = vmul.f32 %v7790_v30, %v7789_v23  ;;  %v7793_v16 = vld [vmem:[#allocation143_spill] sm:$0xff]  ;;  %v7795_v61 = vld [vmem:[#allocation73_spill] sm:$0xff]  ;;  %v3501_v4 = vpop.f32.mrf.mxu3 }
 0x4fc   : > { %v3226_v39 = vadd.f32 %v6999_v43, %v7793_v16 }
 0x4fd   : > { %v7175_v54 = vadd.f32 %v3814_v45, %v3364_v36  ;;  %v3926_v48 = vadd.f32 %v7026_v34, %v3890_v62  ;;  %v7796_v36 = vld [vmem:[#allocation145_spill] sm:$0xff] }
 0x4fe   : > { %v3696_v33 = vpop.f32.mrf.mxu1  ;;  %v3816_v62 = vmul.f32 %v7796_v36, %v7795_v61  ;;  %v7805_v36 = vld [vmem:[#allocation37_spill] sm:$0xff] }
 0x4ff   : > { %v3958_v53 = vadd.f32 %v3926_v48, %v7788_v2  ;;  %v3763_v21 = vadd.f32 %v3696_v33, %v3591_v32  ;;  %v7797_v48 = vld [vmem:[#allocation36_spill] sm:$0xff]  ;;  %v3596_v2 = vadd.f32 %v7123_v19, %v7116_v41  ;;  %v7803_v41 = vld [vmem:[#allocation11_spill] sm:$0xff] }
 0x501   : > { %v3990_v6 = vmax.f32 %v3958_v53, 0.0  ;;  %v3859_v59 = vmul.f32 %v3763_v21, %v7791_v27  ;;  %v7800_v27 = vld [vmem:[#allocation10_spill] sm:$0xff] }
 0x502   : > { %v3328_v37 = vpop.f32.mrf.mxu2 }
 0x503   : > { %v3365_v14 = vadd.f32 %v3328_v37, %v3223_v7  ;;  %4022 = vst.msk [vmem:[%s7043_s15 + $0x40] sm:$0xff] %vm2592_vm4, %v3990_v6  ;;  %v3891_v5 = vadd.f32 %v3859_v59, %v7792_v26  ;;  %v3605_v7 = vpop.f32.mrf.mxu0  ;;  %v7798_v37 = vld [vmem:[#allocation94_spill] sm:$0xff]  ;;  %v7802_v26 = vld [vmem:[#allocation33_spill] sm:$0xff] }
 0x504   : > { %v3228_v23 = vadd.f32 %v7009_v47, %v7798_v37  ;;  %v7801_v59 = vld [vmem:[#allocation146_spill] sm:$0xff]  ;;  %v3599_v47 = vadd.f32 %v7143_v10, %v7140_v31  ;;  %v3601_v31 = vadd.f32 %v7165_v24, %v7160_v17  ;;  %v7807_v37 = vld [vmem:[#allocation39_spill] sm:$0xff] }
 0x505   : > { %v7191_v60 = vadd.f32 %v3815_v28, %v3365_v14  ;;  %v3927_v55 = vadd.f32 %v7026_v34, %v3891_v5  ;;  %v3817_v14 = vmul.f32 %v7801_v59, %v7800_v27  ;;  %v7809_v59 = vld [vmem:[#allocation42_spill] sm:$0xff] }
 0x506   : > { %v3699_v0 = vpop.f32.mrf.mxu1 }
 0x507   : > { %v3959_v45 = vadd.f32 %v3927_v55, %v7794_v9  ;;  %v3764_v13 = vadd.f32 %v3699_v0, %v3594_v18  ;;  %v3504_v0 = vpop.f32.mrf.mxu3 }
 0x509   : > { %v3991_v32 = vmax.f32 %v3959_v45, 0.0  ;;  %v3860_v33 = vmul.f32 %v3764_v13, %v7797_v48  ;;  %4500 = vmatmul.msk.bf16.gmra.mxu1 %vm2592_vm4, %v7725_v57  ;;  %v7799_v57 = vld [vmem:[#allocation86_spill] sm:$0xff]  ;;  %v7804_v45 = vld [vmem:[#allocation87_spill] sm:$0xff] }
 0x50a   : > { %v3331_v44 = vpop.f32.mrf.mxu2 }
 0x50b   : > { %v3366_v11 = vadd.f32 %v3331_v44, %v3226_v39  ;;  %4023 = vst.msk [vmem:[%s7043_s15 + $0x48] sm:$0xff] %vm2592_vm4, %v3991_v32  ;;  %v3892_v43 = vadd.f32 %v3860_v33, %v6924_v40  ;;  %v3608_v39 = vpop.f32.mrf.mxu0 }
 0x50d   : > { %v7207_v58 = vadd.f32 %v3816_v62, %v3366_v11  ;;  %v3928_v53 = vadd.f32 %v7026_v34, %v3892_v43  ;;  %v7806_v11 = vld [vmem:[#allocation88_spill] sm:$0xff] }
 0x50e   : > { %v3701_v21 = vpop.f32.mrf.mxu1 }
 0x50f   : > { %v3960_v30 = vadd.f32 %v3928_v53, %v7799_v57  ;;  %v3765_v28 = vadd.f32 %v3701_v21, %v3596_v2  ;;  %v3506_v48 = vpop.f32.mrf.mxu3  ;;  %v7808_v57 = vld [vmem:[#allocation89_spill] sm:$0xff] }
 0x511   : > { %v3992_v40 = vmax.f32 %v3960_v30, 0.0  ;;  %v3861_v5 = vmul.f32 %v3765_v28, %v7802_v26 }
 0x512   : > { %v3333_v6 = vpop.f32.mrf.mxu2 }
 0x513   : > { %v3367_v18 = vadd.f32 %v3333_v6, %v3228_v23  ;;  %4024 = vst.msk [vmem:[%s7043_s15 + $0x50] sm:$0xff] %vm2592_vm4, %v3992_v40  ;;  %v3893_v19 = vadd.f32 %v3861_v5, %v7803_v41  ;;  %v3610_v53 = vpop.f32.mrf.mxu0  ;;  %v7810_v40 = vmov 0.0|0.0   ;;  %v3606_v5 = vadd.f32 %v3605_v7, %v3501_v4  ;;  %v7813_v7 = vld [vmem:[#allocation91_spill] sm:$0xff] }
 0x515   : > { %v7221_v55 = vadd.f32 %v3817_v14, %v3367_v18  ;;  %v3929_v16 = vadd.f32 %v7026_v34, %v3893_v19  ;;  %v7811_v18 = vld [vmem:[#allocation90_spill] sm:$0xff] }
 0x516   : > { %v3704_v9 = vpop.f32.mrf.mxu1 }
 0x517   : > { %v3961_v13 = vadd.f32 %v3929_v16, %v7804_v45  ;;  %v3766_v44 = vadd.f32 %v3704_v9, %v3599_v47  ;;  %v3509_v6 = vpop.f32.mrf.mxu3  ;;  %v7812_v16 = vld [vmem:[#allocation41_spill] sm:$0xff] }
 0x519   : > { %v3993_v61 = vmax.f32 %v3961_v13, 0.0  ;;  %v3862_v62 = vmul.f32 %v3766_v44, %v7805_v36  ;;  %4501 = vmatmul.msk.bf16.gmra.mxu1 %vm2592_vm4, %v7733_v29 }
 0x51b   : > { %4025 = vst.msk [vmem:[%s7043_s15 + $0x58] sm:$0xff] %vm2592_vm4, %v3993_v61  ;;  %v3894_v32 = vadd.f32 %v3862_v62, %v6948_v46  ;;  %v3604_v46 = vadd.f32 %v3603_v25, %v7183_v22  ;;  %v3613_v26 = vpop.f32.mrf.mxu0  ;;  %v3609_v61 = vadd.f32 %v3608_v39, %v3504_v0  ;;  %v7815_v39 = vld [vmem:[#allocation93_spill] sm:$0xff] }
 0x51d   : > { %v3930_v10 = vadd.f32 %v7026_v34, %v3894_v32 }
 0x51e   : > { %v3706_v33 = vpop.f32.mrf.mxu1 }
 0x51f   : > { %v3962_v43 = vadd.f32 %v3930_v10, %v7806_v11  ;;  %v3767_v2 = vadd.f32 %v3706_v33, %v3601_v31  ;;  %v3511_v45 = vpop.f32.mrf.mxu3  ;;  %v7814_v31 = vld [vmem:[#allocation44_spill] sm:$0xff] }
 0x521   : > { %v3994_v21 = vmax.f32 %v3962_v43, 0.0  ;;  %v3863_v23 = vmul.f32 %v3767_v2, %v7807_v37  ;;  %v3611_v43 = vadd.f32 %v3610_v53, %v3506_v48  ;;  %v7817_v53 = vld [vmem:[#allocation47_spill] sm:$0xff] }
 0x523   : > { %4026 = vst.msk [vmem:[%s7043_s15 + $0x60] sm:$0xff] %vm2592_vm4, %v3994_v21  ;;  %v3895_v29 = vadd.f32 %v3863_v23, %v6956_v52  ;;  %v3615_v44 = vpop.f32.mrf.mxu0 }
 0x525   : > { %v3931_v17 = vadd.f32 %v7026_v34, %v3895_v29  ;;  %v7816_v29 = vld [vmem:[#allocation46_spill] sm:$0xff] }
 0x526   : > { %v3709_v24 = vpop.f32.mrf.mxu1 }
 0x527   : > { %v3963_v30 = vadd.f32 %v3931_v17, %v7808_v57  ;;  %v3768_v28 = vadd.f32 %v3709_v24, %v3604_v46  ;;  %v3514_v11 = vpop.f32.mrf.mxu3  ;;  %v3614_v24 = vadd.f32 %v3613_v26, %v3509_v6  ;;  %v7819_v26 = vld [vmem:[#allocation95_spill] sm:$0xff] }
 0x529   : > { %v3995_v27 = vmax.f32 %v3963_v30, 0.0  ;;  %v3864_v14 = vmul.f32 %v3768_v28, %v7809_v59  ;;  %3748 = vmatmul.bf16.gmra.mxu1 %v7810_v40 }
 0x52b   : > { %4027 = vst.msk [vmem:[%s7043_s15 + $0x68] sm:$0xff] %vm2592_vm4, %v3995_v27  ;;  %v3896_v52 = vadd.f32 %v3864_v14, %v6971_v38  ;;  %v3618_v2 = vpop.f32.mrf.mxu0  ;;  %v7818_v14 = vld [vmem:[#allocation55_spill] sm:$0xff] }
 0x52d   : > { %v3932_v22 = vadd.f32 %v7026_v34, %v3896_v52 }
 0x52e   : > { %v3711_v25 = vpop.f32.mrf.mxu1 }
 0x52f   : > { %v3964_v41 = vadd.f32 %v3932_v22, %v7811_v18  ;;  %v3769_v19 = vadd.f32 %v3711_v25, %v3606_v5  ;;  %v3516_v57 = vpop.f32.mrf.mxu3  ;;  %v3616_v5 = vadd.f32 %v3615_v44, %v3511_v45  ;;  %v7821_v44 = vld [vmem:[#allocation51_spill] sm:$0xff] }
 0x531   : > { %v3996_v47 = vmax.f32 %v3964_v41, 0.0  ;;  %v3865_v9 = vmul.f32 %v3769_v19, %v7812_v16  ;;  %v7820_v19 = vld [vmem:[#allocation50_spill] sm:$0xff] }
 0x533   : > { %4028 = vst.msk [vmem:[%s7043_s15 + $0x70] sm:$0xff] %vm2592_vm4, %v3996_v47  ;;  %v3897_v13 = vadd.f32 %v3865_v9, %v6979_v12  ;;  %v3620_v27 = vpop.f32.mrf.mxu0 }
 0x535   : > { %v3933_v38 = vadd.f32 %v7026_v34, %v3897_v13  ;;  %v3619_v13 = vadd.f32 %v3618_v2, %v3514_v11  ;;  %v7823_v11 = vld [vmem:[#allocation54_spill] sm:$0xff] }
 0x536   : > { %v3714_v4 = vpop.f32.mrf.mxu1 }
 0x537   : > { %v3965_v36 = vadd.f32 %v3933_v38, %v7813_v7  ;;  %v3770_v62 = vadd.f32 %v3714_v4, %v3609_v61  ;;  %v3519_v18 = vpop.f32.mrf.mxu3  ;;  %v7822_v7 = vld [vmem:[#allocation56_spill] sm:$0xff] }
 0x539   : > { %v3997_v32 = vmax.f32 %v3965_v36, 0.0  ;;  %v3866_v10 = vmul.f32 %v3770_v62, %v7814_v31 }
 0x53b   : > { %4029 = vst.msk [vmem:[%s7043_s15 + $0x78] sm:$0xff] %vm2592_vm4, %v3997_v32  ;;  %v3898_v33 = vadd.f32 %v3866_v10, %v6989_v51  ;;  %v3623_v16 = vpop.f32.mrf.mxu0  ;;  %v3621_v10 = vadd.f32 %v3620_v27, %v3516_v57 }
 0x53d   : > { %v3934_v12 = vadd.f32 %v7026_v34, %v3898_v33 }
 0x53e   : > { %v3716_v0 = vpop.f32.mrf.mxu1 }
 0x53f   : > { %v3966_v21 = vadd.f32 %v3934_v12, %v7815_v39  ;;  %v3771_v37 = vadd.f32 %v3716_v0, %v3611_v43  ;;  %v3521_v62 = vpop.f32.mrf.mxu3  ;;  %v7824_v0 = vld [vmem:[#allocation59_spill] sm:$0xff] }
 0x541   : > { %v3998_v23 = vmax.f32 %v3966_v21, 0.0  ;;  %v3867_v46 = vmul.f32 %v3771_v37, %v7816_v29 }
 0x543   : > { %4030 = vst.msk [vmem:[%s7043_s15 + $0x80] sm:$0xff] %vm2592_vm4, %v3998_v23  ;;  %v3899_v17 = vadd.f32 %v3867_v46, %v6997_v42  ;;  %v3625_v31 = vpop.f32.mrf.mxu0  ;;  %v3624_v23 = vadd.f32 %v3623_v16, %v3519_v18 }
 0x545   : > { %v3935_v51 = vadd.f32 %v7026_v34, %v3899_v17  ;;  %v7825_v17 = vld [vmem:[#allocation57_spill] sm:$0xff] }
 0x546   : > { %v3719_v48 = vpop.f32.mrf.mxu1 }
 0x547   : > { %v3967_v30 = vadd.f32 %v3935_v51, %v7817_v53  ;;  %v3772_v28 = vadd.f32 %v3719_v48, %v3614_v24  ;;  %v3524_v37 = vpop.f32.mrf.mxu3  ;;  %v7826_v48 = vld [vmem:[#allocation62_spill] sm:$0xff] }
 0x549   : > { %v3999_v59 = vmax.f32 %v3967_v30, 0.0  ;;  %v3868_v40 = vmul.f32 %v3772_v28, %v7818_v14  ;;  %v3626_v28 = vadd.f32 %v3625_v31, %v3521_v62  ;;  %v7827_v14 = vld [vmem:[#allocation61_spill] sm:$0xff] }
 0x54b   : > { %4031 = vst.msk [vmem:[%s7043_s15 + $0x88] sm:$0xff] %vm2592_vm4, %v3999_v59  ;;  %v3900_v52 = vadd.f32 %v3868_v40, %v7007_v50  ;;  %v3628_v29 = vpop.f32.mrf.mxu0 }
 0x54d   : > { %v3936_v42 = vadd.f32 %v7026_v34, %v3900_v52 }
 0x54e   : > { %v3721_v6 = vpop.f32.mrf.mxu1 }
 0x54f   : > { %v3968_v22 = vadd.f32 %v3936_v42, %v7819_v26  ;;  %v3773_v25 = vadd.f32 %v3721_v6, %v3616_v5  ;;  %v3526_v27 = vpop.f32.mrf.mxu3  ;;  %v7828_v6 = vld [vmem:[#allocation2_spill] sm:$0xff] }
 0x551   : > { %v4000_v41 = vmax.f32 %v3968_v22, 0.0  ;;  %v3869_v47 = vmul.f32 %v3773_v25, %v7820_v19  ;;  %v3629_v25 = vadd.f32 %v3628_v29, %v3524_v37 }
 0x553   : > { %4032 = vst.msk [vmem:[%s7043_s15 + $0x90] sm:$0xff] %vm2592_vm4, %v4000_v41  ;;  %v3901_v9 = vadd.f32 %v3869_v47, %v7015_v3  ;;  %v3630_v5 = vpop.f32.mrf.mxu0  ;;  %v7829_v41 = vld [vmem:[#allocation63_spill] sm:$0xff] }
 0x555   : > { %v3937_v50 = vadd.f32 %v7026_v34, %v3901_v9 }
 0x556   : > { %v3724_v45 = vpop.f32.mrf.mxu1 }
 0x557   : > { %v3969_v61 = vadd.f32 %v3937_v50, %v7821_v44  ;;  %v3774_v38 = vadd.f32 %v3724_v45, %v3619_v13  ;;  %v3529_v16 = vpop.f32.mrf.mxu3  ;;  %v7830_v13 = vld [vmem:[#allocation64_spill] sm:$0xff] }
 0x559   : > { %v4001_v4 = vmax.f32 %v3969_v61, 0.0  ;;  %v3870_v36 = vmul.f32 %v3774_v38, %v7822_v7  ;;  %v3631_v61 = vadd.f32 %v3630_v5, %v3526_v27 }
 0x55b   : > { %4033 = vst.msk [vmem:[%s7043_s15 + $0x98] sm:$0xff] %vm2592_vm4, %v4001_v4  ;;  %v3902_v32 = vadd.f32 %v3870_v36, %v7031_v20  ;;  %v3633_v45 = vpop.f32.mrf.mxu0  ;;  %v7831_v4 = vld [vmem:[#allocation65_spill] sm:$0xff] }
 0x55d   : > { %v3938_v3 = vadd.f32 %v7026_v34, %v3902_v32  ;;  %v7832_v32 = vld [vmem:[#allocation4_spill] sm:$0xff] }
 0x55e   : > { %v3726_v33 = vpop.f32.mrf.mxu1 }
 0x55f   : > { %v3970_v43 = vadd.f32 %v3938_v3, %v7823_v11  ;;  %v3775_v12 = vadd.f32 %v3726_v33, %v3621_v10  ;;  %v3531_v10 = vpop.f32.mrf.mxu3  ;;  %v3634_v11 = vadd.f32 %v3633_v45, %v3529_v16 }
 0x561   : > { %v4002_v2 = vmax.f32 %v3970_v43, 0.0  ;;  %v3871_v39 = vmul.f32 %v3775_v12, %v7824_v0  ;;  %v7833_v12 = vld [vmem:[#allocation67_spill] sm:$0xff] }
 0x563   : > { %4034 = vst.msk [vmem:[%s7043_s15 + $0xa0] sm:$0xff] %vm2592_vm4, %v4002_v2  ;;  %v3903_v21 = vadd.f32 %v3871_v39, %v7051_v63  ;;  %v3635_v33 = vpop.f32.mrf.mxu0 }
 0x564   : > { %v3636_v29 = vadd.f32 %v3635_v33, %v3531_v10 }
 0x565   : > { %v3939_v20 = vadd.f32 %v7026_v34, %v3903_v21  ;;  %v7834_v21 = vld [vmem:[#allocation99_spill] sm:$0xff] }
 0x566   : > { %v3729_v46 = vpop.f32.mrf.mxu1 }
 0x567   : > { %v3971_v24 = vadd.f32 %v3939_v20, %v7825_v17  ;;  %v3776_v51 = vadd.f32 %v3729_v46, %v3624_v23  ;;  %v3534_v20 = vpop.f32.mrf.mxu3 }
 0x569   : > { %v4003_v57 = vmax.f32 %v3971_v24, 0.0  ;;  %v3872_v53 = vmul.f32 %v3776_v51, %v7826_v48  ;;  %v7835_v24 = vld [vmem:[#allocation101_spill] sm:$0xff] }
 0x56b   : > { %4035 = vst.msk [vmem:[%s7043_s15 + $0xa8] sm:$0xff] %vm2592_vm4, %v4003_v57  ;;  %v3904_v30 = vadd.f32 %v3872_v53, %v7070_v35  ;;  %v3638_v46 = vpop.f32.mrf.mxu0  ;;  %v7836_v53 = vld [vmem:[#allocation6_spill] sm:$0xff] }
 0x56d   : > { %v3940_v63 = vadd.f32 %v7026_v34, %v3904_v30 }
 0x56e   : > { %v3731_v59 = vpop.f32.mrf.mxu1 }
 0x56f   : > { %v3972_v40 = vadd.f32 %v3940_v63, %v7827_v14  ;;  %v3777_v52 = vadd.f32 %v3731_v59, %v3626_v28  ;;  %v3639_v63 = vadd.f32 %v3638_v46, %v3534_v20  ;;  %v3536_v27 = vpop.f32.mrf.mxu3  ;;  %v7837_v14 = vld [vmem:[#allocation69_spill] sm:$0xff] }
 0x571   : > { %v4004_v42 = vmax.f32 %v3972_v40, 0.0  ;;  %v3873_v26 = vmul.f32 %v3777_v52, %v7828_v6  ;;  %v7838_v6 = vld [vmem:[#allocation8_spill] sm:$0xff] }
 0x573   : > { %4036 = vst.msk [vmem:[%s7043_s15 + $0xb0] sm:$0xff] %vm2592_vm4, %v4004_v42  ;;  %v3905_v22 = vadd.f32 %v3873_v26, %v7087_v1  ;;  %v3640_v5 = vpop.f32.mrf.mxu0 }
 0x575   : > { %v3941_v35 = vadd.f32 %v7026_v34, %v3905_v22 }
 0x576   : > { %v3734_v18 = vpop.f32.mrf.mxu1 }
 0x577   : > { %v3973_v19 = vadd.f32 %v3941_v35, %v7829_v41  ;;  %v3778_v47 = vadd.f32 %v3734_v18, %v3629_v25  ;;  %v3641_v25 = vadd.f32 %v3640_v5, %v3536_v27  ;;  %v7839_v18 = vld [vmem:[#allocation71_spill] sm:$0xff] }
 0x579   : > { %v4005_v9 = vmax.f32 %v3973_v19, 0.0  ;;  %v3874_v50 = vmul.f32 %v3778_v47, %v7830_v13  ;;  %v3539_v47 = vpop.f32.mrf.mxu3 }
 0x57b   : > { %4037 = vst.msk [vmem:[%s7043_s15 + $0xb8] sm:$0xff] %vm2592_vm4, %v4005_v9  ;;  %v3906_v44 = vadd.f32 %v3874_v50, %v7106_v15  ;;  %v7840_v9 = vld [vmem:[#allocation103_spill] sm:$0xff]  ;;  %v3643_v50 = vpop.f32.mrf.mxu0 }
 0x57d   : > { %v3942_v1 = vadd.f32 %v7026_v34, %v3906_v44  ;;  %v3644_v44 = vadd.f32 %v3643_v50, %v3539_v47 }
 0x57e   : > { %v3736_v38 = vpop.f32.mrf.mxu1 }
 0x57f   : > { %v3974_v7 = vadd.f32 %v3942_v1, %v7831_v4  ;;  %v3779_v36 = vadd.f32 %v3736_v38, %v3631_v61  ;;  %v7841_v1 = vld [vmem:[#allocation72_spill] sm:$0xff] }
 0x581   : > { %v4006_v62 = vmax.f32 %v3974_v7, 0.0  ;;  %v3875_v31 = vmul.f32 %v3779_v36, %v7832_v32  ;;  %v7842_v36 = vld [vmem:[#allocation104_spill] sm:$0xff]  ;;  %v3541_v32 = vpop.f32.mrf.mxu3 }
 0x583   : > { %4038 = vst.msk [vmem:[%s7043_s15 + $0xc0] sm:$0xff] %vm2592_vm4, %v4006_v62  ;;  %v3907_v3 = vadd.f32 %v3875_v31, %v7121_v56  ;;  %v3645_v10 = vpop.f32.mrf.mxu0 }
 0x585   : > { %v3943_v15 = vadd.f32 %v7026_v34, %v3907_v3  ;;  %v3646_v3 = vadd.f32 %v3645_v10, %v3541_v32 }
 0x586   : > { %v3739_v43 = vpop.f32.mrf.mxu1 }
 0x587   : > { %v3975_v2 = vadd.f32 %v3943_v15, %v7833_v12  ;;  %v3780_v0 = vadd.f32 %v3739_v43, %v3634_v11  ;;  %v7843_v11 = vld [vmem:[#allocation9_spill] sm:$0xff] }
 0x589   : > { %v4007_v39 = vmax.f32 %v3975_v2, 0.0  ;;  %v3876_v37 = vmul.f32 %v3780_v0, %v7834_v21  ;;  %v7844_v2 = vld [vmem:[#allocation106_spill] sm:$0xff] }
 0x58b   : > { %4039 = vst.msk [vmem:[%s7043_s15 + $0xc8] sm:$0xff] %vm2592_vm4, %v4007_v39  ;;  %v3908_v23 = vadd.f32 %v3876_v37, %v7138_v49  ;;  %v7845_v37 = vld [vmem:[#allocation74_spill] sm:$0xff] }
 0x58d   : > { %v3944_v56 = vadd.f32 %v7026_v34, %v3908_v23 }
 0x58e   : > { %v3741_v17 = vpop.f32.mrf.mxu1 }
 0x58f   : > { %v3976_v51 = vadd.f32 %v3944_v56, %v7835_v24  ;;  %v3781_v57 = vadd.f32 %v3741_v17, %v3636_v29 }
 0x591   : > { %v4008_v48 = vmax.f32 %v3976_v51, 0.0  ;;  %v3877_v30 = vmul.f32 %v3781_v57, %v7836_v53 }
 0x593   : > { %4040 = vst.msk [vmem:[%s7043_s15 + $0xd0] sm:$0xff] %vm2592_vm4, %v4008_v48  ;;  %v3909_v28 = vadd.f32 %v3877_v30, %v7155_v8 }
 0x595   : > { %v3945_v49 = vadd.f32 %v7026_v34, %v3909_v28 }
 0x596   : > { %v3744_v59 = vpop.f32.mrf.mxu1 }
 0x597   : > { %v3977_v40 = vadd.f32 %v3945_v49, %v7837_v14  ;;  %v3782_v52 = vadd.f32 %v3744_v59, %v3639_v63 }
 0x599   : > { %v4009_v42 = vmax.f32 %v3977_v40, 0.0  ;;  %v3878_v26 = vmul.f32 %v3782_v52, %v7838_v6 }
 0x59b   : > { %4041 = vst.msk [vmem:[%s7043_s15 + $0xd8] sm:$0xff] %vm2592_vm4, %v4009_v42  ;;  %v3910_v22 = vadd.f32 %v3878_v26, %v7175_v54 }
 0x59d   : > { %v3946_v8 = vadd.f32 %v7026_v34, %v3910_v22 }
 0x59e   : > { %v3746_v35 = vpop.f32.mrf.mxu1 }
 0x59f   : > { %v3978_v41 = vadd.f32 %v3946_v8, %v7839_v18  ;;  %v3783_v19 = vadd.f32 %v3746_v35, %v3641_v25 }
 0x5a1   : > { %v4010_v16 = vmax.f32 %v3978_v41, 0.0  ;;  %v3879_v13 = vmul.f32 %v3783_v19, %v7840_v9 }
 0x5a3   : > { %4042 = vst.msk [vmem:[%s7043_s15 + $0xe0] sm:$0xff] %vm2592_vm4, %v4010_v16  ;;  %v3911_v45 = vadd.f32 %v3879_v13, %v7191_v60 }
 0x5a5   : > { %v3947_v54 = vadd.f32 %v7026_v34, %v3911_v45 }
 0x5a6   : > { %v3749_v61 = vpop.f32.mrf.mxu1 }
 0x5a7   : > { %v3979_v38 = vadd.f32 %v3947_v54, %v7841_v1  ;;  %v3784_v4 = vadd.f32 %v3749_v61, %v3644_v44 }
 0x5a9   : > { %v4011_v7 = vmax.f32 %v3979_v38, 0.0  ;;  %v3880_v62 = vmul.f32 %v3784_v4, %v7842_v36 }
 0x5ab   : > { %4043 = vst.msk [vmem:[%s7043_s15 + $0xe8] sm:$0xff] %vm2592_vm4, %v4011_v7  ;;  %v3912_v31 = vadd.f32 %v3880_v62, %v7207_v58 }
 0x5ad   : > { %v3948_v60 = vadd.f32 %v7026_v34, %v3912_v31 }
 0x5ae   : > { %v3751_v33 = vpop.f32.mrf.mxu1 }
 0x5af   : > { %v3980_v15 = vadd.f32 %v3948_v60, %v7843_v11  ;;  %v3785_v43 = vadd.f32 %v3751_v33, %v3646_v3 }
 0x5b1   : > { %v4012_v12 = vmax.f32 %v3980_v15, 0.0  ;;  %v3881_v0 = vmul.f32 %v3785_v43, %v7844_v2 }
 0x5b3   : > { %4044 = vst.msk [vmem:[%s7043_s15 + $0xf0] sm:$0xff] %vm2592_vm4, %v4012_v12  ;;  %v3913_v39 = vadd.f32 %v3881_v0, %v7221_v55 }
 0x5b5   : > { %v3949_v21 = vadd.f32 %v7026_v34, %v3913_v39 }
 0x5b7   : > { %v3981_v23 = vadd.f32 %v3949_v21, %v7845_v37 }
 0x5b9   : > { %v4013_v58 = vmax.f32 %v3981_v23, 0.0 }
 0x5bb   : > { %4045 = vst.msk [vmem:[%s7043_s15 + $0xf8] sm:$0xff] %vm2592_vm4, %v4013_v58 }
 0x5bc PF: > { %s18_s27 = sadd.s32 1, %s4622_s27  }
 0x5bd   : > { %p15_p4 = scmp.ge.s32.totalorder %s18_s27, 4  }
 0x5bf   :  { %17 = sbr.rel (!%p15_p4) target bundleno = 1 (0x1), region = 98 }

</bundles_post_ra>
